<compile_context>
chip_gen: v7x
topology: tpu7x:2x2x1
jax: 0.10.0
libtpu: 0.0.40
codegen_flags: <defaults>
</compile_context>

<pallas_src>
import jax
import jax.numpy as jnp
from jax import lax
from jax.experimental import pallas as pl
from jax.experimental.pallas import tpu as pltpu


def basic_block_kernel(xpad_ref, w1_ref, w2_ref, s1_ref, b1_ref, s2_ref, b2_ref,
                       o_ref, mid_ref):
    """NB batch elements per grid step.

    xpad_ref : (NB, H+2, W+2, C)  zero-padded input tile (NHWC), f32
    w1_ref   : (9, C, C)          conv1 taps, tap-major (dh*3+dw), bf16
    w2_ref   : (9, C, C)          conv2 taps, bf16
    s*/b*    : (1, C)             folded BN scale / shift, f32
    o_ref    : (NB, H, W, C)      output, f32
    mid_ref  : (H+2, W+2, C)      VMEM scratch (re-padded intermediate), bf16
    """
    NB, Hp, Wp, C = xpad_ref.shape
    H, W = Hp - 2, Wp - 2

    # Hoist per-channel BN broadcasts once per invocation (not per tap / image).
    s1 = s1_ref[...]
    b1 = b1_ref[...]
    s2 = s2_ref[...]
    b2 = b2_ref[...]

    # Zero the scratch pad once per step; only its interior is rewritten below,
    # so its 1-pixel border provides the zero padding for conv2.
    mid_ref[...] = jnp.zeros_like(mid_ref)

    for nb in range(NB):
        # ---- conv1: 3x3 as 9 shifted (H*W, C) @ (C, C) bf16 MXU matmuls ----
        acc = jnp.zeros((H * W, C), jnp.float32)
        for t in range(9):
            dh, dw = divmod(t, 3)
            patch = xpad_ref[nb, dh:dh + H, dw:dw + W, :]          # ref-slice load
            patch = patch.reshape(H * W, C).astype(jnp.bfloat16)
            acc = acc + jnp.dot(patch, w1_ref[t],
                                preferred_element_type=jnp.float32)

        # ---- BN1 + ReLU (f32) -> store interior of the scratch pad (bf16) ----
        y = jnp.maximum(acc * s1 + b1, 0.0)
        mid_ref[1:H + 1, 1:W + 1, :] = y.reshape(H, W, C).astype(jnp.bfloat16)

        # ---- conv2: taps read straight from the scratch pad ----
        acc2 = jnp.zeros((H * W, C), jnp.float32)
        for t in range(9):
            dh, dw = divmod(t, 3)
            patch = mid_ref[dh:dh + H, dw:dw + W, :].reshape(H * W, C)
            acc2 = acc2 + jnp.dot(patch, w2_ref[t],
                                  preferred_element_type=jnp.float32)

        # ---- BN2 + identity residual + ReLU (all f32) ----
        resid = xpad_ref[nb, 1:H + 1, 1:W + 1, :].reshape(H * W, C)
        out = jnp.maximum(acc2 * s2 + b2 + resid, 0.0)
        o_ref[nb] = out.reshape(H, W, C).astype(o_ref.dtype)


def _round_up(x, m):
    return (x + m - 1) // m * m


def _pick_batch_block(n, max_nb=4):
    # Keep at least 2 grid steps when possible (so v7x can shard the batch axis
    # across its two TensorCores), while amortizing per-step pipeline overhead.
    upper = max(1, min(max_nb, n // 2))
    for nb in range(upper, 0, -1):
        if n % nb == 0:
            return nb
    return 1


def basic_block_pallas(x_nhwc, w1_taps, w2_taps, s1, b1, s2, b2):
    """x_nhwc: (N, H, W, C) f32. w*_taps: (9, C, C). Returns (N, H, W, C) f32."""
    N, H, W, C = x_nhwc.shape
    assert w1_taps.shape[-1] == C, "identity shortcut requires in_features == init_features"

    # ---- layout plumbing (plain JAX glue) ----
    LANE = 128
    Cp = _round_up(max(C, LANE), LANE)
    pc = Cp - C

    # Zero-pad channels to a lane-dense multiple of 128 and spatial dims by 1.
    # Padded channels stay exactly zero through both convs (zero weights, zero
    # BN scale/shift) and through the identity shortcut (zero-padded x).
    x_pad = jnp.pad(x_nhwc, ((0, 0), (1, 1), (1, 1), (0, pc)))
    w1p = jnp.pad(w1_taps, ((0, 0), (0, pc), (0, pc))).astype(jnp.bfloat16)
    w2p = jnp.pad(w2_taps, ((0, 0), (0, pc), (0, pc))).astype(jnp.bfloat16)
    s1p = jnp.pad(s1, ((0, 0), (0, pc)))
    b1p = jnp.pad(b1, ((0, 0), (0, pc)))
    s2p = jnp.pad(s2, ((0, 0), (0, pc)))
    b2p = jnp.pad(b2, ((0, 0), (0, pc)))

    NB = _pick_batch_block(N)

    out_padded = pl.pallas_call(
        basic_block_kernel,
        out_shape=jax.ShapeDtypeStruct((N, H, W, Cp), x_nhwc.dtype),
        grid=(N // NB,),
        in_specs=[
            pl.BlockSpec((NB, H + 2, W + 2, Cp), lambda n: (n, 0, 0, 0)),
            pl.BlockSpec((9, Cp, Cp), lambda n: (0, 0, 0)),
            pl.BlockSpec((9, Cp, Cp), lambda n: (0, 0, 0)),
            pl.BlockSpec((1, Cp), lambda n: (0, 0)),
            pl.BlockSpec((1, Cp), lambda n: (0, 0)),
            pl.BlockSpec((1, Cp), lambda n: (0, 0)),
            pl.BlockSpec((1, Cp), lambda n: (0, 0)),
        ],
        out_specs=pl.BlockSpec((NB, H, W, Cp), lambda n: (n, 0, 0, 0)),
        scratch_shapes=[pltpu.VMEM((H + 2, W + 2, Cp), jnp.bfloat16)],
        compiler_params=pltpu.CompilerParams(
            dimension_semantics=("parallel",)),
    )(x_pad, w1p, w2p, s1p, b1p, s2p, b2p)

    return out_padded[..., :C]


# ---------------------- pure-JAX reference (NCHW, like PyTorch) ----------------------
def _bn(x_nchw, gamma, beta, mean, var, eps):
    inv = gamma / jnp.sqrt(var + eps)
    return x_nchw * inv[None, :, None, None] + (beta - mean * inv)[None, :, None, None]


def basic_block_ref(x_nchw, w1_oihw, w2_oihw, bn1, bn2, eps=1e-5):
    dn = ("NCHW", "OIHW", "NCHW")
    y = lax.conv_general_dilated(x_nchw, w1_oihw, (1, 1), ((1, 1), (1, 1)),
                                 dimension_numbers=dn)
    y = jnp.maximum(_bn(y, *bn1, eps), 0.0)
    y = lax.conv_general_dilated(y, w2_oihw, (1, 1), ((1, 1), (1, 1)),
                                 dimension_numbers=dn)
    y = _bn(y, *bn2, eps)
    return jnp.maximum(y + x_nchw, 0.0)


if __name__ == "__main__":
    # Small deterministic problem: BasicBlock(in_features=8, init_features=8, stride=1)
    N, C, H, W = 2, 8, 16, 16
    eps = 1e-5

    key = jax.random.PRNGKey(0)
    ks = jax.random.split(key, 12)

    x_nchw = jax.random.normal(ks[0], (N, C, H, W), jnp.float32)

    # Conv weights, PyTorch layout (Cout, Cin, 3, 3), bias=False
    w1_oihw = 0.1 * jax.random.normal(ks[1], (C, C, 3, 3), jnp.float32)
    w2_oihw = 0.1 * jax.random.normal(ks[2], (C, C, 3, 3), jnp.float32)

    # BatchNorm params (inference form: gamma, beta, running_mean, running_var)
    g1 = 1.0 + 0.1 * jax.random.normal(ks[3], (C,), jnp.float32)
    b1 = 0.1 * jax.random.normal(ks[4], (C,), jnp.float32)
    m1 = 0.1 * jax.random.normal(ks[5], (C,), jnp.float32)
    v1 = jnp.abs(jax.random.normal(ks[6], (C,), jnp.float32)) + 0.5
    g2 = 1.0 + 0.1 * jax.random.normal(ks[7], (C,), jnp.float32)
    b2 = 0.1 * jax.random.normal(ks[8], (C,), jnp.float32)
    m2 = 0.1 * jax.random.normal(ks[9], (C,), jnp.float32)
    v2 = jnp.abs(jax.random.normal(ks[10], (C,), jnp.float32)) + 0.5

    # --- parameter plumbing for the kernel (glue, plain JAX) ---
    # OIHW -> HWIO -> tap-major (9, Cin, Cout)
    w1_taps = jnp.transpose(w1_oihw, (2, 3, 1, 0)).reshape(9, C, C)
    w2_taps = jnp.transpose(w2_oihw, (2, 3, 1, 0)).reshape(9, C, C)
    # fold BN into per-channel scale/shift, shaped (1, C) for lane broadcast
    s1 = (g1 / jnp.sqrt(v1 + eps)).reshape(1, C)
    sh1 = (b1 - m1 * g1 / jnp.sqrt(v1 + eps)).reshape(1, C)
    s2 = (g2 / jnp.sqrt(v2 + eps)).reshape(1, C)
    sh2 = (b2 - m2 * g2 / jnp.sqrt(v2 + eps)).reshape(1, C)

    # NCHW -> NHWC for the kernel
    x_nhwc = jnp.transpose(x_nchw, (0, 2, 3, 1))

    out_nhwc = basic_block_pallas(x_nhwc, w1_taps, w2_taps, s1, sh1, s2, sh2)
    out_nhwc = jax.block_until_ready(out_nhwc)
    out_nchw = jnp.transpose(out_nhwc, (0, 3, 1, 2))

    ref = basic_block_ref(x_nchw, w1_oihw, w2_oihw, (g1, b1, m1, v1),
                          (g2, b2, m2, v2), eps)
    # Tolerance loosened for bf16 MXU inputs (two convs); BN/residual stay f32.
    assert jnp.allclose(out_nchw, ref, rtol=5e-2, atol=5e-2), (
        float(jnp.max(jnp.abs(out_nchw - ref))))

    print("KERNEL_OK")
</pallas_src>

<mosaic_0001>
module attributes {stable_mosaic.version = 11 : i64} {
  func.func @basic_block_kernel(%arg0: i32, %arg1: memref<1x18x18x128xf32, #tpu.memory_space<vmem>>, %arg2: memref<9x128x128xbf16, #tpu.memory_space<vmem>>, %arg3: memref<9x128x128xbf16, #tpu.memory_space<vmem>>, %arg4: memref<1x128xf32, #tpu.memory_space<vmem>>, %arg5: memref<1x128xf32, #tpu.memory_space<vmem>>, %arg6: memref<1x128xf32, #tpu.memory_space<vmem>>, %arg7: memref<1x128xf32, #tpu.memory_space<vmem>>, %arg8: memref<1x16x16x128xf32, #tpu.memory_space<vmem>>, %arg9: memref<18x18x128xbf16, #tpu.memory_space<vmem>>) attributes {dimension_semantics = [#tpu.dimension_semantics<parallel>], iteration_bounds = array<i64: 2>, scalar_prefetch = 0 : i64, scratch_operands = 1 : i64, tpu.core_type = #tpu.core_type<tc>, window_params = [{transform_indices = @transform_0, window_bounds = array<i64: 1, 18, 18, 128>}, {pipeline_mode = #tpu.pipeline_mode<synchronous>, transform_indices = @transform_1, window_bounds = array<i64: 9, 128, 128>}, {pipeline_mode = #tpu.pipeline_mode<synchronous>, transform_indices = @transform_2, window_bounds = array<i64: 9, 128, 128>}, {pipeline_mode = #tpu.pipeline_mode<synchronous>, transform_indices = @transform_3, window_bounds = array<i64: 1, 128>}, {pipeline_mode = #tpu.pipeline_mode<synchronous>, transform_indices = @transform_4, window_bounds = array<i64: 1, 128>}, {pipeline_mode = #tpu.pipeline_mode<synchronous>, transform_indices = @transform_5, window_bounds = array<i64: 1, 128>}, {pipeline_mode = #tpu.pipeline_mode<synchronous>, transform_indices = @transform_6, window_bounds = array<i64: 1, 128>}, {transform_indices = @transform_7, window_bounds = array<i64: 1, 16, 16, 128>}]} {
    %c0 = arith.constant 0 : index
    %c0_0 = arith.constant 0 : index
    %0 = vector.load %arg4[%c0, %c0_0] : memref<1x128xf32, #tpu.memory_space<vmem>>, vector<1x128xf32>
    %c0_1 = arith.constant 0 : index
    %c0_2 = arith.constant 0 : index
    %1 = vector.load %arg5[%c0_1, %c0_2] : memref<1x128xf32, #tpu.memory_space<vmem>>, vector<1x128xf32>
    %c0_3 = arith.constant 0 : index
    %c0_4 = arith.constant 0 : index
    %2 = vector.load %arg6[%c0_3, %c0_4] : memref<1x128xf32, #tpu.memory_space<vmem>>, vector<1x128xf32>
    %c0_5 = arith.constant 0 : index
    %c0_6 = arith.constant 0 : index
    %3 = vector.load %arg7[%c0_5, %c0_6] : memref<1x128xf32, #tpu.memory_space<vmem>>, vector<1x128xf32>
    %cst = arith.constant 0.000000e+00 : bf16
    %4 = vector.broadcast %cst : bf16 to vector<18x18x128xbf16>
    %c0_7 = arith.constant 0 : index
    %c0_8 = arith.constant 0 : index
    %c0_9 = arith.constant 0 : index
    %5 = vector.load %arg9[%c0_7, %c0_8, %c0_9] : memref<18x18x128xbf16, #tpu.memory_space<vmem>>, vector<18x18x128xbf16>
    tpu.vector_store %arg9[%c0_7, %c0_8, %c0_9], %4 {strides = array<i32>} : memref<18x18x128xbf16, #tpu.memory_space<vmem>>, vector<18x18x128xbf16>,
    %cst_10 = arith.constant 0.000000e+00 : f32
    %6 = vector.broadcast %cst_10 : f32 to vector<256x128xf32>
    %c0_11 = arith.constant 0 : index
    %c0_12 = arith.constant 0 : index
    %c0_13 = arith.constant 0 : index
    %c0_14 = arith.constant 0 : index
    %7 = vector.load %arg1[%c0_11, %c0_12, %c0_13, %c0_14] : memref<1x18x18x128xf32, #tpu.memory_space<vmem>>, vector<1x16x16x128xf32>
    %8 = vector.shape_cast %7 : vector<1x16x16x128xf32> to vector<16x16x128xf32>
    %9 = vector.shape_cast %8 : vector<16x16x128xf32> to vector<256x128xf32>
    %10 = arith.truncf %9 : vector<256x128xf32> to vector<256x128xbf16>
    %c0_15 = arith.constant 0 : index
    %c0_16 = arith.constant 0 : index
    %c0_17 = arith.constant 0 : index
    %11 = vector.load %arg2[%c0_15, %c0_16, %c0_17] : memref<9x128x128xbf16, #tpu.memory_space<vmem>>, vector<1x128x128xbf16>
    %12 = vector.shape_cast %11 : vector<1x128x128xbf16> to vector<128x128xbf16>
    %cst_18 = arith.constant dense<0.000000e+00> : vector<256x128xf32>
    %13 = tpu.matmul %10, %12, %cst_18 {dimension_numbers = #tpu.dot_dimension_numbers<[1], [0], [0], [1], [0, 0, 1, 1], [], []>} : vector<256x128xbf16>, vector<128x128xbf16>, vector<256x128xf32> -> vector<256x128xf32>
    %14 = arith.addf %6, %13 : vector<256x128xf32>
    %c0_19 = arith.constant 0 : index
    %c0_20 = arith.constant 0 : index
    %c1 = arith.constant 1 : index
    %c0_21 = arith.constant 0 : index
    %15 = vector.load %arg1[%c0_19, %c0_20, %c1, %c0_21] : memref<1x18x18x128xf32, #tpu.memory_space<vmem>>, vector<1x16x16x128xf32>
    %16 = vector.shape_cast %15 : vector<1x16x16x128xf32> to vector<16x16x128xf32>
    %17 = vector.shape_cast %16 : vector<16x16x128xf32> to vector<256x128xf32>
    %18 = arith.truncf %17 : vector<256x128xf32> to vector<256x128xbf16>
    %c1_22 = arith.constant 1 : index
    %c0_23 = arith.constant 0 : index
    %c0_24 = arith.constant 0 : index
    %19 = vector.load %arg2[%c1_22, %c0_23, %c0_24] : memref<9x128x128xbf16, #tpu.memory_space<vmem>>, vector<1x128x128xbf16>
    %20 = vector.shape_cast %19 : vector<1x128x128xbf16> to vector<128x128xbf16>
    %cst_25 = arith.constant dense<0.000000e+00> : vector<256x128xf32>
    %21 = tpu.matmul %18, %20, %cst_25 {dimension_numbers = #tpu.dot_dimension_numbers<[1], [0], [0], [1], [0, 0, 1, 1], [], []>} : vector<256x128xbf16>, vector<128x128xbf16>, vector<256x128xf32> -> vector<256x128xf32>
    %22 = arith.addf %14, %21 : vector<256x128xf32>
    %c0_26 = arith.constant 0 : index
    %c0_27 = arith.constant 0 : index
    %c2 = arith.constant 2 : index
    %c0_28 = arith.constant 0 : index
    %23 = vector.load %arg1[%c0_26, %c0_27, %c2, %c0_28] : memref<1x18x18x128xf32, #tpu.memory_space<vmem>>, vector<1x16x16x128xf32>
    %24 = vector.shape_cast %23 : vector<1x16x16x128xf32> to vector<16x16x128xf32>
    %25 = vector.shape_cast %24 : vector<16x16x128xf32> to vector<256x128xf32>
    %26 = arith.truncf %25 : vector<256x128xf32> to vector<256x128xbf16>
    %c2_29 = arith.constant 2 : index
    %c0_30 = arith.constant 0 : index
    %c0_31 = arith.constant 0 : index
    %27 = vector.load %arg2[%c2_29, %c0_30, %c0_31] : memref<9x128x128xbf16, #tpu.memory_space<vmem>>, vector<1x128x128xbf16>
    %28 = vector.shape_cast %27 : vector<1x128x128xbf16> to vector<128x128xbf16>
    %cst_32 = arith.constant dense<0.000000e+00> : vector<256x128xf32>
    %29 = tpu.matmul %26, %28, %cst_32 {dimension_numbers = #tpu.dot_dimension_numbers<[1], [0], [0], [1], [0, 0, 1, 1], [], []>} : vector<256x128xbf16>, vector<128x128xbf16>, vector<256x128xf32> -> vector<256x128xf32>
    %30 = arith.addf %22, %29 : vector<256x128xf32>
    %c0_33 = arith.constant 0 : index
    %c1_34 = arith.constant 1 : index
    %c0_35 = arith.constant 0 : index
    %c0_36 = arith.constant 0 : index
    %31 = vector.load %arg1[%c0_33, %c1_34, %c0_35, %c0_36] : memref<1x18x18x128xf32, #tpu.memory_space<vmem>>, vector<1x16x16x128xf32>
    %32 = vector.shape_cast %31 : vector<1x16x16x128xf32> to vector<16x16x128xf32>
    %33 = vector.shape_cast %32 : vector<16x16x128xf32> to vector<256x128xf32>
    %34 = arith.truncf %33 : vector<256x128xf32> to vector<256x128xbf16>
    %c3 = arith.constant 3 : index
    %c0_37 = arith.constant 0 : index
    %c0_38 = arith.constant 0 : index
    %35 = vector.load %arg2[%c3, %c0_37, %c0_38] : memref<9x128x128xbf16, #tpu.memory_space<vmem>>, vector<1x128x128xbf16>
    %36 = vector.shape_cast %35 : vector<1x128x128xbf16> to vector<128x128xbf16>
    %cst_39 = arith.constant dense<0.000000e+00> : vector<256x128xf32>
    %37 = tpu.matmul %34, %36, %cst_39 {dimension_numbers = #tpu.dot_dimension_numbers<[1], [0], [0], [1], [0, 0, 1, 1], [], []>} : vector<256x128xbf16>, vector<128x128xbf16>, vector<256x128xf32> -> vector<256x128xf32>
    %38 = arith.addf %30, %37 : vector<256x128xf32>
    %c0_40 = arith.constant 0 : index
    %c1_41 = arith.constant 1 : index
    %c1_42 = arith.constant 1 : index
    %c0_43 = arith.constant 0 : index
    %39 = vector.load %arg1[%c0_40, %c1_41, %c1_42, %c0_43] : memref<1x18x18x128xf32, #tpu.memory_space<vmem>>, vector<1x16x16x128xf32>
    %40 = vector.shape_cast %39 : vector<1x16x16x128xf32> to vector<16x16x128xf32>
    %41 = vector.shape_cast %40 : vector<16x16x128xf32> to vector<256x128xf32>
    %42 = arith.truncf %41 : vector<256x128xf32> to vector<256x128xbf16>
    %c4 = arith.constant 4 : index
    %c0_44 = arith.constant 0 : index
    %c0_45 = arith.constant 0 : index
    %43 = vector.load %arg2[%c4, %c0_44, %c0_45] : memref<9x128x128xbf16, #tpu.memory_space<vmem>>, vector<1x128x128xbf16>
    %44 = vector.shape_cast %43 : vector<1x128x128xbf16> to vector<128x128xbf16>
    %cst_46 = arith.constant dense<0.000000e+00> : vector<256x128xf32>
    %45 = tpu.matmul %42, %44, %cst_46 {dimension_numbers = #tpu.dot_dimension_numbers<[1], [0], [0], [1], [0, 0, 1, 1], [], []>} : vector<256x128xbf16>, vector<128x128xbf16>, vector<256x128xf32> -> vector<256x128xf32>
    %46 = arith.addf %38, %45 : vector<256x128xf32>
    %c0_47 = arith.constant 0 : index
    %c1_48 = arith.constant 1 : index
    %c2_49 = arith.constant 2 : index
    %c0_50 = arith.constant 0 : index
    %47 = vector.load %arg1[%c0_47, %c1_48, %c2_49, %c0_50] : memref<1x18x18x128xf32, #tpu.memory_space<vmem>>, vector<1x16x16x128xf32>
    %48 = vector.shape_cast %47 : vector<1x16x16x128xf32> to vector<16x16x128xf32>
    %49 = vector.shape_cast %48 : vector<16x16x128xf32> to vector<256x128xf32>
    %50 = arith.truncf %49 : vector<256x128xf32> to vector<256x128xbf16>
    %c5 = arith.constant 5 : index
    %c0_51 = arith.constant 0 : index
    %c0_52 = arith.constant 0 : index
    %51 = vector.load %arg2[%c5, %c0_51, %c0_52] : memref<9x128x128xbf16, #tpu.memory_space<vmem>>, vector<1x128x128xbf16>
    %52 = vector.shape_cast %51 : vector<1x128x128xbf16> to vector<128x128xbf16>
    %cst_53 = arith.constant dense<0.000000e+00> : vector<256x128xf32>
    %53 = tpu.matmul %50, %52, %cst_53 {dimension_numbers = #tpu.dot_dimension_numbers<[1], [0], [0], [1], [0, 0, 1, 1], [], []>} : vector<256x128xbf16>, vector<128x128xbf16>, vector<256x128xf32> -> vector<256x128xf32>
    %54 = arith.addf %46, %53 : vector<256x128xf32>
    %c0_54 = arith.constant 0 : index
    %c2_55 = arith.constant 2 : index
    %c0_56 = arith.constant 0 : index
    %c0_57 = arith.constant 0 : index
    %55 = vector.load %arg1[%c0_54, %c2_55, %c0_56, %c0_57] : memref<1x18x18x128xf32, #tpu.memory_space<vmem>>, vector<1x16x16x128xf32>
    %56 = vector.shape_cast %55 : vector<1x16x16x128xf32> to vector<16x16x128xf32>
    %57 = vector.shape_cast %56 : vector<16x16x128xf32> to vector<256x128xf32>
    %58 = arith.truncf %57 : vector<256x128xf32> to vector<256x128xbf16>
    %c6 = arith.constant 6 : index
    %c0_58 = arith.constant 0 : index
    %c0_59 = arith.constant 0 : index
    %59 = vector.load %arg2[%c6, %c0_58, %c0_59] : memref<9x128x128xbf16, #tpu.memory_space<vmem>>, vector<1x128x128xbf16>
    %60 = vector.shape_cast %59 : vector<1x128x128xbf16> to vector<128x128xbf16>
    %cst_60 = arith.constant dense<0.000000e+00> : vector<256x128xf32>
    %61 = tpu.matmul %58, %60, %cst_60 {dimension_numbers = #tpu.dot_dimension_numbers<[1], [0], [0], [1], [0, 0, 1, 1], [], []>} : vector<256x128xbf16>, vector<128x128xbf16>, vector<256x128xf32> -> vector<256x128xf32>
    %62 = arith.addf %54, %61 : vector<256x128xf32>
    %c0_61 = arith.constant 0 : index
    %c2_62 = arith.constant 2 : index
    %c1_63 = arith.constant 1 : index
    %c0_64 = arith.constant 0 : index
    %63 = vector.load %arg1[%c0_61, %c2_62, %c1_63, %c0_64] : memref<1x18x18x128xf32, #tpu.memory_space<vmem>>, vector<1x16x16x128xf32>
    %64 = vector.shape_cast %63 : vector<1x16x16x128xf32> to vector<16x16x128xf32>
    %65 = vector.shape_cast %64 : vector<16x16x128xf32> to vector<256x128xf32>
    %66 = arith.truncf %65 : vector<256x128xf32> to vector<256x128xbf16>
    %c7 = arith.constant 7 : index
    %c0_65 = arith.constant 0 : index
    %c0_66 = arith.constant 0 : index
    %67 = vector.load %arg2[%c7, %c0_65, %c0_66] : memref<9x128x128xbf16, #tpu.memory_space<vmem>>, vector<1x128x128xbf16>
    %68 = vector.shape_cast %67 : vector<1x128x128xbf16> to vector<128x128xbf16>
    %cst_67 = arith.constant dense<0.000000e+00> : vector<256x128xf32>
    %69 = tpu.matmul %66, %68, %cst_67 {dimension_numbers = #tpu.dot_dimension_numbers<[1], [0], [0], [1], [0, 0, 1, 1], [], []>} : vector<256x128xbf16>, vector<128x128xbf16>, vector<256x128xf32> -> vector<256x128xf32>
    %70 = arith.addf %62, %69 : vector<256x128xf32>
    %c0_68 = arith.constant 0 : index
    %c2_69 = arith.constant 2 : index
    %c2_70 = arith.constant 2 : index
    %c0_71 = arith.constant 0 : index
    %71 = vector.load %arg1[%c0_68, %c2_69, %c2_70, %c0_71] : memref<1x18x18x128xf32, #tpu.memory_space<vmem>>, vector<1x16x16x128xf32>
    %72 = vector.shape_cast %71 : vector<1x16x16x128xf32> to vector<16x16x128xf32>
    %73 = vector.shape_cast %72 : vector<16x16x128xf32> to vector<256x128xf32>
    %74 = arith.truncf %73 : vector<256x128xf32> to vector<256x128xbf16>
    %c8 = arith.constant 8 : index
    %c0_72 = arith.constant 0 : index
    %c0_73 = arith.constant 0 : index
    %75 = vector.load %arg2[%c8, %c0_72, %c0_73] : memref<9x128x128xbf16, #tpu.memory_space<vmem>>, vector<1x128x128xbf16>
    %76 = vector.shape_cast %75 : vector<1x128x128xbf16> to vector<128x128xbf16>
    %cst_74 = arith.constant dense<0.000000e+00> : vector<256x128xf32>
    %77 = tpu.matmul %74, %76, %cst_74 {dimension_numbers = #tpu.dot_dimension_numbers<[1], [0], [0], [1], [0, 0, 1, 1], [], []>} : vector<256x128xbf16>, vector<128x128xbf16>, vector<256x128xf32> -> vector<256x128xf32>
    %78 = arith.addf %70, %77 : vector<256x128xf32>
    %79 = vector.broadcast %0 : vector<1x128xf32> to vector<256x128xf32>
    %80 = arith.mulf %78, %79 : vector<256x128xf32>
    %81 = vector.broadcast %1 : vector<1x128xf32> to vector<256x128xf32>
    %82 = arith.addf %80, %81 : vector<256x128xf32>
    %cst_75 = arith.constant 0.000000e+00 : f32
    %83 = vector.broadcast %cst_75 : f32 to vector<256x128xf32>
    %84 = arith.maximumf %82, %83 : vector<256x128xf32>
    %85 = vector.shape_cast %84 : vector<256x128xf32> to vector<16x16x128xf32>
    %86 = arith.truncf %85 : vector<16x16x128xf32> to vector<16x16x128xbf16>
    %c1_76 = arith.constant 1 : index
    %c1_77 = arith.constant 1 : index
    %c0_78 = arith.constant 0 : index
    %87 = vector.load %arg9[%c1_76, %c1_77, %c0_78] : memref<18x18x128xbf16, #tpu.memory_space<vmem>>, vector<16x16x128xbf16>
    tpu.vector_store %arg9[%c1_76, %c1_77, %c0_78], %86 {strides = array<i32>} : memref<18x18x128xbf16, #tpu.memory_space<vmem>>, vector<16x16x128xbf16>,
    %cst_79 = arith.constant 0.000000e+00 : f32
    %88 = vector.broadcast %cst_79 : f32 to vector<256x128xf32>
    %c0_80 = arith.constant 0 : index
    %c0_81 = arith.constant 0 : index
    %c0_82 = arith.constant 0 : index
    %89 = vector.load %arg9[%c0_80, %c0_81, %c0_82] : memref<18x18x128xbf16, #tpu.memory_space<vmem>>, vector<16x16x128xbf16>
    %90 = vector.shape_cast %89 : vector<16x16x128xbf16> to vector<256x128xbf16>
    %c0_83 = arith.constant 0 : index
    %c0_84 = arith.constant 0 : index
    %c0_85 = arith.constant 0 : index
    %91 = vector.load %arg3[%c0_83, %c0_84, %c0_85] : memref<9x128x128xbf16, #tpu.memory_space<vmem>>, vector<1x128x128xbf16>
    %92 = vector.shape_cast %91 : vector<1x128x128xbf16> to vector<128x128xbf16>
    %cst_86 = arith.constant dense<0.000000e+00> : vector<256x128xf32>
    %93 = tpu.matmul %90, %92, %cst_86 {dimension_numbers = #tpu.dot_dimension_numbers<[1], [0], [0], [1], [0, 0, 1, 1], [], []>} : vector<256x128xbf16>, vector<128x128xbf16>, vector<256x128xf32> -> vector<256x128xf32>
    %94 = arith.addf %88, %93 : vector<256x128xf32>
    %c0_87 = arith.constant 0 : index
    %c1_88 = arith.constant 1 : index
    %c0_89 = arith.constant 0 : index
    %95 = vector.load %arg9[%c0_87, %c1_88, %c0_89] : memref<18x18x128xbf16, #tpu.memory_space<vmem>>, vector<16x16x128xbf16>
    %96 = vector.shape_cast %95 : vector<16x16x128xbf16> to vector<256x128xbf16>
    %c1_90 = arith.constant 1 : index
    %c0_91 = arith.constant 0 : index
    %c0_92 = arith.constant 0 : index
    %97 = vector.load %arg3[%c1_90, %c0_91, %c0_92] : memref<9x128x128xbf16, #tpu.memory_space<vmem>>, vector<1x128x128xbf16>
    %98 = vector.shape_cast %97 : vector<1x128x128xbf16> to vector<128x128xbf16>
    %cst_93 = arith.constant dense<0.000000e+00> : vector<256x128xf32>
    %99 = tpu.matmul %96, %98, %cst_93 {dimension_numbers = #tpu.dot_dimension_numbers<[1], [0], [0], [1], [0, 0, 1, 1], [], []>} : vector<256x128xbf16>, vector<128x128xbf16>, vector<256x128xf32> -> vector<256x128xf32>
    %100 = arith.addf %94, %99 : vector<256x128xf32>
    %c0_94 = arith.constant 0 : index
    %c2_95 = arith.constant 2 : index
    %c0_96 = arith.constant 0 : index
    %101 = vector.load %arg9[%c0_94, %c2_95, %c0_96] : memref<18x18x128xbf16, #tpu.memory_space<vmem>>, vector<16x16x128xbf16>
    %102 = vector.shape_cast %101 : vector<16x16x128xbf16> to vector<256x128xbf16>
    %c2_97 = arith.constant 2 : index
    %c0_98 = arith.constant 0 : index
    %c0_99 = arith.constant 0 : index
    %103 = vector.load %arg3[%c2_97, %c0_98, %c0_99] : memref<9x128x128xbf16, #tpu.memory_space<vmem>>, vector<1x128x128xbf16>
    %104 = vector.shape_cast %103 : vector<1x128x128xbf16> to vector<128x128xbf16>
    %cst_100 = arith.constant dense<0.000000e+00> : vector<256x128xf32>
    %105 = tpu.matmul %102, %104, %cst_100 {dimension_numbers = #tpu.dot_dimension_numbers<[1], [0], [0], [1], [0, 0, 1, 1], [], []>} : vector<256x128xbf16>, vector<128x128xbf16>, vector<256x128xf32> -> vector<256x128xf32>
    %106 = arith.addf %100, %105 : vector<256x128xf32>
    %c1_101 = arith.constant 1 : index
    %c0_102 = arith.constant 0 : index
    %c0_103 = arith.constant 0 : index
    %107 = vector.load %arg9[%c1_101, %c0_102, %c0_103] : memref<18x18x128xbf16, #tpu.memory_space<vmem>>, vector<16x16x128xbf16>
    %108 = vector.shape_cast %107 : vector<16x16x128xbf16> to vector<256x128xbf16>
    %c3_104 = arith.constant 3 : index
    %c0_105 = arith.constant 0 : index
    %c0_106 = arith.constant 0 : index
    %109 = vector.load %arg3[%c3_104, %c0_105, %c0_106] : memref<9x128x128xbf16, #tpu.memory_space<vmem>>, vector<1x128x128xbf16>
    %110 = vector.shape_cast %109 : vector<1x128x128xbf16> to vector<128x128xbf16>
    %cst_107 = arith.constant dense<0.000000e+00> : vector<256x128xf32>
    %111 = tpu.matmul %108, %110, %cst_107 {dimension_numbers = #tpu.dot_dimension_numbers<[1], [0], [0], [1], [0, 0, 1, 1], [], []>} : vector<256x128xbf16>, vector<128x128xbf16>, vector<256x128xf32> -> vector<256x128xf32>
    %112 = arith.addf %106, %111 : vector<256x128xf32>
    %c1_108 = arith.constant 1 : index
    %c1_109 = arith.constant 1 : index
    %c0_110 = arith.constant 0 : index
    %113 = vector.load %arg9[%c1_108, %c1_109, %c0_110] : memref<18x18x128xbf16, #tpu.memory_space<vmem>>, vector<16x16x128xbf16>
    %114 = vector.shape_cast %113 : vector<16x16x128xbf16> to vector<256x128xbf16>
    %c4_111 = arith.constant 4 : index
    %c0_112 = arith.constant 0 : index
    %c0_113 = arith.constant 0 : index
    %115 = vector.load %arg3[%c4_111, %c0_112, %c0_113] : memref<9x128x128xbf16, #tpu.memory_space<vmem>>, vector<1x128x128xbf16>
    %116 = vector.shape_cast %115 : vector<1x128x128xbf16> to vector<128x128xbf16>
    %cst_114 = arith.constant dense<0.000000e+00> : vector<256x128xf32>
    %117 = tpu.matmul %114, %116, %cst_114 {dimension_numbers = #tpu.dot_dimension_numbers<[1], [0], [0], [1], [0, 0, 1, 1], [], []>} : vector<256x128xbf16>, vector<128x128xbf16>, vector<256x128xf32> -> vector<256x128xf32>
    %118 = arith.addf %112, %117 : vector<256x128xf32>
    %c1_115 = arith.constant 1 : index
    %c2_116 = arith.constant 2 : index
    %c0_117 = arith.constant 0 : index
    %119 = vector.load %arg9[%c1_115, %c2_116, %c0_117] : memref<18x18x128xbf16, #tpu.memory_space<vmem>>, vector<16x16x128xbf16>
    %120 = vector.shape_cast %119 : vector<16x16x128xbf16> to vector<256x128xbf16>
    %c5_118 = arith.constant 5 : index
    %c0_119 = arith.constant 0 : index
    %c0_120 = arith.constant 0 : index
    %121 = vector.load %arg3[%c5_118, %c0_119, %c0_120] : memref<9x128x128xbf16, #tpu.memory_space<vmem>>, vector<1x128x128xbf16>
    %122 = vector.shape_cast %121 : vector<1x128x128xbf16> to vector<128x128xbf16>
    %cst_121 = arith.constant dense<0.000000e+00> : vector<256x128xf32>
    %123 = tpu.matmul %120, %122, %cst_121 {dimension_numbers = #tpu.dot_dimension_numbers<[1], [0], [0], [1], [0, 0, 1, 1], [], []>} : vector<256x128xbf16>, vector<128x128xbf16>, vector<256x128xf32> -> vector<256x128xf32>
    %124 = arith.addf %118, %123 : vector<256x128xf32>
    %c2_122 = arith.constant 2 : index
    %c0_123 = arith.constant 0 : index
    %c0_124 = arith.constant 0 : index
    %125 = vector.load %arg9[%c2_122, %c0_123, %c0_124] : memref<18x18x128xbf16, #tpu.memory_space<vmem>>, vector<16x16x128xbf16>
    %126 = vector.shape_cast %125 : vector<16x16x128xbf16> to vector<256x128xbf16>
    %c6_125 = arith.constant 6 : index
    %c0_126 = arith.constant 0 : index
    %c0_127 = arith.constant 0 : index
    %127 = vector.load %arg3[%c6_125, %c0_126, %c0_127] : memref<9x128x128xbf16, #tpu.memory_space<vmem>>, vector<1x128x128xbf16>
    %128 = vector.shape_cast %127 : vector<1x128x128xbf16> to vector<128x128xbf16>
    %cst_128 = arith.constant dense<0.000000e+00> : vector<256x128xf32>
    %129 = tpu.matmul %126, %128, %cst_128 {dimension_numbers = #tpu.dot_dimension_numbers<[1], [0], [0], [1], [0, 0, 1, 1], [], []>} : vector<256x128xbf16>, vector<128x128xbf16>, vector<256x128xf32> -> vector<256x128xf32>
    %130 = arith.addf %124, %129 : vector<256x128xf32>
    %c2_129 = arith.constant 2 : index
    %c1_130 = arith.constant 1 : index
    %c0_131 = arith.constant 0 : index
    %131 = vector.load %arg9[%c2_129, %c1_130, %c0_131] : memref<18x18x128xbf16, #tpu.memory_space<vmem>>, vector<16x16x128xbf16>
    %132 = vector.shape_cast %131 : vector<16x16x128xbf16> to vector<256x128xbf16>
    %c7_132 = arith.constant 7 : index
    %c0_133 = arith.constant 0 : index
    %c0_134 = arith.constant 0 : index
    %133 = vector.load %arg3[%c7_132, %c0_133, %c0_134] : memref<9x128x128xbf16, #tpu.memory_space<vmem>>, vector<1x128x128xbf16>
    %134 = vector.shape_cast %133 : vector<1x128x128xbf16> to vector<128x128xbf16>
    %cst_135 = arith.constant dense<0.000000e+00> : vector<256x128xf32>
    %135 = tpu.matmul %132, %134, %cst_135 {dimension_numbers = #tpu.dot_dimension_numbers<[1], [0], [0], [1], [0, 0, 1, 1], [], []>} : vector<256x128xbf16>, vector<128x128xbf16>, vector<256x128xf32> -> vector<256x128xf32>
    %136 = arith.addf %130, %135 : vector<256x128xf32>
    %c2_136 = arith.constant 2 : index
    %c2_137 = arith.constant 2 : index
    %c0_138 = arith.constant 0 : index
    %137 = vector.load %arg9[%c2_136, %c2_137, %c0_138] : memref<18x18x128xbf16, #tpu.memory_space<vmem>>, vector<16x16x128xbf16>
    %138 = vector.shape_cast %137 : vector<16x16x128xbf16> to vector<256x128xbf16>
    %c8_139 = arith.constant 8 : index
    %c0_140 = arith.constant 0 : index
    %c0_141 = arith.constant 0 : index
    %139 = vector.load %arg3[%c8_139, %c0_140, %c0_141] : memref<9x128x128xbf16, #tpu.memory_space<vmem>>, vector<1x128x128xbf16>
    %140 = vector.shape_cast %139 : vector<1x128x128xbf16> to vector<128x128xbf16>
    %cst_142 = arith.constant dense<0.000000e+00> : vector<256x128xf32>
    %141 = tpu.matmul %138, %140, %cst_142 {dimension_numbers = #tpu.dot_dimension_numbers<[1], [0], [0], [1], [0, 0, 1, 1], [], []>} : vector<256x128xbf16>, vector<128x128xbf16>, vector<256x128xf32> -> vector<256x128xf32>
    %142 = arith.addf %136, %141 : vector<256x128xf32>
    %c0_143 = arith.constant 0 : index
    %c1_144 = arith.constant 1 : index
    %c1_145 = arith.constant 1 : index
    %c0_146 = arith.constant 0 : index
    %143 = vector.load %arg1[%c0_143, %c1_144, %c1_145, %c0_146] : memref<1x18x18x128xf32, #tpu.memory_space<vmem>>, vector<1x16x16x128xf32>
    %144 = vector.shape_cast %143 : vector<1x16x16x128xf32> to vector<16x16x128xf32>
    %145 = vector.shape_cast %144 : vector<16x16x128xf32> to vector<256x128xf32>
    %146 = vector.broadcast %2 : vector<1x128xf32> to vector<256x128xf32>
    %147 = arith.mulf %142, %146 : vector<256x128xf32>
    %148 = vector.broadcast %3 : vector<1x128xf32> to vector<256x128xf32>
    %149 = arith.addf %147, %148 : vector<256x128xf32>
    %150 = arith.addf %149, %145 : vector<256x128xf32>
    %cst_147 = arith.constant 0.000000e+00 : f32
    %151 = vector.broadcast %cst_147 : f32 to vector<256x128xf32>
    %152 = arith.maximumf %150, %151 : vector<256x128xf32>
    %153 = vector.shape_cast %152 : vector<256x128xf32> to vector<16x16x128xf32>
    %c0_148 = arith.constant 0 : index
    %c0_149 = arith.constant 0 : index
    %c0_150 = arith.constant 0 : index
    %c0_151 = arith.constant 0 : index
    %154 = vector.load %arg8[%c0_148, %c0_149, %c0_150, %c0_151] : memref<1x16x16x128xf32, #tpu.memory_space<vmem>>, vector<1x16x16x128xf32>
    %155 = vector.shape_cast %154 : vector<1x16x16x128xf32> to vector<16x16x128xf32>
    %156 = vector.shape_cast %153 : vector<16x16x128xf32> to vector<1x16x16x128xf32>
    tpu.vector_store %arg8[%c0_148, %c0_149, %c0_150, %c0_151], %156 {strides = array<i32>} : memref<1x16x16x128xf32, #tpu.memory_space<vmem>>, vector<1x16x16x128xf32>,
    return
  }
  func.func @transform_0(%arg0: i32) -> (i32, i32, i32, i32) {
    %c0_i32 = arith.constant 0 : i32
    %c0_i32_0 = arith.constant 0 : i32
    %c0_i32_1 = arith.constant 0 : i32
    %c0_i32_2 = arith.constant 0 : i32
    return %arg0, %c0_i32, %c0_i32_0, %c0_i32_1 : i32, i32, i32, i32
  }
  func.func @transform_1(%arg0: i32) -> (i32, i32, i32) {
    %c0_i32 = arith.constant 0 : i32
    %c0_i32_0 = arith.constant 0 : i32
    %c0_i32_1 = arith.constant 0 : i32
    %c0_i32_2 = arith.constant 0 : i32
    return %c0_i32, %c0_i32_0, %c0_i32_1 : i32, i32, i32
  }
  func.func @transform_2(%arg0: i32) -> (i32, i32, i32) {
    %c0_i32 = arith.constant 0 : i32
    %c0_i32_0 = arith.constant 0 : i32
    %c0_i32_1 = arith.constant 0 : i32
    %c0_i32_2 = arith.constant 0 : i32
    return %c0_i32, %c0_i32_0, %c0_i32_1 : i32, i32, i32
  }
  func.func @transform_3(%arg0: i32) -> (i32, i32) {
    %c0_i32 = arith.constant 0 : i32
    %c0_i32_0 = arith.constant 0 : i32
    %c0_i32_1 = arith.constant 0 : i32
    return %c0_i32, %c0_i32_0 : i32, i32
  }
  func.func @transform_4(%arg0: i32) -> (i32, i32) {
    %c0_i32 = arith.constant 0 : i32
    %c0_i32_0 = arith.constant 0 : i32
    %c0_i32_1 = arith.constant 0 : i32
    return %c0_i32, %c0_i32_0 : i32, i32
  }
  func.func @transform_5(%arg0: i32) -> (i32, i32) {
    %c0_i32 = arith.constant 0 : i32
    %c0_i32_0 = arith.constant 0 : i32
    %c0_i32_1 = arith.constant 0 : i32
    return %c0_i32, %c0_i32_0 : i32, i32
  }
  func.func @transform_6(%arg0: i32) -> (i32, i32) {
    %c0_i32 = arith.constant 0 : i32
    %c0_i32_0 = arith.constant 0 : i32
    %c0_i32_1 = arith.constant 0 : i32
    return %c0_i32, %c0_i32_0 : i32, i32
  }
  func.func @transform_7(%arg0: i32) -> (i32, i32, i32, i32) {
    %c0_i32 = arith.constant 0 : i32
    %c0_i32_0 = arith.constant 0 : i32
    %c0_i32_1 = arith.constant 0 : i32
    %c0_i32_2 = arith.constant 0 : i32
    return %arg0, %c0_i32, %c0_i32_0, %c0_i32_1 : i32, i32, i32, i32
  }
}

</mosaic_0001>

<bundles_post_ra>
// kernel: tpu_custom_call.1
= control target key start
LH: loop header
LB: loop body
LE: loop exit
PB: predicated region body
PF: predicated region fallthrough
CT: control target
= control target key end

     0   :  { %12 = vsyncpa [#allocation4], 0  ;;  %s14491_s0 = inlined_call_operand.vmem [shape: f32[2,18,18,128], index: 0, kind: input, shape index: {}]   ;;  %s14492_s1 = inlined_call_operand.vmem [shape: bf16[9,128,128], index: 1, kind: input, shape index: {}]   ;;  %s14493_s2 = inlined_call_operand.vmem [shape: bf16[9,128,128], index: 2, kind: input, shape index: {}]   ;;  %s14494_s3 = inlined_call_operand.vmem [shape: f32[1,128], index: 3, kind: input, shape index: {}]   ;;  %s14495_s4 = inlined_call_operand.vmem [shape: f32[1,128], index: 4, kind: input, shape index: {}]   ;;  %s14496_s5 = inlined_call_operand.vmem [shape: f32[1,128], index: 5, kind: input, shape index: {}]   ;;  %s14497_s6 = inlined_call_operand.vmem [shape: f32[1,128], index: 6, kind: input, shape index: {}]   ;;  %s14498_s7 = inlined_call_operand.hbm [shape: f32[2,16,16,128], index: 7, kind: output, shape index: {}]  }
   0x1   :  { %14 = vsyncpa [#allocation4 + $0x1], 0  ;;  %s11851_s24 = smov 0   ;;  %s11853_s25 = smov 0  }
   0x2   :  { %s11855_s26 = smov 0   ;;  %s11857_s27 = smov 0  }
   0x3 LB: > { %s11872_s28 = sadd.s32 4294967295, %s11805_s27   ;;  %s8760_s29 = sadd.s32 4294967294, %s11805_s27   ;;  %s11805_s27 = sphi %s11857_s27, %s14728_s27   ;;  %s11801_s26 = sphi %s11855_s26, %s14727_s26   ;;  %s11797_s25 = sphi %s11853_s25, %s14726_s25   ;;  %s11793_s24 = sphi %s11851_s24, %s14725_s24  }
   0x4   : > { %s11876_s30 = sadd.s32 1, %s11805_s27   ;;  %s179_s8 = sadd.s32 1, %s11801_s26 }
   0x5   : > { %s176_s9 = ssub.s32 %s11805_s27, %s11876_s30  ;;  %p189_p0 = scmp.ne.s32.totalorder %s11801_s26, %s11797_s25 }
   0x6   : > { %p177_p1 = scmp.eq.s32.totalorder %s176_s9, 0  ;;  %p190_p2 = scmp.eq.s32.totalorder %s11872_s28, 1 }
   0x7   : > { %p195_p3 = scmp.ne.s32.totalorder %s11797_s25, %s11793_s24  ;;  %p196_p4 = scmp.eq.s32.totalorder %s8760_s29, 1 }
   0x8   : > { %s11887_s10 = scalar_select %p177_p1, %s11801_s26, %s179_s8  }
   0x9   : > { %p11889_p5 = por %p190_p2, %p189_p0  ;;  %p11893_p6 = por %p196_p4, %p195_p3 }
   0xa   : > { %p8763_p7 = scmp.ge.s32.totalorder %s11805_s27, 1  ;;  %p240_p8 = scmp.lt.s32.totalorder %s11805_s27, 3 }
   0xc   : > { %p241_p9 = pnand %p8763_p7, %p240_p8 }
   0xe   : > { %244 = sbr.rel (%p241_p9) target bundleno = 1688 (0x698), region = 48 }
  0x15   : > { %v11507_v0 = vld [vmem:[%s14492_s1 + $0x40] sm:$0xff]   ;;  %p272_p10 = scmp.lt.s32.totalorder %s11872_s28, 1  ;;  %v11508_v1 = vld [vmem:[%s14492_s1 + $0x48] sm:$0xff]   ;;  %v11509_v2 = vld [vmem:[%s14492_s1 + $0x50] sm:$0xff]   ;;  %vm3736_vm0 = vsmask.f32 3328 }
  0x16   : > { %10088 = vmatprep.subr.bf16.mxu0 %v11507_v0  ;;  %v11510_v3 = vld [vmem:[%s14492_s1 + $0x58] sm:$0xff]   ;;  %v11511_v7 = vld [vmem:[%s14492_s1 + $0x60] sm:$0xff]   ;;  %v11512_v8 = vld [vmem:[%s14492_s1 + $0x68] sm:$0xff]   ;;  %vm3737_vm1 = vsmask.f32 7440  ;;  %vm3555_vm3 = vcmask 1043456  }
  0x17   : > { %s273_s17 = scalar_select %p272_p10, %s11872_s28, 1  ;;  %10089 = vmatpush3.bf16.msra.mxu0 %v11507_v0  ;;  %v11513_v9 = vld [vmem:[%s14492_s1 + $0x70] sm:$0xff]   ;;  %v11514_v10 = vld [vmem:[%s14492_s1 + $0x78] sm:$0xff]   ;;  %v11515_v13 = vld [vmem:[%s14492_s1] sm:$0xff]   ;;  %vm3556_vm4 = vsmask.f32 7938 }
  0x18   : > { %10090 = vmatprep.subr.bf16.mxu0 %v11508_v1  ;;  %v11516_v18 = vld [vmem:[%s14492_s1 + $0x8] sm:$0xff]   ;;  %v11517_v23 = vld [vmem:[%s14492_s1 + $0x10] sm:$0xff]   ;;  %v11518_v26 = vld [vmem:[%s14492_s1 + $0x18] sm:$0xff]   ;;  %vm3231_vm5 = vsmask.f32 256  ;;  %vm3562_vm7 = vcmask 1040384  }
  0x19   : > { %s11464_s20 = smul.u32 432, %s273_s17  ;;  %v11519_v31 = vld [vmem:[%s14492_s1 + $0x20] sm:$0xff]   ;;  %v11520_v34 = vld [vmem:[%s14492_s1 + $0x28] sm:$0xff]   ;;  %v11521_v39 = vld [vmem:[%s14492_s1 + $0x30] sm:$0xff]   ;;  %vm3232_vm6 = vsmask.f32 4368 }
  0x1a   : > { %v11522_v41 = vld [vmem:[%s14492_s1 + $0x38] sm:$0xff]   ;;  %v11523_v47 = vld [vmem:[%s14492_s1 + $0x80] sm:$0xff]   ;;  %vm12520_vm2 = vmor %vm3736_vm0, %vm3737_vm1  ;;  %vm4766_vm11 = vcmask 1042432   ;;  %vm4767_vm12 = vcmask 1046532   ;;  %s269_s16 = sand.u32 1, %s11797_s25   ;;  %s9655_s21 = sshll.u32 %s11872_s28, 12 }
  0x1b   : > { %s11913_s23 = scalar_lea.vmem %s14491_s0, %s11464_s20  ;;  %10091 = vmatpush3.bf16.msra.mxu0 %v11508_v1  ;;  %vm12557_vm8 = vmand %vm3555_vm3, %vm3556_vm4  ;;  %s8764_s19 = sshll.u32 %s269_s16, 8 }
  0x1c   : > { %10092 = vmatprep.subr.bf16.mxu0 %v11509_v2  ;;  %v400_v4 = vld [vmem:[%s11913_s23 + $0x1] sm:$0xff]  ;;  %v401_v5 = vld [vmem:[%s11913_s23 + $0x9] sm:$0xff]  ;;  %v402_v11 = vld [vmem:[%s11913_s23 + $0x19] sm:$0xff]  ;;  %s14321_s20 = scalar_lea.vmem [#allocation3], %s8764_s19  ;;  %s14441_s9 = scalar_lea.hbm %s14498_s7, %s9655_s21 }
  0x1d   : > { %v432_v6 = vpack.c.bf16 %v401_v5, %v400_v4  ;;  %v403_v12 = vld [vmem:[%s11913_s23 + $0x21] sm:$0xff]  ;;  %v404_v14 = vld [vmem:[%s11913_s23 + $0x31] sm:$0xff]  ;;  %v405_v15 = vld [vmem:[%s11913_s23 + $0x39] sm:$0xff]  ;;  %s8698_s22 = sshll.u32 %s14321_s20, 4  ;;  %s14450_s28 = scalar_lea.sflag [#allocation4], %s269_s16  ;;  %s14443_s22 = int_to_ptr.vmem [resolvable:$true] %s8698_s22 }
  0x1e   : > { %v11939_v16 = vpack.c.bf16 %v403_v12, %v402_v11  ;;  %v11941_v17 = vpack.c.bf16 %v405_v15, %v404_v14  ;;  %v406_v19 = vld [vmem:[%s11913_s23 + $0x49] sm:$0xff]  ;;  %v407_v20 = vld [vmem:[%s11913_s23 + $0x51] sm:$0xff]  ;;  %v408_v21 = vld [vmem:[%s11913_s23 + $0x61] sm:$0xff]  ;;  %s11808_s13 = smov [#allocation3]  }
  0x1f   : > { %10093 = vmatpush3.bf16.msra.mxu0 %v11509_v2  ;;  %10104 = vmatprep.mubr.bf16.mxu0 %v432_v6  ;;  %v409_v22 = vld [vmem:[%s11913_s23 + $0x69] sm:$0xff]  ;;  %v11955_v24 = vpack.c.bf16 %v407_v20, %v406_v19  ;;  %v410_v27 = vld [vmem:[%s11913_s23 + $0x79] sm:$0xff]  ;;  %v411_v28 = vld [vmem:[%s11913_s23 + $0x81] sm:$0xff]  ;;  %s11747_s14 = sshll.u32 %s11808_s13, 4  ;;  %s11748_s14 = int_to_ptr.vmem [resolvable:$false] %s11747_s14 }
  0x20   : > { %10094 = vmatprep.subr.bf16.mxu0 %v11510_v3  ;;  %v11957_v25 = vpack.c.bf16 %v409_v22, %v408_v21  ;;  %v412_v29 = vld [vmem:[%s11913_s23 + $0x91] sm:$0xff]  ;;  %v413_v30 = vld [vmem:[%s11913_s23 + $0x99] sm:$0xff]  ;;  %v11971_v32 = vpack.c.bf16 %v411_v28, %v410_v27  ;;  %v414_v35 = vld [vmem:[%s11913_s23 + $0xa9] sm:$0xff]  ;;  %s11749_s15 = scalar_lea.vmem %s11748_s14, 8192  ;;  %p11750_p0 = scmp.lt.s32.totalorder %s14443_s22, %s11748_s14 }
  0x21   : > { %v11973_v33 = vpack.c.bf16 %v413_v30, %v412_v29  ;;  %v415_v36 = vld [vmem:[%s11913_s23 + $0xb1] sm:$0xff]  ;;  %v416_v37 = vld [vmem:[%s11913_s23 + $0xc1] sm:$0xff]  ;;  %v417_v38 = vld [vmem:[%s11913_s23 + $0xc9] sm:$0xff] }
  0x22   : > { %v11987_v40 = vpack.c.bf16 %v415_v36, %v414_v35  ;;  %v11992_v42 = vpack.c.bf16 %v417_v38, %v416_v37  ;;  %v418_v43 = vld [vmem:[%s11913_s23 + $0xd9] sm:$0xff]  ;;  %v419_v44 = vld [vmem:[%s11913_s23 + $0xe1] sm:$0xff]  ;;  %v420_v45 = vld [vmem:[%s11913_s23 + $0xf1] sm:$0xff] }
  0x23   : > { %10095 = vmatpush3.bf16.msra.mxu0 %v11510_v3  ;;  %v421_v46 = vld [vmem:[%s11913_s23 + $0xf9] sm:$0xff]  ;;  %v12003_v48 = vpack.c.bf16 %v419_v44, %v418_v43  ;;  %v422_v50 = vld [vmem:[%s11913_s23 + $0x109] sm:$0xff]  ;;  %v423_v51 = vld [vmem:[%s11913_s23 + $0x111] sm:$0xff] }
  0x24   : > { %10096 = vmatprep.subr.bf16.mxu0 %v11511_v7  ;;  %v12005_v49 = vpack.c.bf16 %v421_v46, %v420_v45  ;;  %v424_v52 = vld [vmem:[%s11913_s23 + $0x121] sm:$0xff]  ;;  %v425_v53 = vld [vmem:[%s11913_s23 + $0x129] sm:$0xff]  ;;  %v12013_v54 = vpack.c.bf16 %v423_v51, %v422_v50  ;;  %v426_v56 = vld [vmem:[%s11913_s23 + $0x139] sm:$0xff] }
  0x25   : > { %v12015_v55 = vpack.c.bf16 %v425_v53, %v424_v52  ;;  %v427_v57 = vld [vmem:[%s11913_s23 + $0x141] sm:$0xff]  ;;  %v428_v58 = vld [vmem:[%s11913_s23 + $0x151] sm:$0xff]  ;;  %v429_v59 = vld [vmem:[%s11913_s23 + $0x159] sm:$0xff] }
  0x26   : > { %v12023_v60 = vpack.c.bf16 %v427_v57, %v426_v56  ;;  %v12025_v61 = vpack.c.bf16 %v429_v59, %v428_v58  ;;  %v430_v62 = vld [vmem:[%s11913_s23 + $0x169] sm:$0xff]  ;;  %v431_v63 = vld [vmem:[%s11913_s23 + $0x171] sm:$0xff]  ;;  %v336_v0 = vld [vmem:[%s11913_s23] sm:$0xff] }
  0x27   : > { %10097 = vmatpush3.bf16.msra.mxu0 %v11511_v7  ;;  %v337_v1 = vld [vmem:[%s11913_s23 + $0x8] sm:$0xff]  ;;  %v12033_v2 = vpack.c.bf16 %v431_v63, %v430_v62  ;;  %v338_v4 = vld [vmem:[%s11913_s23 + $0x18] sm:$0xff]  ;;  %v339_v5 = vld [vmem:[%s11913_s23 + $0x20] sm:$0xff] }
  0x28   : > { %10098 = vmatprep.subr.bf16.mxu0 %v11512_v8  ;;  %v368_v3 = vpack.c.bf16 %v337_v1, %v336_v0  ;;  %v340_v6 = vld [vmem:[%s11913_s23 + $0x30] sm:$0xff]  ;;  %v341_v7 = vld [vmem:[%s11913_s23 + $0x38] sm:$0xff]  ;;  %v342_v11 = vld [vmem:[%s11913_s23 + $0x48] sm:$0xff] }
  0x29   : > { %v343_v12 = vld [vmem:[%s11913_s23 + $0x50] sm:$0xff]  ;;  %v345_v14 = vld [vmem:[%s11913_s23 + $0x68] sm:$0xff]  ;;  %v11526_v19 = vld [vmem:[%s14492_s1 + $0x98] sm:$0xff]  }
  0x2a   : > { %v11525_v15 = vld [vmem:[%s14492_s1 + $0x90] sm:$0xff]   ;;  %v346_v21 = vld [vmem:[%s11913_s23 + $0x78] sm:$0xff]  ;;  %v347_v22 = vld [vmem:[%s11913_s23 + $0x80] sm:$0xff] }
  0x2b   : > { %10099 = vmatpush3.bf16.msra.mxu0 %v11512_v8  ;;  %v12040_v8 = vpack.c.bf16 %v339_v5, %v338_v4  ;;  %v11527_v27 = vld [vmem:[%s14492_s1 + $0xa0] sm:$0xff]   ;;  %v12072_v28 = vpack.c.bf16 %v347_v22, %v346_v21  ;;  %v11528_v29 = vld [vmem:[%s14492_s1 + $0xa8] sm:$0xff]   ;;  %v11529_v37 = vld [vmem:[%s14492_s1 + $0xb0] sm:$0xff]  }
  0x2c   : > { %10100 = vmatprep.subr.bf16.mxu0 %v11513_v9  ;;  %v352_v35 = vld [vmem:[%s11913_s23 + $0xc0] sm:$0xff]  ;;  %v353_v36 = vld [vmem:[%s11913_s23 + $0xc8] sm:$0xff]  ;;  %v354_v43 = vld [vmem:[%s11913_s23 + $0xd8] sm:$0xff] }
  0x2d   : > { %v355_v44 = vld [vmem:[%s11913_s23 + $0xe0] sm:$0xff]  ;;  %v356_v45 = vld [vmem:[%s11913_s23 + $0xf0] sm:$0xff]  ;;  %v357_v46 = vld [vmem:[%s11913_s23 + $0xf8] sm:$0xff] }
  0x2e   : > { %v12104_v50 = vpack.c.bf16 %v355_v44, %v354_v43  ;;  %v12106_v51 = vpack.c.bf16 %v357_v46, %v356_v45  ;;  %v358_v52 = vld [vmem:[%s11913_s23 + $0x108] sm:$0xff]  ;;  %v359_v53 = vld [vmem:[%s11913_s23 + $0x110] sm:$0xff]  ;;  %v360_v56 = vld [vmem:[%s11913_s23 + $0x120] sm:$0xff] }
  0x2f   : > { %10101 = vmatpush3.bf16.msra.mxu0 %v11513_v9  ;;  %v11524_v9 = vld [vmem:[%s14492_s1 + $0x88] sm:$0xff]   ;;  %v12114_v58 = vpack.c.bf16 %v359_v53, %v358_v52  ;;  %v362_v62 = vld [vmem:[%s11913_s23 + $0x138] sm:$0xff]  ;;  %v363_v63 = vld [vmem:[%s11913_s23 + $0x140] sm:$0xff] }
  0x30   : > { %10102 = vmatprep.subr.bf16.mxu0 %v11514_v10  ;;  %v361_v57 = vld [vmem:[%s11913_s23 + $0x128] sm:$0xff]  ;;  %v364_v0 = vld [vmem:[%s11913_s23 + $0x150] sm:$0xff]  ;;  %v365_v1 = vld [vmem:[%s11913_s23 + $0x158] sm:$0xff] }
  0x31   : > { %v12116_v59 = vpack.c.bf16 %v361_v57, %v360_v56  ;;  %v12126_v4 = vpack.c.bf16 %v365_v1, %v364_v0  ;;  %v366_v5 = vld [vmem:[%s11913_s23 + $0x168] sm:$0xff]  ;;  %v895_v44 = vld [vmem:[%s11913_s23 + $0x92] sm:$0xff]  ;;  %v896_v45 = vld [vmem:[%s11913_s23 + $0x9a] sm:$0xff] }
  0x32   : > { %v894_v43 = vld [vmem:[%s11913_s23 + $0x82] sm:$0xff]  ;;  %v12175_v52 = vpack.c.bf16 %v896_v45, %v895_v44  ;;  %v897_v56 = vld [vmem:[%s11913_s23 + $0xaa] sm:$0xff]  ;;  %v898_v57 = vld [vmem:[%s11913_s23 + $0xb2] sm:$0xff] }
  0x33   : > { %10103 = vmatpush3.bf16.msra.mxu0 %v11514_v10  ;;  %v12045_v10 = vpack.c.bf16 %v341_v7, %v340_v6  ;;  %v367_v6 = vld [vmem:[%s11913_s23 + $0x170] sm:$0xff]  ;;  %v883_v7 = vld [vmem:[%s11913_s23 + $0x2] sm:$0xff]  ;;  %v12189_v1 = vpack.c.bf16 %v898_v57, %v897_v56  ;;  %v912_v44 = vld [vmem:[%s11913_s23 + $0x15a] sm:$0xff] }
  0x34   : > { %10136 = vmatprep.subr.bf16.mxu0 %v11515_v13  ;;  %v11535_v46 = vld [vmem:[%s14492_s1 + $0xe0] sm:$0xff]   ;;  %v11536_v53 = vld [vmem:[%s14492_s1 + $0xe8] sm:$0xff]   ;;  %v11537_v0 = vld [vmem:[%s14492_s1 + $0xf0] sm:$0xff]  }
  0x35   : > { %v914_v56 = vld [vmem:[%s11913_s23 + $0x172] sm:$0xff]  ;;  %vm12564_vm9 = vmor %vm3231_vm5, %vm3232_vm6 }
  0x36   : > { %10105 = vmatmul.mubr.bf16.vlgmr.msra.gmra.mrb[0].mxu0 %v11939_v16  ;;  %vm12570_vm10 = vmand %vm3562_vm7, %vm3231_vm5 }
  0x37   : > { %10137 = vmatpush3.bf16.msra.mxu0 %v11515_v13  ;;  %10108 = vmatprep.mubr.bf16.mxu0 %v11941_v17  ;;  %v344_v13 = vld [vmem:[%s11913_s23 + $0x60] sm:$0xff]  ;;  %vm13039_vm13 = vmor %vm4766_vm11, %vm4767_vm12 }
  0x38   : > { %10138 = vmatprep.subr.bf16.mxu0 %v11516_v18  ;;  %v12061_v20 = vpack.c.bf16 %v345_v14, %v344_v13  ;;  %v885_v13 = vld [vmem:[%s11913_s23 + $0x1a] sm:$0xff]  ;;  %v886_v14 = vld [vmem:[%s11913_s23 + $0x22] sm:$0xff] }
  0x39   : > { %v12141_v21 = vpack.c.bf16 %v886_v14, %v885_v13  ;;  %v904_v13 = vld [vmem:[%s11913_s23 + $0xfa] sm:$0xff] }
  0x3a   : > { %v11539_v14 = vld [vmem:[%s14492_s1 + $0x100] sm:$0xff]  }
  0x3b   : > { %10139 = vmatpush3.bf16.msra.mxu0 %v11516_v18  ;;  %v12056_v18 = vpack.c.bf16 %v343_v12, %v342_v11  ;;  %v12134_v11 = vpack.c.bf16 %v367_v6, %v366_v5  ;;  %v11538_v6 = vld [vmem:[%s14492_s1 + $0xf8] sm:$0xff]  }
  0x3c   : > { %10140 = vmatprep.subr.bf16.mxu0 %v11517_v23 }
  0x3e   : > { %10109 = vmatmul.mubr.bf16.gmra.mrb[4].mxu0 %v11955_v24 }
  0x3f   : > { %10112 = vmatprep.mubr.bf16.mxu0 %v11957_v25  ;;  %10141 = vmatpush3.bf16.msra.mxu0 %v11517_v23  ;;  %v348_v23 = vld [vmem:[%s11913_s23 + $0x90] sm:$0xff] }
  0x40   : > { %10142 = vmatprep.subr.bf16.mxu0 %v11518_v26 }
  0x43   : > { %10143 = vmatpush3.bf16.msra.mxu0 %v11518_v26  ;;  %v349_v26 = vld [vmem:[%s11913_s23 + $0x98] sm:$0xff] }
  0x44   : > { %10144 = vmatprep.subr.bf16.mxu0 %v11519_v31  ;;  %v12077_v30 = vpack.c.bf16 %v349_v26, %v348_v23  ;;  %v11532_v23 = vld [vmem:[%s14492_s1 + $0xc8] sm:$0xff]  }
  0x45   : > { %v889_v26 = vld [vmem:[%s11913_s23 + $0x4a] sm:$0xff] }
  0x46   : > { %10113 = vmatmul.mubr.bf16.gmra.mrb[8].mxu0 %v11971_v32 }
  0x47   : > { %10116 = vmatprep.mubr.bf16.mxu0 %v11973_v33  ;;  %10145 = vmatpush3.bf16.msra.mxu0 %v11519_v31  ;;  %v350_v31 = vld [vmem:[%s11913_s23 + $0xa8] sm:$0xff] }
  0x48   : > { %10146 = vmatprep.subr.bf16.mxu0 %v11520_v34 }
  0x4b   : > { %10147 = vmatpush3.bf16.msra.mxu0 %v11520_v34  ;;  %v351_v34 = vld [vmem:[%s11913_s23 + $0xb0] sm:$0xff] }
  0x4c   : > { %10148 = vmatprep.subr.bf16.mxu0 %v11521_v39  ;;  %v12088_v38 = vpack.c.bf16 %v351_v34, %v350_v31  ;;  %v892_v31 = vld [vmem:[%s11913_s23 + $0x6a] sm:$0xff] }
  0x4d   : > { %v11533_v34 = vld [vmem:[%s14492_s1 + $0xd0] sm:$0xff]  }
  0x4e   : > { %10117 = vmatmul.mubr.bf16.gmra.mrb[12].mxu0 %v11987_v40 }
  0x4f   : > { %10120 = vmatprep.mubr.bf16.mxu0 %v11992_v42  ;;  %10149 = vmatpush3.bf16.msra.mxu0 %v11521_v39  ;;  %v11530_v39 = vld [vmem:[%s14492_s1 + $0xb8] sm:$0xff]  }
  0x50   : > { %10150 = vmatprep.subr.bf16.mxu0 %v11522_v41 }
  0x53   : > { %10151 = vmatpush3.bf16.msra.mxu0 %v11522_v41  ;;  %v12093_v41 = vpack.c.bf16 %v353_v36, %v352_v35 }
  0x54   : > { %10184 = vmatprep.subr.bf16.mxu0 %v11523_v47 }
  0x56   : > { %10121 = vmatmul.mubr.bf16.gmra.mrb[16].mxu0 %v12003_v48 }
  0x57   : > { %10124 = vmatprep.mubr.bf16.mxu0 %v12005_v49 }
  0x5e   : > { %10125 = vmatmul.mubr.bf16.gmra.mrb[20].mxu0 %v12013_v54 }
  0x5f   : > { %10128 = vmatprep.mubr.bf16.mxu0 %v12015_v55 }
  0x66   : > { %10129 = vmatmul.mubr.bf16.gmra.mrb[24].mxu0 %v12023_v60 }
  0x67   : > { %10132 = vmatprep.mubr.bf16.mxu0 %v12025_v61 }
  0x6e   : > { %10133 = vmatmul.mubr.bf16.gmra.mrb[28].mxu0 %v12033_v2 }
  0x6f   : > { %10152 = vmatprep.mubr.bf16.mxu0 %v368_v3  ;;  %v12124_v3 = vpack.c.bf16 %v363_v63, %v362_v62  ;;  %v899_v62 = vld [vmem:[%s11913_s23 + $0xc2] sm:$0xff]  ;;  %v900_v63 = vld [vmem:[%s11913_s23 + $0xca] sm:$0xff] }
  0x70   : > { %v12191_v5 = vpack.c.bf16 %v900_v63, %v899_v62  ;;  %v11540_v62 = vld [vmem:[%s14492_s1 + $0x108] sm:$0xff]   ;;  %v11541_v63 = vld [vmem:[%s14492_s1 + $0x110] sm:$0xff]  }
  0x76   : > { %10153 = vmatmul.mubr.bf16.vlgmr.msra.gmra.mrb[0].mxu0 %v12040_v8 }
  0x77   : > { %10185 = vmatpush3.bf16.msra.mxu0 %v11523_v47  ;;  %10156 = vmatprep.mubr.bf16.mxu0 %v12045_v10  ;;  %v11531_v47 = vld [vmem:[%s14492_s1 + $0xc0] sm:$0xff]  }
  0x78   : > { %10186 = vmatprep.subr.bf16.mxu0 %v11524_v9 }
  0x7b   : > { %10187 = vmatpush3.bf16.msra.mxu0 %v11524_v9  ;;  %v884_v9 = vld [vmem:[%s11913_s23 + $0xa] sm:$0xff] }
  0x7c   : > { %10188 = vmatprep.subr.bf16.mxu0 %v11525_v15  ;;  %v915_v12 = vpack.c.bf16 %v884_v9, %v883_v7  ;;  %v901_v7 = vld [vmem:[%s11913_s23 + $0xda] sm:$0xff]  ;;  %v902_v9 = vld [vmem:[%s11913_s23 + $0xe2] sm:$0xff] }
  0x7e   : > { %10157 = vmatmul.mubr.bf16.gmra.mrb[4].mxu0 %v12056_v18 }
  0x7f   : > { %10160 = vmatprep.mubr.bf16.mxu0 %v12061_v20  ;;  %10189 = vmatpush3.bf16.msra.mxu0 %v11525_v15  ;;  %v887_v15 = vld [vmem:[%s11913_s23 + $0x32] sm:$0xff] }
  0x80   : > { %10190 = vmatprep.subr.bf16.mxu0 %v11526_v19 }
  0x83   : > { %10191 = vmatpush3.bf16.msra.mxu0 %v11526_v19  ;;  %v888_v19 = vld [vmem:[%s11913_s23 + $0x3a] sm:$0xff] }
  0x84   : > { %10192 = vmatprep.subr.bf16.mxu0 %v11527_v27  ;;  %v12143_v22 = vpack.c.bf16 %v888_v19, %v887_v15  ;;  %v12205_v15 = vpack.c.bf16 %v902_v9, %v901_v7  ;;  %v11545_v7 = vld [vmem:[%s14492_s1 + $0x130] sm:$0xff]   ;;  %v11546_v9 = vld [vmem:[%s14492_s1 + $0x138] sm:$0xff]  }
  0x86   : > { %10161 = vmatmul.mubr.bf16.gmra.mrb[8].mxu0 %v12072_v28 }
  0x87   : > { %10164 = vmatprep.mubr.bf16.mxu0 %v12077_v30  ;;  %10193 = vmatpush3.bf16.msra.mxu0 %v11527_v27  ;;  %v890_v27 = vld [vmem:[%s11913_s23 + $0x52] sm:$0xff] }
  0x88   : > { %10194 = vmatprep.subr.bf16.mxu0 %v11528_v29  ;;  %v12157_v35 = vpack.c.bf16 %v890_v27, %v889_v26  ;;  %v906_v26 = vld [vmem:[%s11913_s23 + $0x112] sm:$0xff]  ;;  %v907_v27 = vld [vmem:[%s11913_s23 + $0x122] sm:$0xff] }
  0x8b   : > { %10195 = vmatpush3.bf16.msra.mxu0 %v11528_v29  ;;  %v891_v29 = vld [vmem:[%s11913_s23 + $0x62] sm:$0xff] }
  0x8c   : > { %10196 = vmatprep.subr.bf16.mxu0 %v11529_v37  ;;  %v12159_v36 = vpack.c.bf16 %v892_v31, %v891_v29  ;;  %v908_v29 = vld [vmem:[%s11913_s23 + $0x12a] sm:$0xff] }
  0x8e   : > { %10165 = vmatmul.mubr.bf16.gmra.mrb[12].mxu0 %v12088_v38 }
  0x8f   : > { %10168 = vmatprep.mubr.bf16.mxu0 %v12093_v41  ;;  %10197 = vmatpush3.bf16.msra.mxu0 %v11529_v37  ;;  %v11534_v37 = vld [vmem:[%s14492_s1 + $0xd8] sm:$0xff]  }
  0x90   : > { %10198 = vmatprep.subr.bf16.mxu0 %v11530_v39 }
  0x93   : > { %10199 = vmatpush3.bf16.msra.mxu0 %v11530_v39  ;;  %v893_v39 = vld [vmem:[%s11913_s23 + $0x7a] sm:$0xff] }
  0x94   : > { %10232 = vmatprep.subr.bf16.mxu0 %v11531_v47 }
  0x96   : > { %10169 = vmatmul.mubr.bf16.gmra.mrb[16].mxu0 %v12104_v50 }
  0x97   : > { %10172 = vmatprep.mubr.bf16.mxu0 %v12106_v51 }
  0x9e   : > { %10173 = vmatmul.mubr.bf16.gmra.mrb[20].mxu0 %v12114_v58 }
  0x9f   : > { %10176 = vmatprep.mubr.bf16.mxu0 %v12116_v59 }
  0xa6   : > { %10177 = vmatmul.mubr.bf16.gmra.mrb[24].mxu0 %v12124_v3 }
  0xa7   : > { %10180 = vmatprep.mubr.bf16.mxu0 %v12126_v4 }
  0xae   : > { %10181 = vmatmul.mubr.bf16.gmra.mrb[28].mxu0 %v12134_v11 }
  0xaf   : > { %10200 = vmatprep.mubr.bf16.mxu0 %v915_v12  ;;  %v903_v12 = vld [vmem:[%s11913_s23 + $0xf2] sm:$0xff] }
  0xb0   : > { %v12207_v19 = vpack.c.bf16 %v904_v13, %v903_v12  ;;  %v11547_v12 = vld [vmem:[%s14492_s1 + $0x140] sm:$0xff]  }
  0xb1   : > { %v8852_v13 = vld [vmem:[%s11913_s23 + $0x180] sm:$0xff] }
  0xb6   : > { %10201 = vmatmul.mubr.bf16.vlgmr.msra.gmra.mrb[0].mxu0 %v12141_v21 }
  0xb7   : > { %10233 = vmatpush3.bf16.msra.mxu0 %v11531_v47  ;;  %10204 = vmatprep.mubr.bf16.mxu0 %v12143_v22  ;;  %v12173_v47 = vpack.c.bf16 %v894_v43, %v893_v39  ;;  %v910_v39 = vld [vmem:[%s11913_s23 + $0x142] sm:$0xff]  ;;  %v911_v43 = vld [vmem:[%s11913_s23 + $0x152] sm:$0xff] }
  0xb8   : > { %10234 = vmatprep.subr.bf16.mxu0 %v11532_v23 }
  0xbb   : > { %10235 = vmatpush3.bf16.msra.mxu0 %v11532_v23  ;;  %v905_v23 = vld [vmem:[%s11913_s23 + $0x10a] sm:$0xff] }
  0xbc   : > { %10236 = vmatprep.subr.bf16.mxu0 %v11533_v34  ;;  %v12215_v31 = vpack.c.bf16 %v906_v26, %v905_v23  ;;  %v11548_v26 = vld [vmem:[%s14492_s1 + $0x148] sm:$0xff]  }
  0xbe   : > { %10205 = vmatmul.mubr.bf16.gmra.mrb[4].mxu0 %v12157_v35 }
  0xbf   : > { %10208 = vmatprep.mubr.bf16.mxu0 %v12159_v36  ;;  %10237 = vmatpush3.bf16.msra.mxu0 %v11533_v34  ;;  %v12217_v34 = vpack.c.bf16 %v908_v29, %v907_v27  ;;  %v11549_v27 = vld [vmem:[%s14492_s1 + $0x150] sm:$0xff]  }
  0xc0   : > { %10238 = vmatprep.subr.bf16.mxu0 %v11534_v37  ;;  %v9048_v29 = vld [vmem:[%s11913_s23 + $0x49] sm:$0xff] }
  0xc3   : > { %10239 = vmatpush3.bf16.msra.mxu0 %v11534_v37  ;;  %v909_v37 = vld [vmem:[%s11913_s23 + $0x13a] sm:$0xff] }
  0xc4   : > { %10240 = vmatprep.subr.bf16.mxu0 %v11535_v46  ;;  %v12225_v45 = vpack.c.bf16 %v910_v39, %v909_v37  ;;  %v9052_v37 = vld [vmem:[%s11913_s23 + $0x79] sm:$0xff]  ;;  %v9053_v39 = vld [vmem:[%s11913_s23 + $0x81] sm:$0xff] }
  0xc6   : > { %10209 = vmatmul.mubr.bf16.gmra.mrb[8].mxu0 %v12173_v47 }
  0xc7   : > { %10212 = vmatprep.mubr.bf16.mxu0 %v12175_v52  ;;  %10241 = vmatpush3.bf16.msra.mxu0 %v11535_v46  ;;  %v12227_v46 = vpack.c.bf16 %v912_v44, %v911_v43  ;;  %v9054_v43 = vld [vmem:[%s11913_s23 + $0x91] sm:$0xff]  ;;  %v9055_v44 = vld [vmem:[%s11913_s23 + $0x99] sm:$0xff] }
  0xc8   : > { %10242 = vmatprep.subr.bf16.mxu0 %v11536_v53 }
  0xcb   : > { %10243 = vmatpush3.bf16.msra.mxu0 %v11536_v53  ;;  %v913_v53 = vld [vmem:[%s11913_s23 + $0x16a] sm:$0xff] }
  0xcc   : > { %10244 = vmatprep.subr.bf16.mxu0 %v11537_v0  ;;  %v12233_v57 = vpack.c.bf16 %v914_v56, %v913_v53  ;;  %v2451_v53 = vpack.c.bf16 %v9055_v44, %v9054_v43  ;;  %v11574_v56 = vld [vmem:[%s14492_s1 + $0x218] sm:$0xff]  }
  0xcd   : > { %v9118_v43 = vld [vmem:[%s11913_s23 + $0xf2] sm:$0xff]  ;;  %v9119_v44 = vld [vmem:[%s11913_s23 + $0xfa] sm:$0xff] }
  0xce   : > { %10213 = vmatmul.mubr.bf16.gmra.mrb[12].mxu0 %v12189_v1 }
  0xcf   : > { %10216 = vmatprep.mubr.bf16.mxu0 %v12191_v5  ;;  %10245 = vmatpush3.bf16.msra.mxu0 %v11537_v0  ;;  %v11543_v0 = vld [vmem:[%s14492_s1 + $0x120] sm:$0xff]  }
  0xd0   : > { %10246 = vmatprep.subr.bf16.mxu0 %v11538_v6 }
  0xd3   : > { %10247 = vmatpush3.bf16.msra.mxu0 %v11538_v6  ;;  %v11544_v6 = vld [vmem:[%s14492_s1 + $0x128] sm:$0xff]  }
  0xd4   : > { %10280 = vmatprep.subr.bf16.mxu0 %v11539_v14 }
  0xd6   : > { %10217 = vmatmul.mubr.bf16.gmra.mrb[16].mxu0 %v12205_v15 }
  0xd7   : > { %10220 = vmatprep.mubr.bf16.mxu0 %v12207_v19 }
  0xde   : > { %10221 = vmatmul.mubr.bf16.gmra.mrb[20].mxu0 %v12215_v31 }
  0xdf   : > { %10224 = vmatprep.mubr.bf16.mxu0 %v12217_v34 }
  0xe6   : > { %10225 = vmatmul.mubr.bf16.gmra.mrb[24].mxu0 %v12225_v45 }
  0xe7   : > { %10228 = vmatprep.mubr.bf16.mxu0 %v12227_v46 }
  0xee   : > { %10229 = vmatmul.mubr.bf16.gmra.mrb[28].mxu0 %v12233_v57 }
  0xef   : > { %10248 = vmatprep.mubr.bf16.mxu0 %v12040_v8  ;;  %v11542_v8 = vld [vmem:[%s14492_s1 + $0x118] sm:$0xff]  }
  0xf6   : > { %10249 = vmatmul.mubr.bf16.vlgmr.msra.gmra.mrb[0].mxu0 %v12045_v10 }
  0xf7   : > { %10281 = vmatpush3.bf16.msra.mxu0 %v11539_v14  ;;  %10252 = vmatprep.mubr.bf16.mxu0 %v12056_v18  ;;  %v8853_v14 = vld [vmem:[%s11913_s23 + $0x188] sm:$0xff] }
  0xf8   : > { %10282 = vmatprep.subr.bf16.mxu0 %v11540_v62  ;;  %v12277_v23 = vpack.c.bf16 %v8853_v14, %v8852_v13  ;;  %v9061_v13 = vld [vmem:[%s11913_s23 + $0xe1] sm:$0xff]  ;;  %v9062_v14 = vld [vmem:[%s11913_s23 + $0xf1] sm:$0xff] }
  0xfb   : > { %10283 = vmatpush3.bf16.msra.mxu0 %v11540_v62  ;;  %v9057_v62 = vld [vmem:[%s11913_s23 + $0xb1] sm:$0xff] }
  0xfc   : > { %10284 = vmatprep.subr.bf16.mxu0 %v11541_v63 }
  0xfe   : > { %10253 = vmatmul.mubr.bf16.gmra.mrb[4].mxu0 %v12061_v20 }
  0xff   : > { %10256 = vmatprep.mubr.bf16.mxu0 %v12072_v28  ;;  %10285 = vmatpush3.bf16.msra.mxu0 %v11541_v63  ;;  %v9058_v63 = vld [vmem:[%s11913_s23 + $0xc1] sm:$0xff] }
 0x100   : > { %10286 = vmatprep.subr.bf16.mxu0 %v11542_v8 }
 0x103   : > { %10287 = vmatpush3.bf16.msra.mxu0 %v11542_v8  ;;  %v9059_v8 = vld [vmem:[%s11913_s23 + $0xc9] sm:$0xff] }
 0x104   : > { %10288 = vmatprep.subr.bf16.mxu0 %v11543_v0 }
 0x106   : > { %10257 = vmatmul.mubr.bf16.gmra.mrb[8].mxu0 %v12077_v30 }
 0x107   : > { %10260 = vmatprep.mubr.bf16.mxu0 %v12088_v38  ;;  %10289 = vmatpush3.bf16.msra.mxu0 %v11543_v0  ;;  %v11575_v0 = vld [vmem:[%s14492_s1 + $0x220] sm:$0xff]  }
 0x108   : > { %10290 = vmatprep.subr.bf16.mxu0 %v11544_v6 }
 0x10b   : > { %10291 = vmatpush3.bf16.msra.mxu0 %v11544_v6 }
 0x10c   : > { %10292 = vmatprep.subr.bf16.mxu0 %v11545_v7 }
 0x10e   : > { %10261 = vmatmul.mubr.bf16.gmra.mrb[12].mxu0 %v12093_v41 }
 0x10f   : > { %10264 = vmatprep.mubr.bf16.mxu0 %v12104_v50  ;;  %10293 = vmatpush3.bf16.msra.mxu0 %v11545_v7  ;;  %v2453_v7 = vpack.c.bf16 %v9059_v8, %v9058_v63 }
 0x110   : > { %10294 = vmatprep.subr.bf16.mxu0 %v11546_v9 }
 0x113   : > { %10295 = vmatpush3.bf16.msra.mxu0 %v11546_v9  ;;  %v11576_v9 = vld [vmem:[%s14492_s1 + $0x228] sm:$0xff]  }
 0x114   : > { %10328 = vmatprep.subr.bf16.mxu0 %v11547_v12 }
 0x116   : > { %10265 = vmatmul.mubr.bf16.gmra.mrb[16].mxu0 %v12106_v51 }
 0x117   : > { %10268 = vmatprep.mubr.bf16.mxu0 %v12114_v58 }
 0x11e   : > { %10269 = vmatmul.mubr.bf16.gmra.mrb[20].mxu0 %v12116_v59 }
 0x11f   : > { %10272 = vmatprep.mubr.bf16.mxu0 %v12124_v3 }
 0x126   : > { %10273 = vmatmul.mubr.bf16.gmra.mrb[24].mxu0 %v12126_v4 }
 0x127   : > { %10276 = vmatprep.mubr.bf16.mxu0 %v12134_v11 }
 0x12e   : > { %10277 = vmatmul.mubr.bf16.gmra.mrb[28].mxu0 %v12277_v23 }
 0x12f   : > { %10296 = vmatprep.mubr.bf16.mxu0 %v11939_v16  ;;  %v11550_v16 = vld [vmem:[%s14492_s1 + $0x158] sm:$0xff]  }
 0x136   : > { %10297 = vmatmul.mubr.bf16.vlgmr.msra.gmra.mrb[0].mxu0 %v11941_v17  ;;  %v11551_v17 = vld [vmem:[%s14492_s1 + $0x160] sm:$0xff]  }
 0x137   : > { %10329 = vmatpush3.bf16.msra.mxu0 %v11547_v12  ;;  %10300 = vmatprep.mubr.bf16.mxu0 %v11955_v24  ;;  %v11552_v24 = vld [vmem:[%s14492_s1 + $0x168] sm:$0xff]   ;;  %v9060_v12 = vld [vmem:[%s11913_s23 + $0xd9] sm:$0xff] }
 0x138   : > { %10330 = vmatprep.subr.bf16.mxu0 %v11548_v26 }
 0x13b   : > { %10331 = vmatpush3.bf16.msra.mxu0 %v11548_v26  ;;  %v11577_v26 = vld [vmem:[%s14492_s1 + $0x230] sm:$0xff]  }
 0x13c   : > { %10332 = vmatprep.subr.bf16.mxu0 %v11549_v27 }
 0x13e   : > { %10301 = vmatmul.mubr.bf16.gmra.mrb[4].mxu0 %v11957_v25  ;;  %v11553_v25 = vld [vmem:[%s14492_s1 + $0x170] sm:$0xff]  }
 0x13f   : > { %10304 = vmatprep.mubr.bf16.mxu0 %v11971_v32  ;;  %10333 = vmatpush3.bf16.msra.mxu0 %v11549_v27  ;;  %v11554_v32 = vld [vmem:[%s14492_s1 + $0x178] sm:$0xff]   ;;  %v2454_v27 = vpack.c.bf16 %v9061_v13, %v9060_v12 }
 0x140   : > { %10334 = vmatprep.subr.bf16.mxu0 %v11550_v16 }
 0x143   : > { %10335 = vmatpush3.bf16.msra.mxu0 %v11550_v16 }
 0x144   : > { %10336 = vmatprep.subr.bf16.mxu0 %v11551_v17 }
 0x146   : > { %10305 = vmatmul.mubr.bf16.gmra.mrb[8].mxu0 %v11973_v33  ;;  %v11555_v33 = vld [vmem:[%s14492_s1 + $0x180] sm:$0xff]  }
 0x147   : > { %10308 = vmatprep.mubr.bf16.mxu0 %v11987_v40  ;;  %10337 = vmatpush3.bf16.msra.mxu0 %v11551_v17  ;;  %v8908_v40 = vld [vmem:[%s11913_s23 + $0x181] sm:$0xff]  ;;  %v11578_v17 = vld [vmem:[%s14492_s1 + $0x238] sm:$0xff]  }
 0x148   : > { %10338 = vmatprep.subr.bf16.mxu0 %v11552_v24 }
 0x14b   : > { %10339 = vmatpush3.bf16.msra.mxu0 %v11552_v24  ;;  %v9064_v24 = vld [vmem:[%s11913_s23 + $0x109] sm:$0xff] }
 0x14c   : > { %10340 = vmatprep.subr.bf16.mxu0 %v11553_v25 }
 0x14e   : > { %10309 = vmatmul.mubr.bf16.gmra.mrb[12].mxu0 %v11992_v42  ;;  %v8909_v42 = vld [vmem:[%s11913_s23 + $0x189] sm:$0xff] }
 0x14f   : > { %10312 = vmatprep.mubr.bf16.mxu0 %v12003_v48  ;;  %10341 = vmatpush3.bf16.msra.mxu0 %v11553_v25  ;;  %v12321_v48 = vpack.c.bf16 %v8909_v42, %v8908_v40  ;;  %v9065_v25 = vld [vmem:[%s11913_s23 + $0x111] sm:$0xff] }
 0x150   : > { %10342 = vmatprep.subr.bf16.mxu0 %v11554_v32  ;;  %v2456_v40 = vpack.c.bf16 %v9065_v25, %v9064_v24  ;;  %v11579_v24 = vld [vmem:[%s14493_s2 + $0x40] sm:$0xff]   ;;  %v11580_v25 = vld [vmem:[%s14493_s2 + $0x48] sm:$0xff]  }
 0x151   : > { %10520 = vmatprep.subr.bf16.mxu1 %v11579_v24 }
 0x152   : > { %10521 = vmatpush3.bf16.msra.mxu1 %v11579_v24 }
 0x153   : > { %10343 = vmatpush3.bf16.msra.mxu0 %v11554_v32  ;;  %v9066_v32 = vld [vmem:[%s11913_s23 + $0x121] sm:$0xff]  ;;  %10522 = vmatprep.subr.bf16.mxu1 %v11580_v25 }
 0x154   : > { %10376 = vmatprep.subr.bf16.mxu0 %v11555_v33 }
 0x156   : > { %10313 = vmatmul.mubr.bf16.gmra.mrb[16].mxu0 %v12005_v49  ;;  %v11556_v49 = vld [vmem:[%s14492_s1 + $0x188] sm:$0xff]   ;;  %10523 = vmatpush3.bf16.msra.mxu1 %v11580_v25 }
 0x157   : > { %10316 = vmatprep.mubr.bf16.mxu0 %v12013_v54  ;;  %v11557_v54 = vld [vmem:[%s14492_s1 + $0x190] sm:$0xff]  }
 0x15e   : > { %10317 = vmatmul.mubr.bf16.gmra.mrb[20].mxu0 %v12015_v55  ;;  %v11558_v55 = vld [vmem:[%s14492_s1 + $0x198] sm:$0xff]  }
 0x15f   : > { %10320 = vmatprep.mubr.bf16.mxu0 %v12023_v60  ;;  %v11559_v60 = vld [vmem:[%s14492_s1 + $0x1a0] sm:$0xff]  }
 0x166   : > { %10321 = vmatmul.mubr.bf16.gmra.mrb[24].mxu0 %v12025_v61  ;;  %v11560_v61 = vld [vmem:[%s14492_s1 + $0x1a8] sm:$0xff]  }
 0x167   : > { %10324 = vmatprep.mubr.bf16.mxu0 %v12033_v2  ;;  %v11561_v2 = vld [vmem:[%s14492_s1 + $0x1b0] sm:$0xff]  }
 0x16e   : > { %10325 = vmatmul.mubr.bf16.gmra.mrb[28].mxu0 %v12321_v48 }
 0x16f   : > { %10344 = vmatprep.mubr.bf16.mxu0 %v12141_v21  ;;  %v11562_v21 = vld [vmem:[%s14492_s1 + $0x1b8] sm:$0xff]  }
 0x176   : > { %10345 = vmatmul.mubr.bf16.vlgmr.msra.gmra.mrb[0].mxu0 %v12143_v22  ;;  %v11563_v22 = vld [vmem:[%s14492_s1 + $0x1c0] sm:$0xff]  }
 0x177   : > { %10377 = vmatpush3.bf16.msra.mxu0 %v11555_v33  ;;  %10348 = vmatprep.mubr.bf16.mxu0 %v12157_v35  ;;  %v8964_v35 = vld [vmem:[%s11913_s23 + $0x182] sm:$0xff] }
 0x178   : > { %10378 = vmatprep.subr.bf16.mxu0 %v11556_v49  ;;  %v9067_v33 = vld [vmem:[%s11913_s23 + $0x129] sm:$0xff] }
 0x179   : > { %v2457_v42 = vpack.c.bf16 %v9067_v33, %v9066_v32  ;;  %v11582_v32 = vld [vmem:[%s14493_s2 + $0x58] sm:$0xff]   ;;  %v11583_v33 = vld [vmem:[%s14493_s2 + $0x60] sm:$0xff]  }
 0x17b   : > { %10379 = vmatpush3.bf16.msra.mxu0 %v11556_v49  ;;  %v9068_v49 = vld [vmem:[%s11913_s23 + $0x139] sm:$0xff] }
 0x17c   : > { %10380 = vmatprep.subr.bf16.mxu0 %v11557_v54 }
 0x17e   : > { %10349 = vmatmul.mubr.bf16.gmra.mrb[4].mxu0 %v12159_v36  ;;  %v8965_v36 = vld [vmem:[%s11913_s23 + $0x18a] sm:$0xff] }
 0x17f   : > { %10352 = vmatprep.mubr.bf16.mxu0 %v12173_v47  ;;  %10381 = vmatpush3.bf16.msra.mxu0 %v11557_v54  ;;  %v12365_v47 = vpack.c.bf16 %v8965_v36, %v8964_v35  ;;  %v9069_v54 = vld [vmem:[%s11913_s23 + $0x141] sm:$0xff]  ;;  %v9076_v36 = vld [vmem:[%s11913_s23 + $0x199] sm:$0xff] }
 0x180   : > { %10382 = vmatprep.subr.bf16.mxu0 %v11558_v55 }
 0x183   : > { %10383 = vmatpush3.bf16.msra.mxu0 %v11558_v55  ;;  %v9070_v55 = vld [vmem:[%s11913_s23 + $0x151] sm:$0xff] }
 0x184   : > { %10384 = vmatprep.subr.bf16.mxu0 %v11559_v60 }
 0x186   : > { %10353 = vmatmul.mubr.bf16.gmra.mrb[8].mxu0 %v12175_v52  ;;  %v11564_v52 = vld [vmem:[%s14492_s1 + $0x1c8] sm:$0xff]  }
 0x187   : > { %10356 = vmatprep.mubr.bf16.mxu0 %v12189_v1  ;;  %10385 = vmatpush3.bf16.msra.mxu0 %v11559_v60  ;;  %v11565_v1 = vld [vmem:[%s14492_s1 + $0x1d0] sm:$0xff]   ;;  %v9071_v60 = vld [vmem:[%s11913_s23 + $0x159] sm:$0xff] }
 0x188   : > { %10386 = vmatprep.subr.bf16.mxu0 %v11560_v61 }
 0x18b   : > { %10387 = vmatpush3.bf16.msra.mxu0 %v11560_v61  ;;  %v2458_v61 = vpack.c.bf16 %v9069_v54, %v9068_v49 }
 0x18c   : > { %10388 = vmatprep.subr.bf16.mxu0 %v11561_v2 }
 0x18e   : > { %10357 = vmatmul.mubr.bf16.gmra.mrb[12].mxu0 %v12191_v5  ;;  %v9047_v5 = vld [vmem:[%s11913_s23 + $0x39] sm:$0xff] }
 0x18f   : > { %10360 = vmatprep.mubr.bf16.mxu0 %v12205_v15  ;;  %10389 = vmatpush3.bf16.msra.mxu0 %v11561_v2  ;;  %v2459_v2 = vpack.c.bf16 %v9071_v60, %v9070_v55 }
 0x190   : > { %10390 = vmatprep.subr.bf16.mxu0 %v11562_v21 }
 0x193   : > { %10391 = vmatpush3.bf16.msra.mxu0 %v11562_v21  ;;  %v9072_v21 = vld [vmem:[%s11913_s23 + $0x169] sm:$0xff] }
 0x194   : > { %10424 = vmatprep.subr.bf16.mxu0 %v11563_v22 }
 0x196   : > { %10361 = vmatmul.mubr.bf16.gmra.mrb[16].mxu0 %v12207_v19 }
 0x197   : > { %10364 = vmatprep.mubr.bf16.mxu0 %v12215_v31  ;;  %v11807_v31 = vmov 0  }
 0x198   : > { %288 = vst [vmem:[#allocation2 + $0x18] sm:$0xf] %v11807_v31  ;;  %282 = vst [vmem:[#allocation2] sm:$0xf] %v11807_v31 }
 0x199   : > { %283 = vst [vmem:[#allocation2 + $0x4] sm:$0xf] %v11807_v31  ;;  %284 = vst [vmem:[#allocation2 + $0x8] sm:$0x1] %v11807_v31 }
 0x19a   : > { %285 = vst [vmem:[#allocation2 + $0xc] sm:$0xf] %v11807_v31  ;;  %286 = vst [vmem:[#allocation2 + $0x10] sm:$0xf] %v11807_v31 }
 0x19b   : > { %287 = vst [vmem:[#allocation2 + $0x14] sm:$0x1] %v11807_v31  ;;  %289 = vst [vmem:[#allocation2 + $0x1c] sm:$0xf] %v11807_v31 }
 0x19c   : > { %290 = vst [vmem:[#allocation2 + $0x20] sm:$0x1] %v11807_v31  ;;  %291 = vst [vmem:[#allocation2 + $0x24] sm:$0xf] %v11807_v31 }
 0x19d   : > { %292 = vst [vmem:[#allocation2 + $0x28] sm:$0xf] %v11807_v31  ;;  %293 = vst [vmem:[#allocation2 + $0x2c] sm:$0x1] %v11807_v31 }
 0x19e   : > { %10365 = vmatmul.mubr.bf16.gmra.mrb[20].mxu0 %v12217_v34  ;;  %294 = vst [vmem:[#allocation2 + $0x30] sm:$0xf] %v11807_v31  ;;  %295 = vst [vmem:[#allocation2 + $0x34] sm:$0xf] %v11807_v31  ;;  %v11572_v34 = vld [vmem:[%s14492_s1 + $0x208] sm:$0xff]  }
 0x19f   : > { %10368 = vmatprep.mubr.bf16.mxu0 %v12225_v45  ;;  %296 = vst [vmem:[#allocation2 + $0x38] sm:$0x1] %v11807_v31  ;;  %297 = vst [vmem:[#allocation2 + $0x3c] sm:$0xf] %v11807_v31  ;;  %v11573_v45 = vld [vmem:[%s14492_s1 + $0x210] sm:$0xff]  }
 0x1a0   : > { %298 = vst [vmem:[#allocation2 + $0x40] sm:$0xf] %v11807_v31  ;;  %299 = vst [vmem:[#allocation2 + $0x44] sm:$0x1] %v11807_v31  ;;  %v3672_v49 = vld [vmem:[#allocation2] sm:$0xf] }
 0x1a1   : > { %300 = vst [vmem:[#allocation2 + $0x48] sm:$0xf] %v11807_v31  ;;  %301 = vst [vmem:[#allocation2 + $0x4c] sm:$0xf] %v11807_v31  ;;  %v3673_v54 = vld [vmem:[#allocation2 + $0x4] sm:$0xf] }
 0x1a2   : > { %302 = vst [vmem:[#allocation2 + $0x50] sm:$0x1] %v11807_v31  ;;  %303 = vst [vmem:[#allocation2 + $0x54] sm:$0xf] %v11807_v31  ;;  %v3740_v55 = vshrl.u32 %v3672_v49, 16  ;;  %v3743_v60 = vshll.u32 %v3672_v49, 16 }
 0x1a3   : > { %304 = vst [vmem:[#allocation2 + $0x58] sm:$0xf] %v11807_v31  ;;  %305 = vst [vmem:[#allocation2 + $0x5c] sm:$0x1] %v11807_v31 }
 0x1a4   : > { %306 = vst [vmem:[#allocation2 + $0x60] sm:$0xf] %v11807_v31  ;;  %307 = vst [vmem:[#allocation2 + $0x64] sm:$0xf] %v11807_v31 }
 0x1a5   : > { %308 = vst [vmem:[#allocation2 + $0x68] sm:$0x1] %v11807_v31  ;;  %309 = vst [vmem:[#allocation2 + $0x6c] sm:$0xf] %v11807_v31 }
 0x1a6   : > { %10369 = vmatmul.mubr.bf16.gmra.mrb[24].mxu0 %v12227_v46  ;;  %310 = vst [vmem:[#allocation2 + $0x70] sm:$0xf] %v11807_v31  ;;  %311 = vst [vmem:[#allocation2 + $0x74] sm:$0x1] %v11807_v31  ;;  %v2450_v46 = vpack.c.bf16 %v9053_v39, %v9052_v37  ;;  %v9116_v37 = vld [vmem:[%s11913_s23 + $0xda] sm:$0xff]  ;;  %v9117_v39 = vld [vmem:[%s11913_s23 + $0xe2] sm:$0xff] }
 0x1a7   : > { %10372 = vmatprep.mubr.bf16.mxu0 %v12233_v57  ;;  %312 = vst [vmem:[#allocation2 + $0x78] sm:$0xf] %v11807_v31  ;;  %313 = vst [vmem:[#allocation2 + $0x7c] sm:$0xf] %v11807_v31  ;;  %v9056_v57 = vld [vmem:[%s11913_s23 + $0xa9] sm:$0xff] }
 0x1a8   : > { %314 = vst [vmem:[#allocation2 + $0x80] sm:$0x1] %v11807_v31  ;;  %315 = vst [vmem:[#allocation2 + $0x84] sm:$0xf] %v11807_v31  ;;  %v2452_v6 = vpack.c.bf16 %v9057_v62, %v9056_v57  ;;  %v9122_v57 = vld [vmem:[%s11913_s23 + $0x122] sm:$0xff]  ;;  %v9123_v62 = vld [vmem:[%s11913_s23 + $0x12a] sm:$0xff] }
 0x1a9   : > { %316 = vst [vmem:[#allocation2 + $0x88] sm:$0xf] %v11807_v31  ;;  %317 = vst [vmem:[#allocation2 + $0x8c] sm:$0x1] %v11807_v31  ;;  %v2763_v8 = vpack.c.bf16 %v9123_v62, %v9122_v57 }
 0x1aa   : > { %318 = vst [vmem:[#allocation2 + $0x90] sm:$0xf] %v11807_v31  ;;  %319 = vst [vmem:[#allocation2 + $0x94] sm:$0xf] %v11807_v31 }
 0x1ab   : > { %320 = vst [vmem:[#allocation2 + $0x98] sm:$0x1] %v11807_v31  ;;  %321 = vst [vmem:[#allocation2 + $0x9c] sm:$0xf] %v11807_v31 }
 0x1ac   : > { %322 = vst [vmem:[#allocation2 + $0xa0] sm:$0xf] %v11807_v31  ;;  %323 = vst [vmem:[#allocation2 + $0xa4] sm:$0x1] %v11807_v31 }
 0x1ad   : > { %324 = vst [vmem:[#allocation2 + $0xa8] sm:$0xf] %v11807_v31  ;;  %325 = vst [vmem:[#allocation2 + $0xac] sm:$0xf] %v11807_v31 }
 0x1ae   : > { %10373 = vmatmul.mubr.bf16.gmra.mrb[28].mxu0 %v12365_v47  ;;  %326 = vst [vmem:[#allocation2 + $0xb0] sm:$0x1] %v11807_v31  ;;  %327 = vst [vmem:[#allocation2 + $0xb4] sm:$0xf] %v11807_v31 }
 0x1af   : > { %10392 = vmatprep.mubr.bf16.mxu0 %v12045_v10  ;;  %v11566_v10 = vld [vmem:[%s14492_s1 + $0x1d8] sm:$0xff]   ;;  %328 = vst [vmem:[#allocation2 + $0xb8] sm:$0xf] %v11807_v31  ;;  %329 = vst [vmem:[#allocation2 + $0xbc] sm:$0x1] %v11807_v31 }
 0x1b0   : > { %330 = vst [vmem:[#allocation2 + $0xc0] sm:$0xf] %v11807_v31  ;;  %331 = vst [vmem:[#allocation2 + $0xc4] sm:$0xf] %v11807_v31 }
 0x1b1   : > { %332 = vst [vmem:[#allocation2 + $0xc8] sm:$0x1] %v11807_v31  ;;  %333 = vst [vmem:[#allocation2 + $0xcc] sm:$0xf] %v11807_v31 }
 0x1b2   : > { %334 = vst [vmem:[#allocation2 + $0xd0] sm:$0xf] %v11807_v31  ;;  %335 = vst [vmem:[#allocation2 + $0xd4] sm:$0x1] %v11807_v31  ;;  %v9112_v31 = vld [vmem:[%s11913_s23 + $0xaa] sm:$0xff] }
 0x1b6   : > { %10393 = vmatmul.mubr.bf16.vlgmr.msra.gmra.mrb[0].mxu0 %v12056_v18  ;;  %v11567_v18 = vld [vmem:[%s14492_s1 + $0x1e0] sm:$0xff]  }
 0x1b7   : > { %10425 = vmatpush3.bf16.msra.mxu0 %v11563_v22  ;;  %10396 = vmatprep.mubr.bf16.mxu0 %v12061_v20  ;;  %v11568_v20 = vld [vmem:[%s14492_s1 + $0x1e8] sm:$0xff]   ;;  %v9073_v22 = vld [vmem:[%s11913_s23 + $0x171] sm:$0xff] }
 0x1b8   : > { %10426 = vmatprep.subr.bf16.mxu0 %v11564_v52  ;;  %v2460_v35 = vpack.c.bf16 %v9073_v22, %v9072_v21  ;;  %v3742_v21 = vrot.slane %v3740_v55, 4  ;;  %v3745_v22 = vrot.slane %v3743_v60, 5  ;;  %v3558_v60 = vld [vmem:[#allocation2 + $0xc] sm:$0xf] }
 0x1bb   : > { %10427 = vmatpush3.bf16.msra.mxu0 %v11564_v52  ;;  %v9077_v52 = vld [vmem:[%s11913_s23 + $0x1a1] sm:$0xff] }
 0x1bc   : > { %10428 = vmatprep.subr.bf16.mxu0 %v11565_v1 }
 0x1be   : > { %10397 = vmatmul.mubr.bf16.gmra.mrb[4].mxu0 %v12072_v28  ;;  %v11569_v28 = vld [vmem:[%s14492_s1 + $0x1f0] sm:$0xff]  }
 0x1bf   : > { %10400 = vmatprep.mubr.bf16.mxu0 %v12077_v30  ;;  %10429 = vmatpush3.bf16.msra.mxu0 %v11565_v1  ;;  %v11570_v30 = vld [vmem:[%s14492_s1 + $0x1f8] sm:$0xff]  }
 0x1c0   : > { %10430 = vmatprep.subr.bf16.mxu0 %v11566_v10  ;;  %v9102_v1 = vld [vmem:[%s11913_s23 + $0x32] sm:$0xff] }
 0x1c3   : > { %10431 = vmatpush3.bf16.msra.mxu0 %v11566_v10  ;;  %v9103_v10 = vld [vmem:[%s11913_s23 + $0x3a] sm:$0xff] }
 0x1c4   : > { %10432 = vmatprep.subr.bf16.mxu0 %v11567_v18 }
 0x1c6   : > { %10401 = vmatmul.mubr.bf16.gmra.mrb[8].mxu0 %v12088_v38  ;;  %v12401_v38 = vld [vmem:[%s14492_s1 + $0x200] sm:$0xff]  }
 0x1c7   : > { %10404 = vmatprep.mubr.bf16.mxu0 %v12093_v41  ;;  %10433 = vmatpush3.bf16.msra.mxu0 %v11567_v18  ;;  %v9020_v41 = vld [vmem:[%s11913_s23 + $0x198] sm:$0xff]  ;;  %v2462_v18 = vpack.c.bf16 %v9077_v52, %v9076_v36  ;;  %v3720_v52 = vld [vmem:[#allocation2 + $0x8] sm:$0x1] }
 0x1c8   : > { %10434 = vmatprep.subr.bf16.mxu0 %v11568_v20 }
 0x1cb   : > { %10435 = vmatpush3.bf16.msra.mxu0 %v11568_v20  ;;  %v2753_v20 = vpack.c.bf16 %v9103_v10, %v9102_v1  ;;  %v3746_v1 = vor.u32 %v3745_v22, %v3742_v21 }
 0x1cc   : > { %10436 = vmatprep.subr.bf16.mxu0 %v11569_v28 }
 0x1ce   : > { %10405 = vmatmul.mubr.bf16.gmra.mrb[12].mxu0 %v12104_v50  ;;  %v9021_v50 = vld [vmem:[%s11913_s23 + $0x1a0] sm:$0xff] }
 0x1cf   : > { %10408 = vmatprep.mubr.bf16.mxu0 %v12106_v51  ;;  %10437 = vmatpush3.bf16.msra.mxu0 %v11569_v28  ;;  %v9046_v51 = vld [vmem:[%s11913_s23 + $0x31] sm:$0xff]  ;;  %v2156_v15 = vpack.c.bf16 %v9021_v50, %v9020_v41 }
 0x1d0   : > { %10438 = vmatprep.subr.bf16.mxu0 %v11570_v30  ;;  %v2447_v19 = vpack.c.bf16 %v9047_v5, %v9046_v51  ;;  %v9104_v28 = vld [vmem:[%s11913_s23 + $0x4a] sm:$0xff]  ;;  %v9108_v51 = vld [vmem:[%s11913_s23 + $0x7a] sm:$0xff]  ;;  %v9109_v5 = vld [vmem:[%s11913_s23 + $0x82] sm:$0xff] }
 0x1d1   : > { %v9107_v41 = vld [vmem:[%s11913_s23 + $0x6a] sm:$0xff] }
 0x1d3   : > { %10439 = vmatpush3.bf16.msra.mxu0 %v11570_v30  ;;  %v9105_v30 = vld [vmem:[%s11913_s23 + $0x52] sm:$0xff] }
 0x1d4   : > { %10472 = vmatprep.subr.bf16.mxu0 %v12401_v38 }
 0x1d6   : > { %10409 = vmatmul.mubr.bf16.gmra.mrb[16].mxu0 %v12114_v58  ;;  %v9049_v58 = vld [vmem:[%s11913_s23 + $0x51] sm:$0xff] }
 0x1d7   : > { %10412 = vmatprep.mubr.bf16.mxu0 %v12116_v59  ;;  %v9050_v59 = vld [vmem:[%s11913_s23 + $0x61] sm:$0xff] }
 0x1de   : > { %10413 = vmatmul.mubr.bf16.gmra.mrb[20].mxu0 %v12124_v3  ;;  %v9051_v3 = vld [vmem:[%s11913_s23 + $0x69] sm:$0xff] }
 0x1df   : > { %10416 = vmatprep.mubr.bf16.mxu0 %v12126_v4  ;;  %v2448_v4 = vpack.c.bf16 %v9049_v58, %v9048_v29  ;;  %v2756_v29 = vpack.c.bf16 %v9109_v5, %v9108_v51  ;;  %v12531_v5 = vld [vmem:[%s14493_s2] sm:$0xff]  }
 0x1e6   : > { %10417 = vmatmul.mubr.bf16.gmra.mrb[24].mxu0 %v12134_v11  ;;  %v2449_v11 = vpack.c.bf16 %v9051_v3, %v9050_v59  ;;  %v9113_v59 = vld [vmem:[%s11913_s23 + $0xb2] sm:$0xff]  ;;  %v9114_v3 = vld [vmem:[%s11913_s23 + $0xc2] sm:$0xff] }
 0x1e7   : > { %10420 = vmatprep.mubr.bf16.mxu0 %v12277_v23  ;;  %v9063_v23 = vld [vmem:[%s11913_s23 + $0xf9] sm:$0xff] }
 0x1e8   : > { %v2455_v16 = vpack.c.bf16 %v9063_v23, %v9062_v14  ;;  %v9128_v14 = vld [vmem:[%s11913_s23 + $0x16a] sm:$0xff]  ;;  %v9129_v23 = vld [vmem:[%s11913_s23 + $0x172] sm:$0xff] }
 0x1ee   : > { %10421 = vmatmul.mubr.bf16.gmra.mrb[28].mxu0 %v2156_v15  ;;  %v9110_v15 = vld [vmem:[%s11913_s23 + $0x92] sm:$0xff] }
 0x1ef   : > { %10440 = vmatprep.mubr.bf16.mxu0 %v2447_v19  ;;  %v9111_v19 = vld [vmem:[%s11913_s23 + $0x9a] sm:$0xff] }
 0x1f0   : > { %v2757_v58 = vpack.c.bf16 %v9111_v19, %v9110_v15  ;;  %v12537_v15 = vld [vmem:[%s14494_s3] ss:$0 sm:$0xff] }
 0x1f1   : > { %v12542_v19 = vld [vmem:[%s14495_s4] ss:$0 sm:$0xff] }
 0x1f6   : > { %10441 = vmatmul.mubr.bf16.vlgmr.msra.gmra.mrb[0].mxu0 %v2448_v4  ;;  %v9115_v4 = vld [vmem:[%s11913_s23 + $0xca] sm:$0xff] }
 0x1f7   : > { %10473 = vmatpush3.bf16.msra.mxu0 %v12401_v38  ;;  %10444 = vmatprep.mubr.bf16.mxu0 %v2449_v11  ;;  %v9106_v38 = vld [vmem:[%s11913_s23 + $0x62] sm:$0xff]  ;;  %v2758_v11 = vpack.c.bf16 %v9113_v59, %v9112_v31 }
 0x1f8   : > { %10474 = vmatprep.subr.bf16.mxu0 %v11572_v34  ;;  %v2755_v50 = vpack.c.bf16 %v9107_v41, %v9106_v38 }
 0x1fb   : > { %10475 = vmatpush3.bf16.msra.mxu0 %v11572_v34  ;;  %v2759_v34 = vpack.c.bf16 %v9115_v4, %v9114_v3 }
 0x1fc   : > { %10476 = vmatprep.subr.bf16.mxu0 %v11573_v45 }
 0x1fe   : > { %10445 = vmatmul.mubr.bf16.gmra.mrb[4].mxu0 %v2450_v46  ;;  %v2761_v46 = vpack.c.bf16 %v9119_v44, %v9118_v43 }
 0x1ff   : > { %10448 = vmatprep.mubr.bf16.mxu0 %v2451_v53  ;;  %10477 = vmatpush3.bf16.msra.mxu0 %v11573_v45  ;;  %v2760_v45 = vpack.c.bf16 %v9117_v39, %v9116_v37  ;;  %v9120_v53 = vld [vmem:[%s11913_s23 + $0x10a] sm:$0xff] }
 0x200   : > { %10478 = vmatprep.subr.bf16.mxu0 %v11574_v56 }
 0x203   : > { %10479 = vmatpush3.bf16.msra.mxu0 %v11574_v56  ;;  %v9121_v56 = vld [vmem:[%s11913_s23 + $0x112] sm:$0xff] }
 0x204   : > { %10480 = vmatprep.subr.bf16.mxu0 %v11575_v0  ;;  %v2762_v63 = vpack.c.bf16 %v9121_v56, %v9120_v53 }
 0x206   : > { %10449 = vmatmul.mubr.bf16.gmra.mrb[8].mxu0 %v2452_v6  ;;  %v9125_v6 = vld [vmem:[%s11913_s23 + $0x142] sm:$0xff] }
 0x207   : > { %10452 = vmatprep.mubr.bf16.mxu0 %v2453_v7  ;;  %10481 = vmatpush3.bf16.msra.mxu0 %v11575_v0  ;;  %v9124_v0 = vld [vmem:[%s11913_s23 + $0x13a] sm:$0xff]  ;;  %v9126_v7 = vld [vmem:[%s11913_s23 + $0x152] sm:$0xff] }
 0x208   : > { %10482 = vmatprep.subr.bf16.mxu0 %v11576_v9  ;;  %v2764_v12 = vpack.c.bf16 %v9125_v6, %v9124_v0 }
 0x20b   : > { %10483 = vmatpush3.bf16.msra.mxu0 %v11576_v9  ;;  %v9127_v9 = vld [vmem:[%s11913_s23 + $0x15a] sm:$0xff] }
 0x20c   : > { %10484 = vmatprep.subr.bf16.mxu0 %v11577_v26  ;;  %v2765_v13 = vpack.c.bf16 %v9127_v9, %v9126_v7 }
 0x20e   : > { %10453 = vmatmul.mubr.bf16.gmra.mrb[12].mxu0 %v2454_v27  ;;  %v9132_v27 = vld [vmem:[%s11913_s23 + $0x19a] sm:$0xff] }
 0x20f   : > { %10456 = vmatprep.mubr.bf16.mxu0 %v2455_v16  ;;  %10485 = vmatpush3.bf16.msra.mxu0 %v11577_v26  ;;  %v2766_v26 = vpack.c.bf16 %v9129_v23, %v9128_v14  ;;  %v9133_v16 = vld [vmem:[%s11913_s23 + $0x1a2] sm:$0xff] }
 0x210   : > { %10486 = vmatprep.subr.bf16.mxu0 %v11578_v17 }
 0x213   : > { %10487 = vmatpush3.bf16.msra.mxu0 %v11578_v17  ;;  %v2768_v17 = vpack.c.bf16 %v9133_v16, %v9132_v27 }
 0x216   : > { %10457 = vmatmul.mubr.bf16.gmra.mrb[16].mxu0 %v2456_v40  ;;  %v11584_v40 = vld [vmem:[%s14493_s2 + $0x68] sm:$0xff]  }
 0x217   : > { %10460 = vmatprep.mubr.bf16.mxu0 %v2457_v42  ;;  %v11585_v42 = vld [vmem:[%s14493_s2 + $0x70] sm:$0xff]  }
 0x21e   : > { %10461 = vmatmul.mubr.bf16.gmra.mrb[20].mxu0 %v2458_v61  ;;  %v3749_v61 = vshll.u32 %v3673_v54, 16 }
 0x21f   : > { %10464 = vmatprep.mubr.bf16.mxu0 %v2459_v2  ;;  %v3753_v2 = vshrl.u32 %v3673_v54, 16 }
 0x221   : > { %v3755_v36 = vrot.slane %v3753_v2, 4 }
 0x226   : > { %10465 = vmatmul.mubr.bf16.gmra.mrb[24].mxu0 %v2460_v35  ;;  %v3751_v35 = vrot.slane %v3749_v61, 5 }
 0x227   : > { %10468 = vmatprep.mubr.bf16.mxu0 %v12321_v48  ;;  %v2754_v48 = vpack.c.bf16 %v9105_v30, %v9104_v28  ;;  %v3747_v28 = vrot.slane %v3746_v1, 4 }
 0x228   : > { %v3756_v10 = vor.u32 %v3755_v36, %v3751_v35 }
 0x22a   : > { %v3757_v30 = vrot.slane %v3756_v10, 4 }
 0x22e   : > { %10469 = vmatmul.mubr.bf16.gmra.mrb[28].mxu0 %v2462_v18  ;;  %v11586_v18 = vld [vmem:[%s14493_s2 + $0x78] sm:$0xff]  }
 0x22f   : > { %10488 = vmatprep.mubr.bf16.mxu0 %v2753_v20  ;;  %v3759_v20 = vshll.u32 %v3720_v52, 16  ;;  %v3571_v52 = vld [vmem:[#allocation2 + $0x20] sm:$0x1] }
 0x231   : > { %v3761_v41 = vrot.slane %v3759_v20, 5 }
 0x236   : > { %10489 = vmatmul.mubr.bf16.vlgmr.msra.gmra.mrb[0].mxu0 %v2754_v48  ;;  %v3752_v48 = vsel %vm12520_vm2, %v3747_v28, %v3751_v35 }
 0x237   : > { %10492 = vmatprep.mubr.bf16.mxu0 %v2755_v50  ;;  %v3762_v50 = vsel %vm12520_vm2, %v3757_v30, %v3761_v41  ;;  %v3564_v30 = vld [vmem:[#allocation2 + $0x14] sm:$0x1] }
 0x238   : > { %v9208_v51 = vcombine.low %v3752_v48, %v3762_v50 }
 0x23a   : > { %10536 = vmatprep.mubr.bf16.mxu1 %v9208_v51 }
 0x23e   : > { %10493 = vmatmul.mubr.bf16.gmra.mrb[4].mxu0 %v2756_v29 }
 0x23f   : > { %10496 = vmatprep.mubr.bf16.mxu0 %v2757_v58 }
 0x246   : > { %10497 = vmatmul.mubr.bf16.gmra.mrb[8].mxu0 %v2758_v11 }
 0x247   : > { %10500 = vmatprep.mubr.bf16.mxu0 %v2759_v34 }
 0x24e   : > { %10501 = vmatmul.mubr.bf16.gmra.mrb[12].mxu0 %v2760_v45 }
 0x24f   : > { %10504 = vmatprep.mubr.bf16.mxu0 %v2761_v46 }
 0x256   : > { %10505 = vmatmul.mubr.bf16.gmra.mrb[16].mxu0 %v2762_v63 }
 0x257   : > { %10508 = vmatprep.mubr.bf16.mxu0 %v2763_v8 }
 0x25e   : > { %10509 = vmatmul.mubr.bf16.gmra.mrb[20].mxu0 %v2764_v12 }
 0x25f   : > { %10512 = vmatprep.mubr.bf16.mxu0 %v2765_v13 }
 0x266   : > { %10513 = vmatmul.mubr.bf16.gmra.mrb[24].mxu0 %v2766_v26 }
 0x267   : > { %10516 = vmatprep.mubr.bf16.mxu0 %v12365_v47  ;;  %v11581_v47 = vld [vmem:[%s14493_s2 + $0x50] sm:$0xff]  }
 0x268   : > { %10524 = vmatprep.subr.bf16.mxu1 %v11581_v47 }
 0x269   : > { %10525 = vmatpush3.bf16.msra.mxu1 %v11581_v47 }
 0x26a   : > { %10526 = vmatprep.subr.bf16.mxu1 %v11582_v32 }
 0x26d   : > { %10527 = vmatpush3.bf16.msra.mxu1 %v11582_v32  ;;  %v3567_v32 = vld [vmem:[#allocation2 + $0x18] sm:$0xf] }
 0x26e   : > { %10517 = vmatmul.mubr.bf16.gmra.mrb[28].mxu0 %v2768_v17  ;;  %10528 = vmatprep.subr.bf16.mxu1 %v11583_v33 }
 0x271   : > { %10529 = vmatpush3.bf16.msra.mxu1 %v11583_v33 }
 0x272   : > { %10530 = vmatprep.subr.bf16.mxu1 %v11584_v40 }
 0x275   : > { %10531 = vmatpush3.bf16.msra.mxu1 %v11584_v40 }
 0x276   : > { %10532 = vmatprep.subr.bf16.mxu1 %v11585_v42 }
 0x279   : > { %10533 = vmatpush3.bf16.msra.mxu1 %v11585_v42 }
 0x27a   : > { %10534 = vmatprep.subr.bf16.mxu1 %v11586_v18 }
 0x27d   : > { %10535 = vmatpush3.bf16.msra.mxu1 %v11586_v18 }
 0x27e   : > { %10568 = vmatprep.subr.bf16.mxu1 %v12531_v5 }
 0x309   : > { %v10490_v29 = vpop.f32.mrb[0].mxu0 }
 0x30a   : > { %v3035_v58 = vmul.f32 %v10490_v29, %v12537_v15  ;;  %v2868_v31 = vpop.f32.mrb[1].mxu0 }
 0x30b   : > { %v3033_v59 = vmul.f32 %v12537_v15, %v2868_v31  ;;  %v10491_v3 = vpop.f32.mrb[2].mxu0 }
 0x30c   : > { %v3073_v4 = vadd.f32 %v12542_v19, %v3035_v58  ;;  %v3036_v11 = vmul.f32 %v10491_v3, %v12537_v15  ;;  %v2871_v34 = vpop.f32.mrb[3].mxu0 }
 0x30d   : > { %v3071_v37 = vadd.f32 %v12542_v19, %v3033_v59  ;;  %v3034_v39 = vmul.f32 %v12537_v15, %v2871_v34 }
 0x30e   : > { %v3105_v43 = vmax.f32 %v3073_v4, 0.0  ;;  %v3074_v44 = vadd.f32 %v12542_v19, %v3036_v11 }
 0x30f   : > { %v3103_v45 = vmax.f32 %v3071_v37, 0.0  ;;  %v3072_v46 = vadd.f32 %v12542_v19, %v3034_v39 }
 0x310   : > { %v9625_v53 = vpack.c.bf16 %v3105_v43, %v3105_v43  ;;  %v3106_v56 = vmax.f32 %v3074_v44, 0.0 }
 0x311   : > { %v9623_v57 = vpack.c.bf16 %v3103_v45, %v3103_v45  ;;  %v3104_v62 = vmax.f32 %v3072_v46, 0.0  ;;  %v10494_v63 = vpop.f32.mrb[4].mxu0 }
 0x312   : > { %v3252_v8 = vshrl.u32 %v9625_v53, 16  ;;  %v3255_v0 = vshll.u32 %v9625_v53, 16  ;;  %v9626_v6 = vpack.c.bf16 %v3106_v56, %v3106_v56  ;;  %v3039_v7 = vmul.f32 %v10494_v63, %v12537_v15  ;;  %v2884_v9 = vpop.f32.mrb[5].mxu0 }
 0x313   : > { %v3235_v12 = vshrl.u32 %v9623_v57, 16  ;;  %v3238_v13 = vshll.u32 %v9623_v57, 16  ;;  %v9624_v14 = vpack.c.bf16 %v3104_v62, %v3104_v62  ;;  %v3037_v23 = vmul.f32 %v12537_v15, %v2884_v9  ;;  %v10495_v26 = vpop.f32.mrb[6].mxu0  ;;  %v3581_v62 = vld [vmem:[#allocation2 + $0x30] sm:$0xf] }
 0x314   : > { %v3254_v27 = vrot.slane %v3252_v8, 7  ;;  %v3260_v16 = vshrl.u32 %v9626_v6, 16  ;;  %v3263_v17 = vshll.u32 %v9626_v6, 16  ;;  %v3077_v24 = vadd.f32 %v12542_v19, %v3039_v7  ;;  %v2887_v25 = vpop.f32.mrb[7].mxu0 }
 0x315   : > { %v3237_v33 = vrot.slane %v3235_v12, 7  ;;  %v3243_v40 = vshrl.u32 %v9624_v14, 16  ;;  %v3246_v42 = vshll.u32 %v9624_v14, 16  ;;  %v3075_v49 = vadd.f32 %v12542_v19, %v3037_v23  ;;  %v3574_v12 = vld [vmem:[#allocation2 + $0x24] sm:$0xf] }
 0x316   : > { %v3257_v54 = vor.u32 %v3255_v0, %v3254_v27  ;;  %v3258_v55 = vrot.slane %v3254_v27, 4  ;;  %v3262_v2 = vrot.slane %v3260_v16, 7  ;;  %v3109_v21 = vmax.f32 %v3077_v24, 0.0 }
 0x317   : > { %v3240_v22 = vor.u32 %v3238_v13, %v3237_v33  ;;  %v3241_v35 = vrot.slane %v3237_v33, 4  ;;  %v3245_v1 = vrot.slane %v3243_v40, 7  ;;  %v3107_v10 = vmax.f32 %v3075_v49, 0.0 }
 0x318   : > { %v3568_v18 = vsel %vm12557_vm8, %v3257_v54, %v3567_v32  ;;  %v3265_v20 = vor.u32 %v3263_v17, %v3262_v2  ;;  %v3267_v28 = vrot.slane %v3262_v2, 4  ;;  %v9629_v41 = vpack.c.bf16 %v3109_v21, %v3109_v21 }
 0x319   : > { %3569 = vst [vmem:[#allocation2 + $0x18] sm:$0xf] %v3568_v18  ;;  %v3559_v48 = vsel %vm12557_vm8, %v3240_v22, %v3558_v60  ;;  %v3248_v50 = vor.u32 %v3246_v42, %v3245_v1  ;;  %v3250_v51 = vrot.slane %v3245_v1, 4  ;;  %v9627_v29 = vpack.c.bf16 %v3107_v10, %v3107_v10  ;;  %v10498_v58 = vpop.f32.mrb[8].mxu0 }
 0x31a   : > { %3560 = vst [vmem:[#allocation2 + $0xc] sm:$0xf] %v3559_v48  ;;  %v3266_v31 = vsel %vm12564_vm9, %v3258_v55, %v3265_v20  ;;  %v3572_v59 = vsel %vm12570_vm10, %v3267_v28, %v3571_v52  ;;  %v3286_v3 = vshrl.u32 %v9629_v41, 16  ;;  %v3289_v4 = vshll.u32 %v9629_v41, 16  ;;  %v2900_v11 = vpop.f32.mrb[9].mxu0 }
 0x31b   : > { %3570 = vst [vmem:[#allocation2 + $0x1c] sm:$0xf] %v3266_v31  ;;  %3573 = vst [vmem:[#allocation2 + $0x20] sm:$0x1] %v3572_v59  ;;  %v3249_v34 = vsel %vm12564_vm9, %v3241_v35, %v3248_v50  ;;  %v3565_v37 = vsel %vm12570_vm10, %v3250_v51, %v3564_v30  ;;  %v3269_v39 = vshrl.u32 %v9627_v29, 16  ;;  %v3272_v43 = vshll.u32 %v9627_v29, 16 }
 0x31c   : > { %v10499_v44 = vpop.f32.mrb[10].mxu0  ;;  %3561 = vst [vmem:[#allocation2 + $0x10] sm:$0xf] %v3249_v34  ;;  %3566 = vst [vmem:[#allocation2 + $0x14] sm:$0x1] %v3565_v37  ;;  %v12586_v45 = vrot.slane %v3286_v3, 7  ;;  %v3040_v46 = vmul.f32 %v10495_v26, %v12537_v15  ;;  %v3038_v53 = vmul.f32 %v12537_v15, %v2887_v25  ;;  %v3043_v56 = vmul.f32 %v10498_v58, %v12537_v15 }
 0x31d   : > { %v2903_v57 = vpop.f32.mrb[11].mxu0  ;;  %v12591_v63 = vrot.slane %v3269_v39, 7  ;;  %v3041_v8 = vmul.f32 %v12537_v15, %v2900_v11  ;;  %v3044_v0 = vmul.f32 %v10499_v44, %v12537_v15  ;;  %v3585_v50 = vld [vmem:[#allocation2 + $0x38] sm:$0x1]  ;;  %v3578_v51 = vld [vmem:[#allocation2 + $0x2c] sm:$0x1] }
 0x31e   : > { %v3042_v6 = vmul.f32 %v12537_v15, %v2903_v57  ;;  %v3291_v7 = vor.u32 %v3289_v4, %v12586_v45  ;;  %v3292_v9 = vrot.slane %v12586_v45, 4  ;;  %v3078_v13 = vadd.f32 %v12542_v19, %v3040_v46  ;;  %v3595_v11 = vld [vmem:[#allocation2 + $0x48] sm:$0xf] }
 0x31f   : > { %v3076_v14 = vadd.f32 %v12542_v19, %v3038_v53  ;;  %v3274_v23 = vor.u32 %v3272_v43, %v12591_v63  ;;  %v3275_v26 = vrot.slane %v12591_v63, 4  ;;  %v3081_v27 = vadd.f32 %v12542_v19, %v3043_v56 }
 0x320   : > { %v3079_v16 = vadd.f32 %v12542_v19, %v3041_v8  ;;  %v3582_v17 = vsel %vm12557_vm8, %v3291_v7, %v3581_v62  ;;  %v3110_v24 = vmax.f32 %v3078_v13, 0.0  ;;  %v3082_v32 = vadd.f32 %v12542_v19, %v3044_v0  ;;  %v3588_v62 = vld [vmem:[#allocation2 + $0x3c] sm:$0xf] }
 0x321   : > { %v3108_v25 = vmax.f32 %v3076_v14, 0.0  ;;  %3583 = vst [vmem:[#allocation2 + $0x30] sm:$0xf] %v3582_v17  ;;  %v3575_v33 = vsel %vm12557_vm8, %v3274_v23, %v3574_v12  ;;  %v3113_v40 = vmax.f32 %v3081_v27, 0.0  ;;  %v3080_v49 = vadd.f32 %v12542_v19, %v3042_v6  ;;  %v10502_v54 = vpop.f32.mrb[12].mxu0 }
 0x322   : > { %v3111_v42 = vmax.f32 %v3079_v16, 0.0  ;;  %3576 = vst [vmem:[#allocation2 + $0x24] sm:$0xf] %v3575_v33  ;;  %v9630_v55 = vpack.c.bf16 %v3110_v24, %v3110_v24  ;;  %v3114_v2 = vmax.f32 %v3082_v32, 0.0  ;;  %v3047_v21 = vmul.f32 %v10502_v54, %v12537_v15  ;;  %v2916_v22 = vpop.f32.mrb[13].mxu0 }
 0x323   : > { %v9628_v60 = vpack.c.bf16 %v3108_v25, %v3108_v25  ;;  %v9633_v35 = vpack.c.bf16 %v3113_v40, %v3113_v40  ;;  %v3112_v1 = vmax.f32 %v3080_v49, 0.0  ;;  %v3045_v10 = vmul.f32 %v12537_v15, %v2916_v22  ;;  %v10503_v18 = vpop.f32.mrb[14].mxu0  ;;  %v3599_v54 = vld [vmem:[#allocation2 + $0x50] sm:$0x1] }
 0x324   : > { %v9631_v52 = vpack.c.bf16 %v3111_v42, %v3111_v42  ;;  %v3294_v20 = vshrl.u32 %v9630_v55, 16  ;;  %v3297_v28 = vshll.u32 %v9630_v55, 16  ;;  %v2919_v48 = vpop.f32.mrb[15].mxu0  ;;  %v9634_v34 = vpack.c.bf16 %v3114_v2, %v3114_v2 }
 0x325   : > { %v3277_v30 = vshrl.u32 %v9628_v60, 16  ;;  %v3280_v41 = vshll.u32 %v9628_v60, 16  ;;  %v3320_v29 = vshrl.u32 %v9633_v35, 16  ;;  %v3323_v58 = vshll.u32 %v9633_v35, 16 }
 0x326   : > { %v3303_v31 = vshrl.u32 %v9631_v52, 16  ;;  %v3306_v59 = vshll.u32 %v9631_v52, 16  ;;  %v3296_v3 = vrot.slane %v3294_v20, 7  ;;  %v9632_v37 = vpack.c.bf16 %v3112_v1, %v3112_v1  ;;  %v3592_v20 = vld [vmem:[#allocation2 + $0x44] sm:$0x1] }
 0x327   : > { %v3279_v4 = vrot.slane %v3277_v30, 7  ;;  %v3322_v39 = vrot.slane %v3320_v29, 7  ;;  %v3085_v44 = vadd.f32 %v12542_v19, %v3047_v21  ;;  %v3083_v45 = vadd.f32 %v12542_v19, %v3045_v10 }
 0x328   : > { %v3305_v43 = vrot.slane %v3303_v31, 7  ;;  %v3299_v46 = vor.u32 %v3297_v28, %v3296_v3  ;;  %v3301_v53 = vrot.slane %v3296_v3, 4  ;;  %v3328_v17 = vshrl.u32 %v9634_v34, 16 }
 0x329   : > { %v3282_v56 = vor.u32 %v3280_v41, %v3279_v4  ;;  %v3284_v57 = vrot.slane %v3279_v4, 4  ;;  %v3325_v63 = vor.u32 %v3323_v58, %v3322_v39  ;;  %v3326_v8 = vrot.slane %v3322_v39, 4  ;;  %v10506_v7 = vpop.f32.mrb[16].mxu0  ;;  %v3609_v39 = vld [vmem:[#allocation2 + $0x60] sm:$0xf] }
 0x32a   : > { %v3308_v0 = vor.u32 %v3306_v59, %v3305_v43  ;;  %v3309_v6 = vrot.slane %v3305_v43, 4  ;;  %v3300_v12 = vsel %vm12564_vm9, %v3292_v9, %v3299_v46  ;;  %v3586_v13 = vsel %vm12570_vm10, %v3301_v53, %v3585_v50  ;;  %v2932_v27 = vpop.f32.mrb[17].mxu0 }
 0x32b   : > { %v3283_v14 = vsel %vm12564_vm9, %v3275_v26, %v3282_v56  ;;  %v3579_v23 = vsel %vm12570_vm10, %v3284_v57, %v3578_v51  ;;  %3584 = vst [vmem:[#allocation2 + $0x34] sm:$0xf] %v3300_v12  ;;  %3587 = vst [vmem:[#allocation2 + $0x38] sm:$0x1] %v3586_v13  ;;  %v3596_v16 = vsel %vm12557_vm8, %v3325_v63, %v3595_v11  ;;  %v3331_v24 = vshll.u32 %v9634_v34, 16  ;;  %v10507_v25 = vpop.f32.mrb[18].mxu0 }
 0x32c   : > { %3577 = vst [vmem:[#allocation2 + $0x28] sm:$0xf] %v3283_v14  ;;  %3580 = vst [vmem:[#allocation2 + $0x2c] sm:$0x1] %v3579_v23  ;;  %v3589_v9 = vsel %vm12557_vm8, %v3308_v0, %v3588_v62  ;;  %v3311_v26 = vshrl.u32 %v9632_v37, 16  ;;  %v3314_v32 = vshll.u32 %v9632_v37, 16  ;;  %v3048_v55 = vmul.f32 %v10503_v18, %v12537_v15 }
 0x32d   : > { %3597 = vst [vmem:[#allocation2 + $0x48] sm:$0xf] %v3596_v16  ;;  %3590 = vst [vmem:[#allocation2 + $0x3c] sm:$0xf] %v3589_v9  ;;  %v3117_v33 = vmax.f32 %v3085_v44, 0.0  ;;  %v3115_v40 = vmax.f32 %v3083_v45, 0.0  ;;  %v3046_v60 = vmul.f32 %v12537_v15, %v2919_v48  ;;  %v3051_v2 = vmul.f32 %v10506_v7, %v12537_v15 }
 0x32e   : > { %v12626_v42 = vpop.f32.mrb[19].mxu0  ;;  %v3330_v49 = vrot.slane %v3328_v17, 7  ;;  %v3313_v21 = vrot.slane %v3311_v26, 7  ;;  %v3049_v52 = vmul.f32 %v12537_v15, %v2932_v27  ;;  %v3086_v28 = vadd.f32 %v12542_v19, %v3048_v55  ;;  %v3602_v62 = vld [vmem:[#allocation2 + $0x54] sm:$0xf] }
 0x32f   : > { %v9637_v22 = vpack.c.bf16 %v3117_v33, %v3117_v33  ;;  %v9635_v35 = vpack.c.bf16 %v3115_v40, %v3115_v40  ;;  %v3084_v30 = vadd.f32 %v12542_v19, %v3046_v60  ;;  %v3089_v45 = vadd.f32 %v12542_v19, %v3051_v2  ;;  %v12653_v14 = vld [vmem:[#allocation2 + $0xc] sm:$0xf]  ;;  %v3613_v33 = vld [vmem:[#allocation2 + $0x68] sm:$0x1] }
 0x330   : > { %v3333_v1 = vor.u32 %v3331_v24, %v3330_v49  ;;  %v3335_v10 = vrot.slane %v3330_v49, 4  ;;  %v3316_v41 = vor.u32 %v3314_v32, %v3313_v21  ;;  %v3318_v50 = vrot.slane %v3313_v21, 4 }
 0x331   : > { %v3354_v51 = vshrl.u32 %v9637_v22, 16  ;;  %v3357_v18 = vshll.u32 %v9637_v22, 16  ;;  %v3337_v58 = vshrl.u32 %v9635_v35, 16  ;;  %v3340_v31 = vshll.u32 %v9635_v35, 16  ;;  %v12638_v59 = vpop.f32.mrb[20].mxu0 }
 0x332   : > { %v3334_v48 = vsel %vm12564_vm9, %v3326_v8, %v3333_v1  ;;  %v3600_v29 = vsel %vm12570_vm10, %v3335_v10, %v3599_v54  ;;  %v3317_v3 = vsel %vm12564_vm9, %v3309_v6, %v3316_v41  ;;  %v3593_v4 = vsel %vm12570_vm10, %v3318_v50, %v3592_v20  ;;  %v12644_v37 = vpop.f32.mrb[21].mxu0  ;;  %v3606_v1 = vld [vmem:[#allocation2 + $0x5c] sm:$0x1] }
 0x333   : > { %3598 = vst [vmem:[#allocation2 + $0x4c] sm:$0xf] %v3334_v48  ;;  %3601 = vst [vmem:[#allocation2 + $0x50] sm:$0x1] %v3600_v29  ;;  %v3356_v11 = vrot.slane %v3354_v51, 7  ;;  %v3118_v34 = vmax.f32 %v3086_v28, 0.0  ;;  %v3087_v46 = vadd.f32 %v12542_v19, %v3049_v52  ;;  %v3052_v8 = vmul.f32 %v10507_v25, %v12537_v15 }
 0x334   : > { %3591 = vst [vmem:[#allocation2 + $0x40] sm:$0xf] %v3317_v3  ;;  %3594 = vst [vmem:[#allocation2 + $0x44] sm:$0x1] %v3593_v4  ;;  %v3339_v43 = vrot.slane %v3337_v58, 7  ;;  %v3116_v44 = vmax.f32 %v3084_v30, 0.0  ;;  %v3050_v54 = vmul.f32 %v12537_v15, %v12626_v42 }
 0x335   : > { %v12648_v53 = vpop.f32.mrb[22].mxu0  ;;  %v3359_v56 = vor.u32 %v3357_v18, %v3356_v11  ;;  %v3360_v57 = vrot.slane %v3356_v11, 4  ;;  %v9638_v63 = vpack.c.bf16 %v3118_v34, %v3118_v34  ;;  %v3121_v13 = vmax.f32 %v3089_v45, 0.0  ;;  %v3623_v29 = vld [vmem:[#allocation2 + $0x78] sm:$0xf] }
 0x336   : > { %v12651_v0 = vpop.f32.mrb[23].mxu0  ;;  %v3342_v6 = vor.u32 %v3340_v31, %v3339_v43  ;;  %v3343_v7 = vrot.slane %v3339_v43, 4  ;;  %v9636_v12 = vpack.c.bf16 %v3116_v44, %v3116_v44  ;;  %v3119_v9 = vmax.f32 %v3087_v46, 0.0  ;;  %v3675_v3 = vld [vmem:[#allocation2 + $0x10] sm:$0xf] }
 0x337   : > { %v3610_v23 = vsel %vm12557_vm8, %v3359_v56, %v3609_v39  ;;  %v3362_v27 = vshrl.u32 %v9638_v63, 16  ;;  %v3365_v16 = vshll.u32 %v9638_v63, 16  ;;  %v9641_v26 = vpack.c.bf16 %v3121_v13, %v3121_v13  ;;  %v3616_v43 = vld [vmem:[#allocation2 + $0x6c] sm:$0xf] }
 0x338   : > { %3611 = vst [vmem:[#allocation2 + $0x60] sm:$0xf] %v3610_v23  ;;  %v3603_v17 = vsel %vm12557_vm8, %v3342_v6, %v3602_v62  ;;  %v3345_v24 = vshrl.u32 %v9636_v12, 16  ;;  %v3348_v25 = vshll.u32 %v9636_v12, 16  ;;  %v9639_v40 = vpack.c.bf16 %v3119_v9, %v3119_v9  ;;  %v3627_v9 = vld [vmem:[#allocation2 + $0x80] sm:$0x1] }
 0x339   : > { %3604 = vst [vmem:[#allocation2 + $0x54] sm:$0xf] %v3603_v17  ;;  %v3364_v32 = vrot.slane %v3362_v27, 7  ;;  %v3090_v49 = vadd.f32 %v12542_v19, %v3052_v8  ;;  %v3388_v60 = vshrl.u32 %v9641_v26, 16  ;;  %v3391_v2 = vshll.u32 %v9641_v26, 16  ;;  %v12663_v22 = vpop.f32.mrb[24].mxu0 }
 0x33a   : > { %v3347_v55 = vrot.slane %v3345_v24, 7  ;;  %v3764_v21 = vshrl.u32 %v12653_v14, 16  ;;  %v3371_v10 = vshrl.u32 %v9639_v40, 16  ;;  %v3374_v20 = vshll.u32 %v9639_v40, 16  ;;  %v12665_v28 = vpop.f32.mrb[25].mxu0 }
 0x33b   : > { %v3367_v35 = vor.u32 %v3365_v16, %v3364_v32  ;;  %v3369_v52 = vrot.slane %v3364_v32, 4  ;;  %v12667_v50 = vrot.slane %v3388_v60, 7  ;;  %v3122_v51 = vmax.f32 %v3090_v49, 0.0  ;;  %v12669_v42 = vpop.f32.mrb[26].mxu0  ;;  %v3676_v27 = vld [vmem:[#allocation2 + $0x18] sm:$0xf] }
 0x33c   : > { %v3350_v30 = vor.u32 %v3348_v25, %v3347_v55  ;;  %v3352_v41 = vrot.slane %v3347_v55, 4  ;;  %v12675_v58 = vrot.slane %v3371_v10, 7  ;;  %v3088_v31 = vadd.f32 %v12542_v19, %v3050_v54  ;;  %v12678_v4 = vpop.f32.mrb[27].mxu0  ;;  %v3677_v16 = vld [vmem:[#allocation2 + $0x1c] sm:$0xf] }
 0x33d   : > { %v3368_v18 = vsel %vm12564_vm9, %v3360_v57, %v3367_v35  ;;  %v3614_v48 = vsel %vm12570_vm10, %v3369_v52, %v3613_v33  ;;  %v3393_v39 = vor.u32 %v3391_v2, %v12667_v50  ;;  %v3394_v44 = vrot.slane %v12667_v50, 4  ;;  %v3721_v57 = vld [vmem:[#allocation2 + $0x14] sm:$0x1] }
 0x33e   : > { %3612 = vst [vmem:[#allocation2 + $0x64] sm:$0xf] %v3368_v18  ;;  %3615 = vst [vmem:[#allocation2 + $0x68] sm:$0x1] %v3614_v48  ;;  %v3351_v11 = vsel %vm12564_vm9, %v3343_v7, %v3350_v30  ;;  %v3607_v34 = vsel %vm12570_vm10, %v3352_v41, %v3606_v1  ;;  %v3376_v45 = vor.u32 %v3374_v20, %v12675_v58  ;;  %v3120_v56 = vmax.f32 %v3088_v31, 0.0 }
 0x33f   : > { %3605 = vst [vmem:[#allocation2 + $0x58] sm:$0xf] %v3351_v11  ;;  %3608 = vst [vmem:[#allocation2 + $0x5c] sm:$0x1] %v3607_v34  ;;  %v9642_v46 = vpack.c.bf16 %v3122_v51, %v3122_v51  ;;  %v3624_v62 = vsel %vm12557_vm8, %v3393_v39, %v3623_v29  ;;  %v3766_v63 = vrot.slane %v3764_v21, 4  ;;  %v3767_v8 = vshll.u32 %v12653_v14, 16 }
 0x340   : > { %v3773_v6 = vshll.u32 %v3675_v3, 16  ;;  %3625 = vst [vmem:[#allocation2 + $0x78] sm:$0xf] %v3624_v62  ;;  %v3377_v7 = vrot.slane %v12675_v58, 4  ;;  %v3617_v12 = vsel %vm12557_vm8, %v3376_v45, %v3616_v43  ;;  %v9640_v23 = vpack.c.bf16 %v3120_v56, %v3120_v56  ;;  %v3620_v20 = vld [vmem:[#allocation2 + $0x74] sm:$0x1] }
 0x341   : > { %v3396_v13 = vshrl.u32 %v9642_v46, 16  ;;  %3618 = vst [vmem:[#allocation2 + $0x6c] sm:$0xf] %v3617_v12  ;;  %v3769_v17 = vrot.slane %v3767_v8, 5  ;;  %v3777_v25 = vshrl.u32 %v3675_v3, 16  ;;  %v3783_v26 = vshll.u32 %v3721_v57, 16 }
 0x342   : > { %v3775_v24 = vrot.slane %v3773_v6, 5  ;;  %v12693_v32 = vpop.f32.mrb[28].mxu0  ;;  %v3399_v33 = vshll.u32 %v9642_v46, 16  ;;  %v3379_v40 = vshrl.u32 %v9640_v23, 16  ;;  %v3382_v49 = vshll.u32 %v9640_v23, 16 }
 0x343   : > { %v3398_v14 = vrot.slane %v3396_v13, 7  ;;  %v12695_v54 = vpop.f32.mrb[29].mxu0  ;;  %v3770_v55 = vor.u32 %v3769_v17, %v3766_v63  ;;  %v3779_v60 = vrot.slane %v3777_v25, 4  ;;  %v3785_v2 = vrot.slane %v3783_v26, 5  ;;  %v3722_v18 = vld [vmem:[#allocation2 + $0x20] sm:$0x1] }
 0x344   : > { %v3788_v21 = vshrl.u32 %v3676_v27, 16  ;;  %v12697_v35 = vpop.f32.mrb[30].mxu0  ;;  %v3381_v10 = vrot.slane %v3379_v40, 7  ;;  %v3791_v30 = vshll.u32 %v3676_v27, 16  ;;  %v3797_v29 = vshll.u32 %v3677_v16, 16 }
 0x345   : > { %v3401_v52 = vor.u32 %v3399_v33, %v3398_v14  ;;  %v3403_v1 = vrot.slane %v3398_v14, 4  ;;  %v12699_v41 = vpop.f32.mrb[31].mxu0  ;;  %v3771_v50 = vrot.slane %v3770_v55, 4  ;;  %v3780_v51 = vor.u32 %v3779_v60, %v3775_v24  ;;  %v3678_v12 = vld [vmem:[#allocation2 + $0x24] sm:$0xf] }
 0x346   : > { %v3790_v48 = vrot.slane %v3788_v21, 4  ;;  %v3384_v3 = vor.u32 %v3382_v49, %v3381_v10  ;;  %v3386_v11 = vrot.slane %v3381_v10, 4  ;;  %v3793_v43 = vrot.slane %v3791_v30, 5  ;;  %v3679_v26 = vld [vmem:[#allocation2 + $0x28] sm:$0xf] }
 0x347   : > { %v3402_v58 = vsel %vm12564_vm9, %v3394_v44, %v3401_v52  ;;  %v3628_v31 = vsel %vm12570_vm10, %v3403_v1, %v3627_v9  ;;  %v3776_v34 = vsel %vm12520_vm2, %v3771_v50, %v3775_v24  ;;  %v3781_v39 = vrot.slane %v3780_v51, 4  ;;  %v11589_v52 = vld [vmem:[%s14493_s2 + $0x10] sm:$0xff]   ;;  %v12871_v47 = vld [vmem:[#allocation2 + $0x68] sm:$0x1] }
 0x348   : > { %3626 = vst [vmem:[#allocation2 + $0x7c] sm:$0xf] %v3402_v58  ;;  %3629 = vst [vmem:[#allocation2 + $0x80] sm:$0x1] %v3628_v31  ;;  %v3799_v45 = vrot.slane %v3797_v29, 5  ;;  %v3385_v46 = vsel %vm12564_vm9, %v3377_v7, %v3384_v3  ;;  %v3621_v56 = vsel %vm12570_vm10, %v3386_v11, %v3620_v20  ;;  %v3801_v44 = vshrl.u32 %v3677_v16, 16 }
 0x349   : > { %v3807_v57 = vshll.u32 %v3722_v18, 16  ;;  %3619 = vst [vmem:[#allocation2 + $0x70] sm:$0xf] %v3385_v46  ;;  %3622 = vst [vmem:[#allocation2 + $0x74] sm:$0x1] %v3621_v56  ;;  %v3786_v62 = vsel %vm12520_vm2, %v3781_v39, %v3785_v2  ;;  %v3794_v63 = vor.u32 %v3793_v43, %v3790_v48  ;;  %v3055_v8 = vmul.f32 %v12638_v59, %v12537_v15  ;;  %v11588_v7 = vld [vmem:[%s14493_s2 + $0x8] sm:$0xff]  }
 0x34a   : > { %v3053_v6 = vmul.f32 %v12537_v15, %v12644_v37  ;;  %v9209_v13 = vcombine.low %v3776_v34, %v3786_v62  ;;  %v3803_v23 = vrot.slane %v3801_v44, 4  ;;  %v3056_v16 = vmul.f32 %v12648_v53, %v12537_v15  ;;  %v3637_v3 = vld [vmem:[#allocation2 + $0x90] sm:$0xf]  ;;  %v3630_v44 = vld [vmem:[#allocation2 + $0x84] sm:$0xf] }
 0x34b   : > { %v3809_v27 = vrot.slane %v3807_v57, 5  ;;  %v3795_v9 = vrot.slane %v3794_v63, 4  ;;  %v3093_v17 = vadd.f32 %v12542_v19, %v3055_v8  ;;  %v3054_v59 = vmul.f32 %v12537_v15, %v12651_v0 }
 0x34c   : > { %v3091_v24 = vadd.f32 %v12542_v19, %v3053_v6  ;;  %10537 = vmatmul.mubr.bf16.vlgmr.msra.gmra.mrb[0].mxu1 %v9209_v13  ;;  %v3804_v37 = vor.u32 %v3803_v23, %v3799_v45  ;;  %v3094_v25 = vadd.f32 %v12542_v19, %v3056_v16  ;;  %v3812_v14 = vshrl.u32 %v3678_v12, 16 }
 0x34d   : > { %v3815_v33 = vshll.u32 %v3678_v12, 16  ;;  %v3800_v40 = vsel %vm12520_vm2, %v3795_v9, %v3799_v45  ;;  %10569 = vmatpush3.bf16.msra.mxu1 %v12531_v5  ;;  %v3125_v53 = vmax.f32 %v3093_v17, 0.0  ;;  %v3092_v55 = vadd.f32 %v12542_v19, %v3054_v59  ;;  %v11590_v45 = vld [vmem:[%s14493_s2 + $0x18] sm:$0xff]   ;;  %v3723_v12 = vld [vmem:[#allocation2 + $0x2c] sm:$0x1] }
 0x34e   : > { %v3123_v49 = vmax.f32 %v3091_v24, 0.0  ;;  %v3805_v60 = vrot.slane %v3804_v37, 4  ;;  %v3126_v2 = vmax.f32 %v3094_v25, 0.0  ;;  %v3814_v21 = vrot.slane %v3812_v14, 4  ;;  %10570 = vmatprep.subr.bf16.mxu1 %v11588_v7  ;;  %v3641_v9 = vld [vmem:[#allocation2 + $0x98] sm:$0x1] }
 0x34f   : > { %v3817_v0 = vrot.slane %v3815_v33, 5  ;;  %v9645_v1 = vpack.c.bf16 %v3125_v53, %v3125_v53  ;;  %v3124_v20 = vmax.f32 %v3092_v55, 0.0  ;;  %v3821_v30 = vshll.u32 %v3679_v26, 16  ;;  %v12741_v25 = vld [vmem:[#allocation2 + $0x30] sm:$0xf] }
 0x350   : > { %v9643_v10 = vpack.c.bf16 %v3123_v49, %v3123_v49  ;;  %v3810_v5 = vsel %vm12520_vm2, %v3805_v60, %v3809_v27  ;;  %v9646_v50 = vpack.c.bf16 %v3126_v2, %v3126_v2  ;;  %v3825_v18 = vshrl.u32 %v3679_v26, 16  ;;  %v11591_v26 = vld [vmem:[%s14493_s2 + $0x20] sm:$0xff]   ;;  %v12750_v55 = vld [vmem:[#allocation2 + $0x34] sm:$0xf] }
 0x351   : > { %v3818_v51 = vor.u32 %v3817_v0, %v3814_v21  ;;  %v9210_v48 = vcombine.low %v3800_v40, %v3810_v5  ;;  %v3422_v29 = vshrl.u32 %v9645_v1, 16  ;;  %v3425_v58 = vshll.u32 %v9645_v1, 16  ;;  %10571 = vmatpush3.bf16.msra.mxu1 %v11588_v7  ;;  %v3634_v40 = vld [vmem:[#allocation2 + $0x8c] sm:$0x1] }
 0x352   : > { %v3405_v31 = vshrl.u32 %v9643_v10, 16  ;;  %v3408_v11 = vshll.u32 %v9643_v10, 16  ;;  %v3430_v34 = vshrl.u32 %v9646_v50, 16  ;;  %v3433_v39 = vshll.u32 %v9646_v50, 16  ;;  %10572 = vmatprep.subr.bf16.mxu1 %v11589_v52  ;;  %v11592_v5 = vld [vmem:[%s14493_s2 + $0x28] sm:$0xff]  }
 0x353   : > { %v9644_v43 = vpack.c.bf16 %v3124_v20, %v3124_v20  ;;  %10540 = vmatprep.mubr.bf16.mxu1 %v9210_v48  ;;  %v3424_v46 = vrot.slane %v3422_v29, 7  ;;  %v3819_v57 = vrot.slane %v3818_v51, 4  ;;  %v3823_v62 = vrot.slane %v3821_v30, 5  ;;  %v12767_v29 = vld [vmem:[#allocation2 + $0x3c] sm:$0xf] }
 0x354   : > { %v3407_v56 = vrot.slane %v3405_v31, 7  ;;  %v3432_v63 = vrot.slane %v3430_v34, 7  ;;  %v3827_v7 = vrot.slane %v3825_v18, 4  ;;  %v3831_v49 = vshll.u32 %v3723_v12, 16 }
 0x355   : > { %v3413_v8 = vshrl.u32 %v9644_v43, 16  ;;  %v3416_v6 = vshll.u32 %v9644_v43, 16  ;;  %v3427_v13 = vor.u32 %v3425_v58, %v3424_v46  ;;  %v3428_v23 = vrot.slane %v3424_v46, 4  ;;  %10573 = vmatpush3.bf16.msra.mxu1 %v11589_v52  ;;  %v3724_v52 = vld [vmem:[#allocation2 + $0x38] sm:$0x1] }
 0x356   : > { %v3410_v27 = vor.u32 %v3408_v11, %v3407_v56  ;;  %v3411_v16 = vrot.slane %v3407_v56, 4  ;;  %v3435_v17 = vor.u32 %v3433_v39, %v3432_v63  ;;  %v3437_v24 = vrot.slane %v3432_v63, 4  ;;  %10574 = vmatprep.subr.bf16.mxu1 %v11590_v45 }
 0x357   : > { %v3415_v59 = vrot.slane %v3413_v8, 7  ;;  %v3824_v37 = vsel %vm12520_vm2, %v3819_v57, %v3823_v62  ;;  %v3638_v14 = vsel %vm12557_vm8, %v3427_v13, %v3637_v3  ;;  %v3828_v53 = vor.u32 %v3827_v7, %v3823_v62  ;;  %v12786_v7 = vld [vmem:[#allocation2 + $0x40] sm:$0xf] }
 0x358   : > { %v3631_v33 = vsel %vm12557_vm8, %v3410_v27, %v3630_v44  ;;  %3639 = vst [vmem:[#allocation2 + $0x90] sm:$0xf] %v3638_v14  ;;  %v3436_v60 = vsel %vm12564_vm9, %v3428_v23, %v3435_v17  ;;  %v3642_v2 = vsel %vm12570_vm10, %v3437_v24, %v3641_v9  ;;  %v3833_v10 = vrot.slane %v3831_v49, 5  ;;  %v3725_v49 = vld [vmem:[#allocation2 + $0x44] sm:$0x1] }
 0x359   : > { %3632 = vst [vmem:[#allocation2 + $0x84] sm:$0xf] %v3631_v33  ;;  %v3418_v21 = vor.u32 %v3416_v6, %v3415_v59  ;;  %v3420_v0 = vrot.slane %v3415_v59, 4  ;;  %3640 = vst [vmem:[#allocation2 + $0x94] sm:$0xf] %v3436_v60  ;;  %v3829_v1 = vrot.slane %v3828_v53, 4  ;;  %10575 = vmatpush3.bf16.msra.mxu1 %v11590_v45  ;;  %v3059_v45 = vmul.f32 %v12663_v22, %v12537_v15 }
 0x35a   : > { %3643 = vst [vmem:[#allocation2 + $0x98] sm:$0x1] %v3642_v2  ;;  %v3836_v20 = vshrl.u32 %v12741_v25, 16  ;;  %v3839_v30 = vshll.u32 %v12741_v25, 16  ;;  %v3845_v18 = vshll.u32 %v12750_v55, 16  ;;  %v3849_v48 = vshrl.u32 %v12750_v55, 16  ;;  %10576 = vmatprep.subr.bf16.mxu1 %v11591_v26 }
 0x35b   : > { %v3419_v50 = vsel %vm12564_vm9, %v3411_v16, %v3418_v21  ;;  %v3635_v51 = vsel %vm12570_vm10, %v3420_v0, %v3634_v40  ;;  %v3834_v58 = vsel %vm12520_vm2, %v3829_v1, %v3833_v10  ;;  %v3855_v11 = vshll.u32 %v3724_v52, 16  ;;  %v11593_v22 = vld [vmem:[%s14493_s2 + $0x30] sm:$0xff]   ;;  %v12803_v1 = vld [vmem:[%s14493_s2 + $0x80] sm:$0xff]  }
 0x35c   : > { %3633 = vst [vmem:[#allocation2 + $0x88] sm:$0xf] %v3419_v50  ;;  %3636 = vst [vmem:[#allocation2 + $0x8c] sm:$0x1] %v3635_v51  ;;  %v3838_v31 = vrot.slane %v3836_v20, 4  ;;  %v3841_v3 = vrot.slane %v3839_v30, 5  ;;  %v9211_v34 = vcombine.low %v3824_v37, %v3834_v58  ;;  %v3057_v44 = vmul.f32 %v12537_v15, %v12665_v28 }
 0x35d   : > { %v3847_v39 = vrot.slane %v3845_v18, 5  ;;  %v3851_v43 = vrot.slane %v3849_v48, 4  ;;  %v3857_v56 = vrot.slane %v3855_v11, 5  ;;  %v3060_v57 = vmul.f32 %v12669_v42, %v12537_v15  ;;  %10577 = vmatpush3.bf16.msra.mxu1 %v11591_v26  ;;  %v3651_v58 = vld [vmem:[#allocation2 + $0xa8] sm:$0xf] }
 0x35e   : > { %v3842_v46 = vor.u32 %v3841_v3, %v3838_v31  ;;  %10541 = vmatmul.mubr.bf16.gmra.mrb[4].mxu1 %v9211_v34  ;;  %v3097_v63 = vadd.f32 %v12542_v19, %v3059_v45  ;;  %v3058_v8 = vmul.f32 %v12537_v15, %v12678_v4  ;;  %v3860_v6 = vshrl.u32 %v12767_v29, 16  ;;  %10578 = vmatprep.subr.bf16.mxu1 %v11592_v5  ;;  %v3644_v45 = vld [vmem:[#allocation2 + $0x9c] sm:$0xf] }
 0x35f   : > { %v3852_v62 = vor.u32 %v3851_v43, %v3847_v39  ;;  %v3095_v28 = vadd.f32 %v12542_v19, %v3057_v44  ;;  %v3098_v42 = vadd.f32 %v12542_v19, %v3060_v57  ;;  %v3863_v13 = vshll.u32 %v12767_v29, 16 }
 0x360   : > { %v3843_v12 = vrot.slane %v3842_v46, 4  ;;  %v3129_v27 = vmax.f32 %v3097_v63, 0.0  ;;  %v3096_v15 = vadd.f32 %v12542_v19, %v3058_v8  ;;  %v3862_v4 = vrot.slane %v3860_v6, 4  ;;  %v11594_v19 = vld [vmem:[%s14493_s2 + $0x38] sm:$0xff]   ;;  %v3655_v46 = vld [vmem:[#allocation2 + $0xb0] sm:$0x1] }
 0x361   : > { %v3853_v23 = vrot.slane %v3852_v62, 4  ;;  %v3127_v9 = vmax.f32 %v3095_v28, 0.0  ;;  %v3130_v17 = vmax.f32 %v3098_v42, 0.0  ;;  %v3865_v24 = vrot.slane %v3863_v13, 5  ;;  %10579 = vmatpush3.bf16.msra.mxu1 %v11592_v5  ;;  %v3648_v6 = vld [vmem:[#allocation2 + $0xa4] sm:$0x1] }
 0x362   : > { %v3848_v16 = vsel %vm12520_vm2, %v3843_v12, %v3847_v39  ;;  %v9649_v37 = vpack.c.bf16 %v3129_v27, %v3129_v27  ;;  %v3128_v26 = vmax.f32 %v3096_v15, 0.0  ;;  %v3869_v14 = vshll.u32 %v12786_v7, 16  ;;  %10580 = vmatprep.subr.bf16.mxu1 %v11593_v22  ;;  %v12815_v27 = vld [vmem:[#allocation2 + $0x50] sm:$0x1] }
 0x363   : > { %v3858_v59 = vsel %vm12520_vm2, %v3853_v23, %v3857_v56  ;;  %v9647_v40 = vpack.c.bf16 %v3127_v9, %v3127_v9  ;;  %v9650_v53 = vpack.c.bf16 %v3130_v17, %v3130_v17  ;;  %v3866_v60 = vor.u32 %v3865_v24, %v3862_v4  ;;  %v12813_v23 = vld [vmem:[#allocation2 + $0x4c] sm:$0xf] }
 0x364   : > { %v9212_v33 = vcombine.low %v3848_v16, %v3858_v59  ;;  %v3456_v2 = vshrl.u32 %v9649_v37, 16  ;;  %v3459_v21 = vshll.u32 %v9649_v37, 16  ;;  %v9648_v0 = vpack.c.bf16 %v3128_v26, %v3128_v26 }
 0x365   : > { %v12798_v52 = vrot.slane %v3869_v14, 5  ;;  %v3439_v10 = vshrl.u32 %v9647_v40, 16  ;;  %v3442_v20 = vshll.u32 %v9647_v40, 16  ;;  %v3464_v30 = vshrl.u32 %v9650_v53, 16  ;;  %10581 = vmatpush3.bf16.msra.mxu1 %v11593_v22  ;;  %v12809_v22 = vld [vmem:[#allocation2 + $0x48] sm:$0xf] }
 0x366   : > { %10544 = vmatprep.mubr.bf16.mxu1 %v9212_v33  ;;  %v3467_v5 = vshll.u32 %v9650_v53, 16  ;;  %v3458_v50 = vrot.slane %v3456_v2, 7  ;;  %v3447_v51 = vshrl.u32 %v9648_v0, 16  ;;  %v3450_v18 = vshll.u32 %v9648_v0, 16  ;;  %10582 = vmatprep.subr.bf16.mxu1 %v11594_v19 }
 0x367   : > { %v3867_v48 = vrot.slane %v3866_v60, 4  ;;  %v3441_v31 = vrot.slane %v3439_v10, 7  ;;  %v3466_v3 = vrot.slane %v3464_v30, 7  ;;  %v3873_v11 = vshrl.u32 %v12786_v7, 16 }
 0x368   : > { %v3879_v34 = vshll.u32 %v3725_v49, 16  ;;  %v3461_v39 = vor.u32 %v3459_v21, %v3458_v50  ;;  %v3462_v43 = vrot.slane %v3458_v50, 4  ;;  %v3449_v56 = vrot.slane %v3447_v51, 7  ;;  %v11699_v49 = vld [vmem:[%s14494_s3] ss:$0 sm:$0xff] }
 0x369   : > { %v3872_v44 = vsel %vm12520_vm2, %v3867_v48, %v12798_v52  ;;  %v3444_v57 = vor.u32 %v3442_v20, %v3441_v31  ;;  %v3445_v62 = vrot.slane %v3441_v31, 4  ;;  %v3469_v63 = vor.u32 %v3467_v5, %v3466_v3  ;;  %10583 = vmatpush3.bf16.msra.mxu1 %v11594_v19  ;;  %v12839_v20 = vld [vmem:[#allocation2 + $0x54] sm:$0xf]  ;;  %v11700_v5 = vld [vmem:[%s14495_s4] ss:$0 sm:$0xff] }
 0x36a   : > { %v3471_v8 = vrot.slane %v3466_v3, 4  ;;  %v3652_v12 = vsel %vm12557_vm8, %v3461_v39, %v3651_v58  ;;  %v3452_v28 = vor.u32 %v3450_v18, %v3449_v56  ;;  %v3454_v42 = vrot.slane %v3449_v56, 4  ;;  %10616 = vmatprep.subr.bf16.mxu1 %v12803_v1 }
 0x36b   : > { %v3875_v13 = vrot.slane %v3873_v11, 4  ;;  %3653 = vst [vmem:[#allocation2 + $0xa8] sm:$0xf] %v3652_v12  ;;  %v3645_v15 = vsel %vm12557_vm8, %v3444_v57, %v3644_v45  ;;  %v3470_v4 = vsel %vm12564_vm9, %v3462_v43, %v3469_v63  ;;  %v3881_v9 = vrot.slane %v3879_v34, 5 }
 0x36c   : > { %v3656_v16 = vsel %vm12570_vm10, %v3471_v8, %v3655_v46  ;;  %3646 = vst [vmem:[#allocation2 + $0x9c] sm:$0xf] %v3645_v15  ;;  %3654 = vst [vmem:[#allocation2 + $0xac] sm:$0xf] %v3470_v4  ;;  %v3453_v17 = vsel %vm12564_vm9, %v3445_v62, %v3452_v28  ;;  %v3649_v24 = vsel %vm12570_vm10, %v3454_v42, %v3648_v6  ;;  %v3884_v37 = vshrl.u32 %v12809_v22, 16 }
 0x36d   : > { %3657 = vst [vmem:[#allocation2 + $0xb0] sm:$0x1] %v3656_v16  ;;  %v3876_v59 = vor.u32 %v3875_v13, %v12798_v52  ;;  %3647 = vst [vmem:[#allocation2 + $0xa0] sm:$0xf] %v3453_v17  ;;  %v3887_v26 = vshll.u32 %v12809_v22, 16  ;;  %v3893_v14 = vshll.u32 %v12813_v23, 16  ;;  %v3063_v60 = vmul.f32 %v11699_v49, %v12693_v32 }
 0x36e   : > { %3650 = vst [vmem:[#allocation2 + $0xa4] sm:$0x1] %v3649_v24  ;;  %v3897_v19 = vshrl.u32 %v12813_v23, 16  ;;  %v3903_v33 = vshll.u32 %v12815_v27, 16  ;;  %v3886_v53 = vrot.slane %v3884_v37, 4  ;;  %v3061_v2 = vmul.f32 %v11699_v49, %v12695_v54 }
 0x36f   : > { %v3877_v40 = vrot.slane %v3876_v59, 4  ;;  %v3889_v21 = vrot.slane %v3887_v26, 5  ;;  %v3895_v0 = vrot.slane %v3893_v14, 5  ;;  %v3101_v50 = vadd.f32 %v11700_v5, %v3063_v60  ;;  %v12854_v8 = vld [vmem:[#allocation2 + $0x58] sm:$0xf] }
 0x370   : > { %v3899_v52 = vrot.slane %v3897_v19, 4  ;;  %v3905_v10 = vrot.slane %v3903_v33, 5  ;;  %v3099_v51 = vadd.f32 %v11700_v5, %v3061_v2  ;;  %v3064_v18 = vmul.f32 %v11699_v49, %v12697_v35  ;;  %v3665_v15 = vld [vmem:[#allocation2 + $0xc0] sm:$0xf]  ;;  %v3658_v16 = vld [vmem:[#allocation2 + $0xb4] sm:$0xf] }
 0x371   : > { %v3882_v30 = vsel %vm12520_vm2, %v3877_v40, %v3881_v9  ;;  %v3890_v48 = vor.u32 %v3889_v21, %v3886_v53  ;;  %v3062_v58 = vmul.f32 %v11699_v49, %v12699_v41  ;;  %v3133_v31 = vmax.f32 %v3101_v50, 0.0  ;;  %v12858_v49 = vld [vmem:[#allocation2 + $0x5c] sm:$0x1]  ;;  %v12860_v50 = vld [vmem:[#allocation2 + $0x60] sm:$0xf] }
 0x372   : > { %v9213_v32 = vcombine.low %v3872_v44, %v3882_v30  ;;  %v3900_v54 = vor.u32 %v3899_v52, %v3895_v0  ;;  %v3131_v3 = vmax.f32 %v3099_v51, 0.0  ;;  %v3102_v11 = vadd.f32 %v11700_v5, %v3064_v18 }
 0x373   : > { %v3908_v34 = vshrl.u32 %v12839_v20, 16  ;;  %v3891_v39 = vrot.slane %v3890_v48, 4  ;;  %v3100_v45 = vadd.f32 %v11700_v5, %v3062_v58  ;;  %v3911_v46 = vshll.u32 %v12839_v20, 16  ;;  %v3662_v48 = vld [vmem:[#allocation2 + $0xbc] sm:$0x1] }
 0x374   : > { %10545 = vmatmul.mubr.bf16.gmra.mrb[8].mxu1 %v9213_v32  ;;  %v3901_v43 = vrot.slane %v3900_v54, 4  ;;  %v9653_v56 = vpack.c.bf16 %v3133_v31, %v3133_v31  ;;  %v9651_v57 = vpack.c.bf16 %v3131_v3, %v3131_v3  ;;  %v3134_v62 = vmax.f32 %v3102_v11, 0.0  ;;  %v3669_v32 = vld [vmem:[#allocation2 + $0xc8] sm:$0x1] }
 0x375   : > { %v3910_v35 = vrot.slane %v3908_v34, 4  ;;  %v3896_v44 = vsel %vm12520_vm2, %v3891_v39, %v3895_v0  ;;  %v3132_v63 = vmax.f32 %v3100_v45, 0.0  ;;  %v3913_v6 = vrot.slane %v3911_v46, 5  ;;  %v12867_v39 = vld [vmem:[#allocation2 + $0x64] sm:$0xf] }
 0x376   : > { %v3906_v41 = vsel %vm12520_vm2, %v3901_v43, %v3905_v10  ;;  %v3490_v28 = vshrl.u32 %v9653_v56, 16  ;;  %v3493_v42 = vshll.u32 %v9653_v56, 16  ;;  %v3473_v13 = vshrl.u32 %v9651_v57, 16 }
 0x377   : > { %v9214_v12 = vcombine.low %v3896_v44, %v3906_v41  ;;  %v3476_v4 = vshll.u32 %v9651_v57, 16  ;;  %v9654_v9 = vpack.c.bf16 %v3134_v62, %v3134_v62  ;;  %v9652_v17 = vpack.c.bf16 %v3132_v63, %v3132_v63  ;;  %v12874_v57 = vld [vmem:[#allocation2 + $0x6c] sm:$0xf]  ;;  %v12884_v63 = vld [vmem:[#allocation2 + $0x70] sm:$0xf] }
 0x378   : > { %v3914_v24 = vor.u32 %v3913_v6, %v3910_v35  ;;  %v3492_v59 = vrot.slane %v3490_v28, 7  ;;  %v3475_v37 = vrot.slane %v3473_v13, 7  ;;  %v3917_v26 = vshll.u32 %v12854_v8, 16  ;;  %v12888_v13 = vld [vmem:[#allocation2 + $0x78] sm:$0xf] }
 0x379   : > { %10548 = vmatprep.mubr.bf16.mxu1 %v9214_v12  ;;  %v3921_v14 = vshrl.u32 %v12854_v8, 16  ;;  %v3498_v19 = vshrl.u32 %v9654_v9, 16  ;;  %v3501_v33 = vshll.u32 %v9654_v9, 16  ;;  %v3481_v40 = vshrl.u32 %v9652_v17, 16 }
 0x37a   : > { %v3484_v53 = vshll.u32 %v9652_v17, 16  ;;  %v3495_v60 = vor.u32 %v3493_v42, %v3492_v59  ;;  %v3496_v2 = vrot.slane %v3492_v59, 4  ;;  %v3478_v21 = vor.u32 %v3476_v4, %v3475_v37  ;;  %v12898_v59 = vld [vmem:[#allocation2 + $0x74] sm:$0x1] }
 0x37b   : > { %v3479_v0 = vrot.slane %v3475_v37, 4  ;;  %v3500_v52 = vrot.slane %v3498_v19, 7  ;;  %v3483_v10 = vrot.slane %v3481_v40, 7  ;;  %v3915_v30 = vrot.slane %v3914_v24, 4 }
 0x37c   : > { %v3919_v5 = vrot.slane %v3917_v26, 5  ;;  %v3666_v51 = vsel %vm12557_vm8, %v3495_v60, %v3665_v15  ;;  %v3659_v18 = vsel %vm12557_vm8, %v3478_v21, %v3658_v16  ;;  %v3923_v54 = vrot.slane %v3921_v14, 4  ;;  %v12894_v16 = vld [vmem:[#allocation2 + $0x7c] sm:$0xf] }
 0x37d   : > { %v3927_v58 = vshll.u32 %v12858_v49, 16  ;;  %3667 = vst [vmem:[#allocation2 + $0xc0] sm:$0xf] %v3666_v51  ;;  %3660 = vst [vmem:[#allocation2 + $0xb4] sm:$0xf] %v3659_v18  ;;  %v3503_v31 = vor.u32 %v3501_v33, %v3500_v52  ;;  %v3505_v3 = vrot.slane %v3500_v52, 4  ;;  %v3486_v11 = vor.u32 %v3484_v53, %v3483_v10 }
 0x37e   : > { %v3488_v34 = vrot.slane %v3483_v10, 4  ;;  %v3920_v43 = vsel %vm12520_vm2, %v3915_v30, %v3919_v5  ;;  %v3924_v45 = vor.u32 %v3923_v54, %v3919_v5  ;;  %v3932_v56 = vshrl.u32 %v12860_v50, 16  ;;  %v12903_v52 = vld [vmem:[#allocation2 + $0x80] sm:$0x1] }
 0x37f   : > { %v3929_v46 = vrot.slane %v3927_v58, 5  ;;  %v3504_v62 = vsel %vm12564_vm9, %v3496_v2, %v3503_v31  ;;  %v3670_v35 = vsel %vm12570_vm10, %v3505_v3, %v3669_v32  ;;  %v3487_v44 = vsel %vm12564_vm9, %v3479_v0, %v3486_v11  ;;  %v12908_v3 = vld [vmem:[#allocation2 + $0x84] sm:$0xf] }
 0x380   : > { %v3663_v41 = vsel %vm12570_vm10, %v3488_v34, %v3662_v48  ;;  %3668 = vst [vmem:[#allocation2 + $0xc4] sm:$0xf] %v3504_v62  ;;  %3671 = vst [vmem:[#allocation2 + $0xc8] sm:$0x1] %v3670_v35  ;;  %v3925_v6 = vrot.slane %v3924_v45, 4  ;;  %v3934_v12 = vrot.slane %v3932_v56, 4 }
 0x381   : > { %3661 = vst [vmem:[#allocation2 + $0xb8] sm:$0xf] %v3487_v44  ;;  %3664 = vst [vmem:[#allocation2 + $0xbc] sm:$0x1] %v3663_v41  ;;  %v3935_v28 = vshll.u32 %v12860_v50, 16  ;;  %v3941_v42 = vshll.u32 %v12867_v39, 16 }
 0x382   : > { %v3945_v61 = vshrl.u32 %v12867_v39, 16  ;;  %v3951_v15 = vshll.u32 %v12871_v47, 16  ;;  %v3956_v36 = vshrl.u32 %v12874_v57, 16  ;;  %v3959_v4 = vshll.u32 %v12874_v57, 16  ;;  %v12916_v44 = vld [vmem:[#allocation2 + $0x88] sm:$0xf] }
 0x383   : > { %v3930_v9 = vsel %vm12520_vm2, %v3925_v6, %v3929_v46  ;;  %v3937_v17 = vrot.slane %v3935_v28, 5  ;;  %v3943_v24 = vrot.slane %v3941_v42, 5  ;;  %v3965_v37 = vshll.u32 %v12884_v63, 16  ;;  %v12921_v42 = vld [vmem:[#allocation2 + $0x90] sm:$0xf] }
 0x384   : > { %v9215_v26 = vcombine.low %v3920_v43, %v3930_v9  ;;  %v3947_v14 = vrot.slane %v3945_v61, 4  ;;  %v3953_v19 = vrot.slane %v3951_v15, 5  ;;  %v3958_v33 = vrot.slane %v3956_v36, 4 }
 0x385   : > { %v3938_v40 = vor.u32 %v3937_v17, %v3934_v12  ;;  %v3961_v53 = vrot.slane %v3959_v4, 5  ;;  %v3967_v60 = vrot.slane %v3965_v37, 5  ;;  %v3969_v2 = vshrl.u32 %v12884_v63, 16  ;;  %v12923_v4 = vld [vmem:[#allocation2 + $0x8c] sm:$0x1] }
 0x386   : > { %10549 = vmatmul.mubr.bf16.gmra.mrb[12].mxu1 %v9215_v26  ;;  %v3948_v21 = vor.u32 %v3947_v14, %v3943_v24  ;;  %v3975_v0 = vshll.u32 %v12898_v59, 16  ;;  %v3980_v10 = vshrl.u32 %v12888_v13, 16  ;;  %v3983_v30 = vshll.u32 %v12888_v13, 16  ;;  %v12930_v14 = vld [vmem:[#allocation2 + $0x94] sm:$0xf] }
 0x387   : > { %v3939_v5 = vrot.slane %v3938_v40, 4  ;;  %v3962_v51 = vor.u32 %v3961_v53, %v3958_v33  ;;  %v3971_v18 = vrot.slane %v3969_v2, 4  ;;  %v3989_v32 = vshll.u32 %v12894_v16, 16 }
 0x388   : > { %v3949_v48 = vrot.slane %v3948_v21, 4  ;;  %v3977_v54 = vrot.slane %v3975_v0, 5  ;;  %v3982_v58 = vrot.slane %v3980_v10, 4  ;;  %v3985_v31 = vrot.slane %v3983_v30, 5  ;;  %v12935_v0 = vld [vmem:[#allocation2 + $0x98] sm:$0x1] }
 0x389   : > { %v3944_v11 = vsel %vm12520_vm2, %v3939_v5, %v3943_v24  ;;  %v3963_v34 = vrot.slane %v3962_v51, 4  ;;  %v3972_v43 = vor.u32 %v3971_v18, %v3967_v60  ;;  %v3991_v45 = vrot.slane %v3989_v32, 5  ;;  %v12940_v32 = vld [vmem:[#allocation2 + $0x9c] sm:$0xf] }
 0x38a   : > { %v3954_v46 = vsel %vm12520_vm2, %v3949_v48, %v3953_v19  ;;  %v3986_v56 = vor.u32 %v3985_v31, %v3982_v58  ;;  %v3993_v62 = vshrl.u32 %v12894_v16, 16  ;;  %v3999_v35 = vshll.u32 %v12903_v52, 16 }
 0x38b   : > { %v9216_v41 = vcombine.low %v3944_v11, %v3954_v46  ;;  %v3968_v6 = vsel %vm12520_vm2, %v3963_v34, %v3967_v60  ;;  %v3973_v12 = vrot.slane %v3972_v43, 4  ;;  %v4004_v28 = vshrl.u32 %v12908_v3, 16  ;;  %v12943_v11 = vld [vmem:[#allocation2 + $0xa0] sm:$0xf] }
 0x38c   : > { %v3987_v61 = vrot.slane %v3986_v56, 4  ;;  %v3995_v15 = vrot.slane %v3993_v62, 4  ;;  %v4001_v36 = vrot.slane %v3999_v35, 5  ;;  %v4007_v9 = vshll.u32 %v12908_v3, 16  ;;  %v12947_v56 = vld [vmem:[#allocation2 + $0xa4] sm:$0x1] }
 0x38d   : > { %10552 = vmatprep.mubr.bf16.mxu1 %v9216_v41  ;;  %v3978_v17 = vsel %vm12520_vm2, %v3973_v12, %v3977_v54  ;;  %v4006_v24 = vrot.slane %v4004_v28, 4  ;;  %v4013_v37 = vshll.u32 %v12916_v44, 16  ;;  %v4017_v26 = vshrl.u32 %v12916_v44, 16  ;;  %v12950_v12 = vld [vmem:[#allocation2 + $0xa8] sm:$0xf] }
 0x38e   : > { %v9217_v19 = vcombine.low %v3968_v6, %v3978_v17  ;;  %v3992_v33 = vsel %vm12520_vm2, %v3987_v61, %v3991_v45  ;;  %v3996_v40 = vor.u32 %v3995_v15, %v3991_v45  ;;  %v4009_v53 = vrot.slane %v4007_v9, 5  ;;  %v12956_v9 = vld [vmem:[#allocation2 + $0xac] sm:$0xf] }
 0x38f   : > { %v4015_v60 = vrot.slane %v4013_v37, 5  ;;  %v4019_v2 = vrot.slane %v4017_v26, 4  ;;  %v4023_v21 = vshll.u32 %v12923_v4, 16  ;;  %v4028_v10 = vshrl.u32 %v12921_v42, 16 }
 0x390   : > { %10553 = vmatmul.mubr.bf16.gmra.mrb[16].mxu1 %v9217_v19  ;;  %v3997_v30 = vrot.slane %v3996_v40, 4  ;;  %v4010_v5 = vor.u32 %v4009_v53, %v4006_v24  ;;  %v4031_v51 = vshll.u32 %v12921_v42, 16  ;;  %v4037_v18 = vshll.u32 %v12930_v14, 16 }
 0x391   : > { %v4020_v48 = vor.u32 %v4019_v2, %v4015_v60  ;;  %v4025_v54 = vrot.slane %v4023_v21, 5  ;;  %v4030_v58 = vrot.slane %v4028_v10, 4  ;;  %v4041_v31 = vshrl.u32 %v12930_v14, 16 }
 0x392   : > { %v4002_v34 = vsel %vm12520_vm2, %v3997_v30, %v4001_v36  ;;  %v4011_v43 = vrot.slane %v4010_v5, 4  ;;  %v4033_v45 = vrot.slane %v4031_v51, 5  ;;  %v4039_v46 = vrot.slane %v4037_v18, 5  ;;  %v12965_v5 = vld [vmem:[#allocation2 + $0xb4] sm:$0xf] }
 0x393   : > { %v9218_v62 = vcombine.low %v3992_v33, %v4002_v34  ;;  %v4021_v35 = vrot.slane %v4020_v48, 4  ;;  %v4043_v41 = vrot.slane %v4041_v31, 4  ;;  %v4047_v6 = vshll.u32 %v12935_v0, 16 }
 0x394   : > { %v4016_v28 = vsel %vm12520_vm2, %v4011_v43, %v4015_v60  ;;  %v4034_v61 = vor.u32 %v4033_v45, %v4030_v58  ;;  %v4052_v15 = vshrl.u32 %v12940_v32, 16  ;;  %v4055_v36 = vshll.u32 %v12940_v32, 16  ;;  %v12961_v60 = vld [vmem:[#allocation2 + $0xb0] sm:$0x1]  ;;  %v12971_v58 = vld [vmem:[#allocation2 + $0xb8] sm:$0xf] }
 0x395   : > { %10556 = vmatprep.mubr.bf16.mxu1 %v9218_v62  ;;  %v4026_v17 = vsel %vm12520_vm2, %v4021_v35, %v4025_v54  ;;  %v4044_v24 = vor.u32 %v4043_v41, %v4039_v46  ;;  %v4049_v37 = vrot.slane %v4047_v6, 5  ;;  %v4061_v26 = vshll.u32 %v12943_v11, 16 }
 0x396   : > { %v9219_v19 = vcombine.low %v4016_v28, %v4026_v17  ;;  %v4035_v33 = vrot.slane %v4034_v61, 4  ;;  %v4054_v40 = vrot.slane %v4052_v15, 4  ;;  %v4057_v53 = vrot.slane %v4055_v36, 5  ;;  %v12976_v28 = vld [vmem:[#allocation2 + $0xbc] sm:$0x1] }
 0x397   : > { %v4045_v2 = vrot.slane %v4044_v24, 4  ;;  %v4063_v21 = vrot.slane %v4061_v26, 5  ;;  %v4065_v10 = vshrl.u32 %v12943_v11, 16  ;;  %v4071_v30 = vshll.u32 %v12947_v56, 16 }
 0x398   : > { %10557 = vmatmul.mubr.bf16.gmra.mrb[20].mxu1 %v9219_v19  ;;  %v4040_v51 = vsel %vm12520_vm2, %v4035_v33, %v4039_v46  ;;  %v4058_v18 = vor.u32 %v4057_v53, %v4054_v40  ;;  %v4076_v48 = vshrl.u32 %v12950_v12, 16  ;;  %v4079_v54 = vshll.u32 %v12950_v12, 16 }
 0x399   : > { %v4050_v31 = vsel %vm12520_vm2, %v4045_v2, %v4049_v37  ;;  %v4067_v34 = vrot.slane %v4065_v10, 4  ;;  %v4073_v43 = vrot.slane %v4071_v30, 5  ;;  %v4085_v45 = vshll.u32 %v12956_v9, 16 }
 0x39a   : > { %v9220_v62 = vcombine.low %v4040_v51, %v4050_v31  ;;  %v4059_v35 = vrot.slane %v4058_v18, 4  ;;  %v4078_v41 = vrot.slane %v4076_v48, 4  ;;  %v4081_v6 = vrot.slane %v4079_v54, 5 }
 0x39b   : > { %v4068_v46 = vor.u32 %v4067_v34, %v4063_v21  ;;  %v4087_v61 = vrot.slane %v4085_v45, 5  ;;  %v4089_v15 = vshrl.u32 %v12956_v9, 16  ;;  %v4095_v36 = vshll.u32 %v12961_v60, 16 }
 0x39c   : > { %10560 = vmatprep.mubr.bf16.mxu1 %v9220_v62  ;;  %v4082_v17 = vor.u32 %v4081_v6, %v4078_v41  ;;  %v4100_v24 = vshrl.u32 %v12965_v5, 16  ;;  %v4103_v37 = vshll.u32 %v12965_v5, 16  ;;  %v4064_v26 = vsel %vm12520_vm2, %v4059_v35, %v4063_v21 }
 0x39d   : > { %v4069_v19 = vrot.slane %v4068_v46, 4  ;;  %v4091_v33 = vrot.slane %v4089_v15, 4  ;;  %v4109_v40 = vshll.u32 %v12971_v58, 16  ;;  %v4113_v30 = vshrl.u32 %v12971_v58, 16 }
 0x39e   : > { %v4083_v53 = vrot.slane %v4082_v17, 4  ;;  %v4102_v2 = vrot.slane %v4100_v24, 4  ;;  %v4105_v10 = vrot.slane %v4103_v37, 5  ;;  %v4119_v54 = vshll.u32 %v12976_v28, 16 }
 0x39f   : > { %v4074_v51 = vsel %vm12520_vm2, %v4069_v19, %v4073_v43  ;;  %v4092_v18 = vor.u32 %v4091_v33, %v4087_v61  ;;  %v4111_v48 = vrot.slane %v4109_v40, 5  ;;  %v4115_v45 = vrot.slane %v4113_v30, 4  ;;  %v11701_v30 = vld [vmem:[#allocation2] sm:$0xf]  ;;  %v4730_v40 = vld [vmem:[#allocation2 + $0x90] sm:$0xe] }
 0x3a0   : > { %v9221_v31 = vcombine.low %v4064_v26, %v4074_v51  ;;  %v4106_v34 = vor.u32 %v4105_v10, %v4102_v2  ;;  %v4097_v62 = vrot.slane %v4095_v36, 5  ;;  %v4088_v6 = vsel %vm12520_vm2, %v4083_v53, %v4087_v61  ;;  %v13013_v51 = vld [vmem:[#allocation2 + $0x4] sm:$0xf] }
 0x3a1   : > { %v4093_v21 = vrot.slane %v4092_v18, 4  ;;  %v4116_v41 = vor.u32 %v4115_v45, %v4111_v48  ;;  %v4121_v15 = vrot.slane %v4119_v54, 5  ;;  %v9239_v37 = vcombine.low %v12839_v20, %v12854_v8  ;;  %v11703_v54 = vld [vmem:[#allocation2 + $0xc] sm:$0xf] }
 0x3a2   : > { %10561 = vmatmul.mubr.bf16.gmra.mrb[24].mxu1 %v9221_v31  ;;  %v4107_v35 = vrot.slane %v4106_v34, 4  ;;  %v9240_v36 = vcombine.low %v12860_v50, %v12867_v39  ;;  %v9241_v26 = vcombine.low %v12874_v57, %v12884_v63  ;;  %v9242_v61 = vcombine.low %v12888_v13, %v12894_v16  ;;  %v13018_v31 = vld [vmem:[#allocation2 + $0x10] sm:$0xf]  ;;  %v11600_v45 = vld [vmem:[%s14493_s2 + $0x88] sm:$0xff]   ;;  %v4718_v50 = vld [vmem:[#allocation2] sm:$0xe] }
 0x3a3   : > { %v4098_v46 = vsel %vm12520_vm2, %v4093_v21, %v4097_v62  ;;  %v4117_v24 = vrot.slane %v4116_v41, 4  ;;  %v9243_v19 = vcombine.low %v12908_v3, %v12916_v44  ;;  %v9232_v18 = vcombine.low %v11701_v30, %v13013_v51  ;;  %v11705_v21 = vld [vmem:[#allocation2 + $0x18] sm:$0xf]  ;;  %v13024_v62 = vld [vmem:[#allocation2 + $0x1c] sm:$0xf] }
 0x3a4   : > { %v9222_v43 = vcombine.low %v4088_v6, %v4098_v46  ;;  %v4112_v17 = vsel %vm12520_vm2, %v4107_v35, %v4111_v48  ;;  %v9233_v34 = vcombine.low %v11703_v54, %v13018_v31  ;;  %v9234_v35 = vcombine.low %v11705_v21, %v13024_v62  ;;  %v4725_v41 = vld [vmem:[#allocation2 + $0x54] sm:$0xe]  ;;  %v4726_v6 = vld [vmem:[#allocation2 + $0x60] sm:$0xe] }
 0x3a5   : > { %v4122_v33 = vsel %vm12520_vm2, %v4117_v24, %v4121_v15  ;;  %v4820_v46 = vrot.slane %v12854_v8, 5  ;;  %v4727_v15 = vld [vmem:[#allocation2 + $0x6c] sm:$0xe]  ;;  %v9263_v30 = vrot.slane %v4725_v41, 9  ;;  %v9264_v21 = vrot.slane %v4726_v6, 9 }
 0x3a6   : > { %10564 = vmatprep.mubr.bf16.mxu1 %v9222_v43  ;;  %v9223_v10 = vcombine.low %v4112_v17, %v4122_v33  ;;  %v11707_v43 = vld [vmem:[#allocation2 + $0x24] sm:$0xf]  ;;  %v13029_v17 = vld [vmem:[#allocation2 + $0x28] sm:$0xf]  ;;  %v9236_v33 = vcombine.low %v12741_v25, %v12750_v55  ;;  %v9265_v41 = vrot.slane %v4727_v15, 9  ;;  %v4834_v48 = vrot.slane %v12884_v63, 5 }
 0x3a7   : > { %v9235_v24 = vcombine.low %v11707_v43, %v13029_v17  ;;  %v4822_v54 = vrot.slane %v4820_v46, 4  ;;  %v4728_v43 = vld [vmem:[#allocation2 + $0x78] sm:$0xe]  ;;  %v13047_v25 = vsel %vm13039_vm13, %v9263_v30, %v4820_v46  ;;  %v4841_v6 = vrot.slane %v12894_v16, 5 }
 0x3a8   : > { %v11606_v46 = vld [vmem:[%s14493_s2 + $0x98] sm:$0xff]   ;;  %v4836_v30 = vrot.slane %v4834_v48, 4  ;;  %v4844_v53 = vrot.slane %v12903_v52, 5  ;;  %v14571_v20 = vcombine.low %v12921_v42, %v12930_v14  ;;  %v4771_v8 = vrot.slane %v13013_v51, 5  ;;  %v11711_v51 = vld [vmem:[#allocation2 + $0x20] sm:$0x1] }
 0x3a9   : > { %v14572_v63 = vcombine.low %v12940_v32, %v12943_v11  ;;  %v14573_v13 = vcombine.low %v12950_v12, %v12956_v9  ;;  %v4785_v42 = vrot.slane %v13024_v62, 5  ;;  %v14574_v32 = vcombine.low %v12965_v5, %v12971_v58  ;;  %v11710_v12 = vld [vmem:[#allocation2 + $0x14] sm:$0x1] }
 0x3aa   : > { %10565 = vmatmul.mubr.bf16.gmra.mrb[28].mxu1 %v9223_v10  ;;  %v11603_v10 = vld [vmem:[%s14493_s2 + $0x90] sm:$0xff]   ;;  %v4773_v57 = vrot.slane %v4771_v8, 4  ;;  %v4792_v62 = vrot.slane %v13029_v17, 5  ;;  %v4721_v17 = vld [vmem:[#allocation2 + $0x24] sm:$0xe] }
 0x3ab   : > { %10584 = vmatprep.mubr.bf16.mxu1 %v9232_v18  ;;  %v4827_v18 = vrot.slane %v12867_v39, 5  ;;  %v11709_v39 = vld [vmem:[#allocation2 + $0x8] sm:$0x1]  ;;  %v11712_v5 = vld [vmem:[#allocation2 + $0x34] sm:$0xf] }
 0x3ad   : > { %v4829_v55 = vrot.slane %v4827_v18, 4 }
 0x3b2   : > { %10585 = vmatmul.mubr.bf16.vlgmr.msra.gmra.mrb[0].mxu1 %v9233_v34  ;;  %v4823_v34 = vrot.slane %v12858_v49, 5  ;;  %v13056_v49 = vsel %vm13039_vm13, %v9264_v21, %v4827_v18  ;;  %v4729_v18 = vld [vmem:[#allocation2 + $0x84] sm:$0xe]  ;;  %v4843_v21 = vrot.slane %v4841_v6, 4 }
 0x3b3   : > { %10588 = vmatprep.mubr.bf16.mxu1 %v9234_v35  ;;  %10617 = vmatpush3.bf16.msra.mxu1 %v12803_v1  ;;  %v4830_v35 = vrot.slane %v12871_v47, 5  ;;  %v4837_v47 = vrot.slane %v12898_v59, 5  ;;  %v9237_v59 = vcombine.low %v12767_v29, %v12786_v7  ;;  %v4848_v29 = vrot.slane %v12916_v44, 5  ;;  %v7246_v1 = vld [vmem:[#allocation2 + $0x60] sm:$0xf] }
 0x3b4   : > { %10618 = vmatprep.subr.bf16.mxu1 %v11600_v45  ;;  %v13052_v2 = vsel %vm13039_vm13, %v4822_v54, %v4823_v34  ;;  %v9266_v54 = vrot.slane %v4728_v43, 9  ;;  %v13091_v52 = vsel %vm13039_vm13, %v4843_v21, %v4844_v53  ;;  %v4732_v21 = vld [vmem:[#allocation2 + $0xa8] sm:$0xe]  ;;  %v4865_v34 = vrot.slane %v12947_v56, 5 }
 0x3b5   : > { %v13067_v15 = vsel %vm13039_vm13, %v4829_v55, %v4830_v35  ;;  %v13080_v35 = vsel %vm13039_vm13, %v4836_v30, %v4837_v47  ;;  %v4731_v55 = vld [vmem:[#allocation2 + $0x9c] sm:$0xe]  ;;  %v4851_v47 = vrot.slane %v12923_v4, 5  ;;  %v4778_v44 = vrot.slane %v13018_v31, 5 }
 0x3b6   : > { %v13084_v43 = vsel %vm13039_vm13, %v9266_v54, %v4841_v6  ;;  %v9268_v6 = vrot.slane %v4730_v40, 9  ;;  %v4858_v54 = vrot.slane %v12935_v0, 5  ;;  %v9269_v4 = vrot.slane %v4731_v55, 9 }
 0x3b7   : > { %10619 = vmatpush3.bf16.msra.mxu1 %v11600_v45  ;;  %v13076_v45 = vsel %vm13039_vm13, %v9265_v41, %v4834_v48  ;;  %v9267_v48 = vrot.slane %v4729_v18, 9  ;;  %v11609_v41 = vld [vmem:[%s14493_s2 + $0xa0] sm:$0xff]   ;;  %v4862_v18 = vrot.slane %v12943_v11, 5  ;;  %v4869_v40 = vrot.slane %v12956_v9, 5  ;;  %v4719_v11 = vld [vmem:[#allocation2 + $0xc] sm:$0xe] }
 0x3b8   : > { %10620 = vmatprep.subr.bf16.mxu1 %v11603_v10  ;;  %v4781_v9 = vrot.slane %v11710_v12, 5 }
 0x3b9   : > { %v13102_v53 = vsel %vm13039_vm13, %v9267_v48, %v4848_v29  ;;  %v4864_v48 = vrot.slane %v4862_v18, 4 }
 0x3ba   : > { %10589 = vmatmul.mubr.bf16.gmra.mrb[4].mxu1 %v9235_v24  ;;  %v4855_v24 = vrot.slane %v12930_v14, 5 }
 0x3bb   : > { %10592 = vmatprep.mubr.bf16.mxu1 %v9236_v33  ;;  %10621 = vmatpush3.bf16.msra.mxu1 %v11603_v10  ;;  %v4850_v10 = vrot.slane %v4848_v29, 4  ;;  %v13136_v56 = vsel %vm13039_vm13, %v4864_v48, %v4865_v34  ;;  %v4876_v29 = vrot.slane %v12971_v58, 5  ;;  %v11615_v48 = vld [vmem:[%s14493_s2 + $0xb0] sm:$0xff]   ;;  %v4799_v58 = vrot.slane %v11712_v5, 5 }
 0x3bc   : > { %10622 = vmatprep.subr.bf16.mxu1 %v11606_v46  ;;  %v4857_v30 = vrot.slane %v4855_v24, 4  ;;  %v13112_v33 = vsel %vm13039_vm13, %v9268_v6, %v4855_v24  ;;  %v11612_v24 = vld [vmem:[%s14493_s2 + $0xa8] sm:$0xff]   ;;  %v4733_v6 = vld [vmem:[#allocation2 + $0xb4] sm:$0xe] }
 0x3bd   : > { %v13108_v7 = vsel %vm13039_vm13, %v4850_v10, %v4851_v47  ;;  %v9270_v10 = vrot.slane %v4732_v21, 9  ;;  %v4872_v47 = vrot.slane %v12961_v60, 5 }
 0x3be   : > { %v13119_v0 = vsel %vm13039_vm13, %v4857_v30, %v4858_v54  ;;  %v9238_v30 = vcombine.low %v12809_v22, %v12813_v23  ;;  %v13132_v54 = vsel %vm13039_vm13, %v9269_v4, %v4862_v18  ;;  %v9271_v18 = vrot.slane %v4733_v6, 9 }
 0x3bf   : > { %10623 = vmatpush3.bf16.msra.mxu1 %v11606_v46  ;;  %v4871_v46 = vrot.slane %v4869_v40, 4  ;;  %v13143_v60 = vsel %vm13039_vm13, %v9270_v10, %v4869_v40  ;;  %v4878_v4 = vrot.slane %v4876_v29, 4 }
 0x3c0   : > { %10624 = vmatprep.subr.bf16.mxu1 %v11609_v41  ;;  %v13157_v40 = vsel %vm13039_vm13, %v9271_v18, %v4876_v29  ;;  %v11619_v29 = vld [vmem:[%s14493_s2 + $0xc0] sm:$0xff]  }
 0x3c1   : > { %v13147_v22 = vsel %vm13039_vm13, %v4871_v46, %v4872_v47  ;;  %v9257_v46 = vrot.slane %v4719_v11, 9  ;;  %v11622_v11 = vld [vmem:[%s14493_s2 + $0xd8] sm:$0xff]  }
 0x3c2   : > { %10593 = vmatmul.mubr.bf16.gmra.mrb[8].mxu1 %v9237_v59  ;;  %v4879_v59 = vrot.slane %v12976_v28, 5  ;;  %v11618_v28 = vld [vmem:[%s14493_s2 + $0xb8] sm:$0xff]  }
 0x3c3   : > { %10596 = vmatprep.mubr.bf16.mxu1 %v9238_v30  ;;  %10625 = vmatpush3.bf16.msra.mxu1 %v11609_v41  ;;  %v4779_v30 = vsel %vm13039_vm13, %v9257_v46, %v4778_v44  ;;  %v4816_v46 = vrot.slane %v12815_v27, 5  ;;  %v5627_v41 = vld [vmem:[#allocation2 + $0xa4] sm:$0x1] }
 0x3c4   : > { %10626 = vmatprep.subr.bf16.mxu1 %v11612_v24  ;;  %v13161_v10 = vsel %vm13039_vm13, %v4878_v4, %v4879_v59  ;;  %v11620_v59 = vld [vmem:[%s14493_s2 + $0xc8] sm:$0xff]  }
 0x3c7   : > { %10627 = vmatpush3.bf16.msra.mxu1 %v11612_v24  ;;  %v4788_v24 = vrot.slane %v11711_v51, 5 }
 0x3c8   : > { %10628 = vmatprep.subr.bf16.mxu1 %v11615_v48 }
 0x3ca   : > { %10597 = vmatmul.mubr.bf16.gmra.mrb[12].mxu1 %v9239_v37  ;;  %v4774_v37 = vrot.slane %v11709_v39, 5  ;;  %v4722_v39 = vld [vmem:[#allocation2 + $0x30] sm:$0xe] }
 0x3cb   : > { %10600 = vmatprep.mubr.bf16.mxu1 %v9240_v36  ;;  %10629 = vmatpush3.bf16.msra.mxu1 %v11615_v48  ;;  %v9256_v36 = vrot.slane %v4718_v50, 9 }
 0x3cc   : > { %10630 = vmatprep.subr.bf16.mxu1 %v11618_v28  ;;  %v4775_v3 = vsel %vm13039_vm13, %v4773_v57, %v4774_v37  ;;  %v11714_v37 = vld [vmem:[#allocation2 + $0x38] sm:$0x1]  ;;  %v11621_v57 = vld [vmem:[%s14493_s2 + $0xd0] sm:$0xff]  }
 0x3cd   : > { %v4772_v16 = vsel %vm13039_vm13, %v9256_v36, %v4771_v8  ;;  %v11713_v8 = vld [vmem:[#allocation2 + $0x2c] sm:$0x1]  ;;  %v4802_v36 = vrot.slane %v11714_v37, 5  ;;  %v6346_v37 = vld [vmem:[#allocation2 + $0x30] sm:$0xe] }
 0x3ce   : > { %v9288_v14 = vcombine.low %v4772_v16, %v4775_v3  ;;  %v4795_v50 = vrot.slane %v11713_v8, 5  ;;  %v11715_v16 = vld [vmem:[#allocation2 + $0x40] sm:$0xf]  ;;  %v6345_v8 = vld [vmem:[#allocation2 + $0x24] sm:$0xe] }
 0x3cf   : > { %10631 = vmatpush3.bf16.msra.mxu1 %v11618_v28  ;;  %v4794_v28 = vrot.slane %v4792_v62, 4  ;;  %v4806_v3 = vrot.slane %v11715_v16, 5  ;;  %v14576_v16 = vcombine.low %v13056_v49, %v13067_v15  ;;  %v13283_v49 = vld [vmem:[#allocation2 + $0x58] sm:$0xf]  ;;  %v13285_v15 = vld [vmem:[#allocation2 + $0x5c] sm:$0x1] }
 0x3d0   : > { %10664 = vmatprep.subr.bf16.mxu1 %v11619_v29 }
 0x3d1   : > { %v4808_v12 = vrot.slane %v4806_v3, 4 }
 0x3d2   : > { %10601 = vmatmul.mubr.bf16.gmra.mrb[16].mxu1 %v9241_v26  ;;  %v4780_v26 = vrot.slane %v4778_v44, 4  ;;  %v9260_v44 = vrot.slane %v4722_v39, 9 }
 0x3d3   : > { %10604 = vmatprep.mubr.bf16.mxu1 %v9242_v61  ;;  %v4787_v61 = vrot.slane %v4785_v42, 4 }
 0x3d4   : > { %v4782_v31 = vsel %vm13039_vm13, %v4780_v26, %v4781_v9  ;;  %v4723_v9 = vld [vmem:[#allocation2 + $0x3c] sm:$0xe] }
 0x3d5   : > { %v4789_v6 = vsel %vm13039_vm13, %v4787_v61, %v4788_v24  ;;  %v9289_v18 = vcombine.low %v4779_v30, %v4782_v31  ;;  %v4724_v24 = vld [vmem:[#allocation2 + $0x48] sm:$0xe]  ;;  %v11623_v31 = vld [vmem:[%s14493_s2 + $0xe0] sm:$0xff]  }
 0x3da   : > { %10605 = vmatmul.mubr.bf16.gmra.mrb[20].mxu1 %v9243_v19  ;;  %v4720_v19 = vld [vmem:[#allocation2 + $0x18] sm:$0xe] }
 0x3db   : > { %10608 = vmatprep.mubr.bf16.mxu1 %v14571_v20  ;;  %v9258_v47 = vrot.slane %v4720_v19, 9  ;;  %v4801_v20 = vrot.slane %v4799_v58, 4 }
 0x3dd   : > { %v4786_v4 = vsel %vm13039_vm13, %v9258_v47, %v4785_v42  ;;  %v4813_v42 = vrot.slane %v12813_v23, 5  ;;  %v11716_v23 = vld [vmem:[#allocation2 + $0x44] sm:$0x1] }
 0x3de   : > { %v9290_v48 = vcombine.low %v4786_v4, %v4789_v6  ;;  %v4809_v51 = vrot.slane %v11716_v23, 5  ;;  %v9262_v6 = vrot.slane %v4724_v24, 9  ;;  %v13386_v23 = vld [vmem:[#allocation2 + $0xa0] sm:$0xf] }
 0x3df   : > { %v4815_v19 = vrot.slane %v4813_v42, 4 }
 0x3e0   : > { %v4810_v47 = vsel %vm13039_vm13, %v4808_v12, %v4809_v51  ;;  %v4814_v27 = vsel %vm13039_vm13, %v9262_v6, %v4813_v42 }
 0x3e1   : > { %v4817_v5 = vsel %vm13039_vm13, %v4815_v19, %v4816_v46  ;;  %v13296_v19 = vld [vmem:[#allocation2 + $0x64] sm:$0xf] }
 0x3e2   : > { %10609 = vmatmul.mubr.bf16.gmra.mrb[24].mxu1 %v14572_v63  ;;  %v9259_v63 = vrot.slane %v4721_v17, 9  ;;  %v9294_v4 = vcombine.low %v4814_v27, %v4817_v5  ;;  %v11626_v17 = vld [vmem:[%s14493_s2 + $0xf8] sm:$0xff]  }
 0x3e3   : > { %10612 = vmatprep.mubr.bf16.mxu1 %v14573_v13  ;;  %v4796_v13 = vsel %vm13039_vm13, %v4794_v28, %v4795_v50  ;;  %v13252_v28 = vld [vmem:[#allocation2 + $0x2c] sm:$0x1]  ;;  %v13259_v50 = vld [vmem:[#allocation2 + $0x38] sm:$0x1] }
 0x3ea   : > { %10613 = vmatmul.mubr.bf16.gmra.mrb[28].mxu1 %v14574_v32  ;;  %v4800_v32 = vsel %vm13039_vm13, %v9260_v44, %v4799_v58 }
 0x3eb   : > { %10632 = vmatprep.mubr.bf16.mxu1 %v9288_v14  ;;  %v4793_v14 = vsel %vm13039_vm13, %v9259_v63, %v4792_v62  ;;  %v9261_v62 = vrot.slane %v4723_v9, 9  ;;  %v13267_v63 = vld [vmem:[#allocation2 + $0x44] sm:$0x1]  ;;  %v6433_v9 = vrot.slane %v13259_v50, 5 }
 0x3ec   : > { %v9291_v26 = vcombine.low %v4793_v14, %v4796_v13  ;;  %v13269_v13 = vld [vmem:[#allocation2 + $0x4c] sm:$0xf]  ;;  %v6347_v14 = vld [vmem:[#allocation2 + $0x3c] sm:$0xe]  ;;  %v6440_v6 = vrot.slane %v13267_v63, 5 }
 0x3ed   : > { %v4807_v58 = vsel %vm13039_vm13, %v9261_v62, %v4806_v3  ;;  %v9394_v3 = vrot.slane %v6345_v8, 9  ;;  %v9396_v24 = vrot.slane %v6347_v14, 9  ;;  %v13305_v62 = vld [vmem:[#allocation2 + $0x68] sm:$0x1]  ;;  %v13320_v8 = vld [vmem:[#allocation2 + $0x74] sm:$0x1] }
 0x3ee   : > { %v9293_v30 = vcombine.low %v4807_v58, %v4810_v47  ;;  %v6444_v58 = vrot.slane %v13269_v13, 5  ;;  %v6458_v14 = vrot.slane %v13296_v19, 5 }
 0x3f2   : > { %10633 = vmatmul.mubr.bf16.vlgmr.msra.gmra.mrb[0].mxu1 %v9289_v18  ;;  %v11624_v18 = vld [vmem:[%s14493_s2 + $0xe8] sm:$0xff]  }
 0x3f3   : > { %10636 = vmatprep.mubr.bf16.mxu1 %v9290_v48  ;;  %10665 = vmatpush3.bf16.msra.mxu1 %v11619_v29  ;;  %v4803_v29 = vsel %vm13039_vm13, %v4801_v20, %v4802_v36  ;;  %v13250_v48 = vld [vmem:[#allocation2 + $0x28] sm:$0xf]  ;;  %v13257_v20 = vld [vmem:[#allocation2 + $0x34] sm:$0xf]  ;;  %v14575_v36 = vcombine.low %v13047_v25, %v13052_v2  ;;  %v13279_v2 = vld [vmem:[%s14493_s2 + $0x100] sm:$0xff]  }
 0x3f4   : > { %10666 = vmatprep.subr.bf16.mxu1 %v11620_v59  ;;  %v9292_v61 = vcombine.low %v4800_v32, %v4803_v29  ;;  %v6423_v39 = vrot.slane %v13250_v48, 5  ;;  %v6426_v29 = vrot.slane %v13252_v28, 5  ;;  %v6430_v42 = vrot.slane %v13257_v20, 5  ;;  %v13281_v25 = vld [vmem:[#allocation2 + $0x50] sm:$0x1] }
 0x3f5   : > { %v6348_v32 = vld [vmem:[#allocation2 + $0x48] sm:$0xe] }
 0x3f6   : > { %v6425_v44 = vrot.slane %v6423_v39, 4  ;;  %v6432_v12 = vrot.slane %v6430_v42, 4  ;;  %v9397_v5 = vrot.slane %v6348_v32, 9  ;;  %v14581_v32 = vcombine.low %v13084_v43, %v13091_v52 }
 0x3f7   : > { %10667 = vmatpush3.bf16.msra.mxu1 %v11620_v59  ;;  %v11625_v59 = vld [vmem:[%s14493_s2 + $0xf0] sm:$0xff]  }
 0x3f8   : > { %10668 = vmatprep.subr.bf16.mxu1 %v11621_v57  ;;  %v13309_v47 = vsel %vm13039_vm13, %v6432_v12, %v6433_v9  ;;  %v13342_v12 = vld [vmem:[#allocation2 + $0x7c] sm:$0xf] }
 0x3fa   : > { %10637 = vmatmul.mubr.bf16.gmra.mrb[4].mxu1 %v9291_v26  ;;  %v9395_v26 = vrot.slane %v6346_v37, 9  ;;  %v13328_v37 = vsel %vm13039_vm13, %v9397_v5, %v6444_v58  ;;  %v6460_v5 = vrot.slane %v6458_v14, 4 }
 0x3fb   : > { %10640 = vmatprep.mubr.bf16.mxu1 %v9292_v61  ;;  %10669 = vmatpush3.bf16.msra.mxu1 %v11621_v57  ;;  %v13265_v57 = vld [vmem:[#allocation2 + $0x40] sm:$0xf]  ;;  %v13293_v61 = vsel %vm13039_vm13, %v6425_v44, %v6426_v29  ;;  %14578 = vst [vmem:[#allocation7_spill] sm:$0xff] %v13328_v37 }
 0x3fc   : > { %10670 = vmatprep.subr.bf16.mxu1 %v11622_v11  ;;  %v13302_v51 = vsel %vm13039_vm13, %v9395_v26, %v6430_v42  ;;  %v6437_v46 = vrot.slane %v13265_v57, 5  ;;  %v6454_v42 = vrot.slane %v13285_v15, 5  ;;  %v6351_v26 = vld [vmem:[#allocation2 + $0x6c] sm:$0xe] }
 0x3fe   : > { %v6439_v27 = vrot.slane %v6437_v46, 4 }
 0x3ff   : > { %10671 = vmatpush3.bf16.msra.mxu1 %v11622_v11  ;;  %v13289_v11 = vsel %vm13039_vm13, %v9394_v3, %v6423_v39  ;;  %v13324_v39 = vsel %vm13039_vm13, %v9396_v24, %v6437_v46  ;;  %v14579_v3 = vcombine.low %v13076_v45, %v13080_v35  ;;  %v6352_v46 = vld [vmem:[#allocation2 + $0x78] sm:$0xe] }
 0x400   : > { %10672 = vmatprep.subr.bf16.mxu1 %v11623_v31  ;;  %14577 = vst [vmem:[#allocation6_spill] sm:$0xff] %v13324_v39  ;;  %v13335_v44 = vsel %vm13039_vm13, %v6439_v27, %v6440_v6  ;;  %v13356_v6 = vld [vmem:[#allocation2 + $0x88] sm:$0xf]  ;;  %v13365_v27 = vld [vmem:[#allocation2 + $0x94] sm:$0xf]  ;;  %v9401_v43 = vrot.slane %v6352_v46, 9 }
 0x401   : > { %14580 = vst [vmem:[#allocation8_spill] sm:$0xff] %v13335_v44  ;;  %v6479_v45 = vrot.slane %v13356_v6, 5  ;;  %v7988_v39 = vld [vmem:[#allocation2 + $0x60] sm:$0xe] }
 0x402   : > { %10641 = vmatmul.mubr.bf16.gmra.mrb[8].mxu1 %v9293_v30  ;;  %v6354_v30 = vld [vmem:[#allocation2 + $0x90] sm:$0xe] }
 0x403   : > { %10644 = vmatprep.mubr.bf16.mxu1 %v9294_v4  ;;  %10673 = vmatpush3.bf16.msra.mxu1 %v11623_v31  ;;  %v6349_v31 = vld [vmem:[#allocation2 + $0x54] sm:$0xe]  ;;  %v6451_v4 = vrot.slane %v13283_v49, 5  ;;  %v6481_v21 = vrot.slane %v6479_v45, 4 }
 0x404   : > { %10674 = vmatprep.subr.bf16.mxu1 %v11624_v18 }
 0x405   : > { %v6453_v29 = vrot.slane %v6451_v4, 4 }
 0x407   : > { %10675 = vmatpush3.bf16.msra.mxu1 %v11624_v18  ;;  %v6447_v18 = vrot.slane %v13281_v25, 5  ;;  %v13362_v52 = vsel %vm13039_vm13, %v6453_v29, %v6454_v42  ;;  %v5624_v29 = vld [vmem:[#allocation2 + $0x98] sm:$0x1] }
 0x408   : > { %10676 = vmatprep.subr.bf16.mxu1 %v11625_v59  ;;  %14584 = vst [vmem:[#allocation11_spill] sm:$0xff] %v13362_v52  ;;  %v14593_v52 = vcombine.low %v13112_v33, %v13119_v0 }
 0x40a   : > { %10645 = vmatmul.mubr.bf16.gmra.mrb[12].mxu1 %v14575_v36  ;;  %v6446_v36 = vrot.slane %v6444_v58, 4  ;;  %v6461_v58 = vrot.slane %v13305_v62, 5 }
 0x40b   : > { %10648 = vmatprep.mubr.bf16.mxu1 %v14576_v16  ;;  %10677 = vmatpush3.bf16.msra.mxu1 %v11625_v59  ;;  %v6350_v59 = vld [vmem:[#allocation2 + $0x60] sm:$0xe]  ;;  %v9398_v16 = vrot.slane %v6349_v31, 9  ;;  %v13354_v31 = vld [vmem:[#allocation2 + $0x80] sm:$0x1] }
 0x40c   : > { %10678 = vmatprep.subr.bf16.mxu1 %v11626_v17  ;;  %v13348_v35 = vsel %vm13039_vm13, %v6446_v36, %v6447_v18  ;;  %v9399_v24 = vrot.slane %v6350_v59, 9  ;;  %v9400_v59 = vrot.slane %v6351_v26, 9  ;;  %v13378_v42 = vsel %vm13039_vm13, %v6460_v5, %v6461_v58 }
 0x40d   : > { %14582 = vst [vmem:[#allocation9_spill] sm:$0xff] %v13348_v35  ;;  %v13352_v9 = vsel %vm13039_vm13, %v9398_v16, %v6451_v4  ;;  %v6353_v16 = vld [vmem:[#allocation2 + $0x84] sm:$0xe]  ;;  %14586 = vst [vmem:[#allocation13_spill] sm:$0xff] %v13378_v42  ;;  %v6472_v18 = vrot.slane %v13342_v12, 5  ;;  %v6475_v26 = vrot.slane %v13354_v31, 5 }
 0x40e   : > { %14583 = vst [vmem:[#allocation10_spill] sm:$0xff] %v13352_v9  ;;  %v13371_v4 = vsel %vm13039_vm13, %v9399_v24, %v6458_v14  ;;  %v9402_v34 = vrot.slane %v6353_v16, 9  ;;  %v6486_v42 = vrot.slane %v13365_v27, 5  ;;  %v11640_v9 = vld [vmem:[#allocation2 + $0x78] sm:$0xff]  }
 0x40f   : > { %10679 = vmatpush3.bf16.msra.mxu1 %v11626_v17  ;;  %v13318_v17 = vld [vmem:[#allocation2 + $0x70] sm:$0xf]  ;;  %14585 = vst [vmem:[#allocation12_spill] sm:$0xff] %v13371_v4  ;;  %v13394_v46 = vsel %vm13039_vm13, %v9401_v43, %v6472_v18  ;;  %v6474_v58 = vrot.slane %v6472_v18, 4  ;;  %v6355_v4 = vld [vmem:[#allocation2 + $0x9c] sm:$0xe] }
 0x410   : > { %10712 = vmatprep.subr.bf16.mxu1 %v13279_v2  ;;  %v6465_v36 = vrot.slane %v13318_v17, 5  ;;  %14588 = vst [vmem:[#allocation15_spill] sm:$0xff] %v13394_v46  ;;  %v13415_v16 = vsel %vm13039_vm13, %v9402_v34, %v6479_v45  ;;  %v6489_v43 = vrot.slane %v5624_v29, 5  ;;  %v5633_v34 = vld [vmem:[#allocation2 + $0xbc] sm:$0x1]  ;;  %v9404_v0 = vrot.slane %v6355_v4, 9 }
 0x411   : > { %v13411_v18 = vsel %vm13039_vm13, %v6474_v58, %v6475_v26  ;;  %14592 = vst [vmem:[#allocation18_spill] sm:$0xff] %v13415_v16  ;;  %v6488_v58 = vrot.slane %v6486_v42, 4  ;;  %v6493_v45 = vrot.slane %v13386_v23, 5  ;;  %v6358_v4 = vld [vmem:[#allocation2 + $0xc0] sm:$0xe] }
 0x412   : > { %10649 = vmatmul.mubr.bf16.gmra.mrb[16].mxu1 %v14579_v3  ;;  %v13374_v3 = vld [vmem:[#allocation2 + $0x8c] sm:$0x1]  ;;  %v6467_v24 = vrot.slane %v6465_v36, 4  ;;  %v13390_v5 = vsel %vm13039_vm13, %v9400_v59, %v6465_v36  ;;  %v14590_v59 = vcombine.low %v13102_v53, %v13108_v7  ;;  %14591 = vst [vmem:[#allocation17_spill] sm:$0xff] %v13411_v18  ;;  %v5630_v7 = vld [vmem:[#allocation2 + $0xb0] sm:$0x1] }
 0x413   : > { %10652 = vmatprep.mubr.bf16.mxu1 %v14581_v32  ;;  %v6468_v32 = vrot.slane %v13320_v8, 5  ;;  %14587 = vst [vmem:[#allocation14_spill] sm:$0xff] %v13390_v5  ;;  %v6482_v55 = vrot.slane %v13374_v3, 5  ;;  %v13405_v36 = vld [vmem:[#allocation2 + $0xac] sm:$0xf]  ;;  %v6503_v16 = vrot.slane %v5630_v7, 5  ;;  %v13445_v18 = vsel %vm13039_vm13, %v9404_v0, %v6493_v45 }
 0x414   : > { %v13420_v53 = vld [vmem:[#allocation2 + $0xb8] sm:$0xf]  ;;  %v6500_v29 = vrot.slane %v13405_v36, 5  ;;  %14597 = vst [vmem:[#allocation22_spill] sm:$0xff] %v13445_v18  ;;  %v6510_v7 = vrot.slane %v5633_v34, 5  ;;  %v5743_v18 = vshll.u32 %v13265_v57, 16 }
 0x415   : > { %v13398_v14 = vsel %vm13039_vm13, %v6467_v24, %v6468_v32  ;;  %v9403_v32 = vrot.slane %v6354_v30, 9  ;;  %v6356_v24 = vld [vmem:[#allocation2 + $0xa8] sm:$0xe]  ;;  %v13426_v26 = vsel %vm13039_vm13, %v6481_v21, %v6482_v55  ;;  %v6496_v55 = vrot.slane %v5627_v41, 5 }
 0x416   : > { %14589 = vst [vmem:[#allocation16_spill] sm:$0xff] %v13398_v14  ;;  %14594 = vst [vmem:[#allocation19_spill] sm:$0xff] %v13426_v26  ;;  %v5635_v14 = vld [vmem:[#allocation2 + $0xc4] sm:$0xf]  ;;  %v9405_v21 = vrot.slane %v6356_v24, 9  ;;  %v6495_v26 = vrot.slane %v6493_v45, 4 }
 0x417   : > { %v13432_v33 = vsel %vm13039_vm13, %v9403_v32, %v6486_v42  ;;  %v6507_v42 = vrot.slane %v13420_v53, 5  ;;  %v5636_v32 = vld [vmem:[#allocation2 + $0xc8] sm:$0x1]  ;;  %v6502_v41 = vrot.slane %v6500_v29, 4 }
 0x418   : > { %14595 = vst [vmem:[#allocation20_spill] sm:$0xff] %v13432_v33  ;;  %v13505_v33 = vld [vmem:[#allocation2 + $0x14] sm:$0x1] }
 0x419   : > { %v6509_v30 = vrot.slane %v6507_v42, 4  ;;  %v13459_v0 = vsel %vm13039_vm13, %v6502_v41, %v6503_v16  ;;  %v14604_v16 = vcombine.low %v13143_v60, %v13147_v22  ;;  %v11628_v60 = vld [vmem:[#allocation2 + $0x18] sm:$0xff]   ;;  %v11632_v22 = vld [vmem:[%s14493_s2 + $0x108] sm:$0xff]  }
 0x41a   : > { %10653 = vmatmul.mubr.bf16.gmra.mrb[20].mxu1 %v14590_v59  ;;  %v13437_v59 = vsel %vm13039_vm13, %v6488_v58, %v6489_v43  ;;  %v13449_v43 = vsel %vm13039_vm13, %v9405_v21, %v6500_v29  ;;  %v13453_v58 = vsel %vm13039_vm13, %v6495_v26, %v6496_v55  ;;  %14600 = vst [vmem:[#allocation25_spill] sm:$0xff] %v13459_v0  ;;  %v9407_v21 = vrot.slane %v6358_v4, 9  ;;  %v5589_v41 = vld [vmem:[#allocation2 + $0xc] sm:$0xf] }
 0x41b   : > { %10656 = vmatprep.mubr.bf16.mxu1 %v14593_v52  ;;  %v6357_v52 = vld [vmem:[#allocation2 + $0xb4] sm:$0xe]  ;;  %14596 = vst [vmem:[#allocation21_spill] sm:$0xff] %v13437_v59  ;;  %14598 = vst [vmem:[#allocation23_spill] sm:$0xff] %v13449_v43  ;;  %v6514_v59 = vrot.slane %v5635_v14, 5  ;;  %v13472_v14 = vsel %vm13039_vm13, %v6509_v30, %v6510_v7  ;;  %v6517_v55 = vrot.slane %v5636_v32, 5  ;;  %v14607_v4 = vcombine.low %v13157_v40, %v13161_v10 }
 0x41c   : > { %v9406_v24 = vrot.slane %v6357_v52, 9  ;;  %14599 = vst [vmem:[#allocation24_spill] sm:$0xff] %v13453_v58  ;;  %v14602_v52 = vcombine.low %v13132_v54, %v13136_v56  ;;  %14603 = vst [vmem:[#allocation27_spill] sm:$0xff] %v13472_v14  ;;  %v11635_v32 = vld [vmem:[%s14493_s2 + $0x110] sm:$0xff]   ;;  %v5638_v40 = vshrl.u32 %v5589_v41, 16  ;;  %v5641_v10 = vshll.u32 %v5589_v41, 16 }
 0x41d   : > { %v6516_v34 = vrot.slane %v6514_v59, 4  ;;  %v13481_v54 = vsel %vm13039_vm13, %v9407_v21, %v6514_v59  ;;  %v11630_v59 = vld [vmem:[#allocation2 + $0x24] sm:$0xff]   ;;  %v11631_v7 = vld [vmem:[#allocation2 + $0x30] sm:$0xff]   ;;  %v11638_v21 = vld [vmem:[%s14493_s2 + $0x118] sm:$0xff]  }
 0x41e   : > { %v13463_v45 = vsel %vm13039_vm13, %v9406_v24, %v6507_v42  ;;  %14605 = vst [vmem:[#allocation28_spill] sm:$0xff] %v13481_v54  ;;  %v11627_v42 = vld [vmem:[#allocation2 + $0xc] sm:$0xff]  }
 0x41f   : > { %14601 = vst [vmem:[#allocation26_spill] sm:$0xff] %v13463_v45  ;;  %v13485_v56 = vsel %vm13039_vm13, %v6516_v34, %v6517_v55  ;;  %v5590_v24 = vld [vmem:[#allocation2 + $0x10] sm:$0xf]  ;;  %v5592_v55 = vld [vmem:[#allocation2 + $0x18] sm:$0xf]  ;;  %v5699_v45 = vshrl.u32 %v13250_v48, 16 }
 0x420   : > { %14606 = vst [vmem:[#allocation29_spill] sm:$0xff] %v13485_v56  ;;  %v5651_v34 = vshrl.u32 %v5590_v24, 16  ;;  %v13510_v56 = vld [vmem:[#allocation2 + $0x20] sm:$0x1] }
 0x422   : > { %10657 = vmatmul.mubr.bf16.gmra.mrb[24].mxu1 %v14602_v52  ;;  %v5647_v52 = vshll.u32 %v5590_v24, 16  ;;  %v5653_v30 = vrot.slane %v5651_v34, 4  ;;  %v5595_v24 = vld [vmem:[#allocation2 + $0x24] sm:$0xf] }
 0x423   : > { %10660 = vmatprep.mubr.bf16.mxu1 %v14604_v16  ;;  %v5593_v16 = vld [vmem:[#allocation2 + $0x1c] sm:$0xf]  ;;  %v5686_v54 = vshrl.u32 %v5595_v24, 16 }
 0x424   : > { %v5649_v41 = vrot.slane %v5647_v52, 5  ;;  %v5671_v29 = vshll.u32 %v5593_v16, 16  ;;  %v5675_v26 = vshrl.u32 %v5593_v16, 16  ;;  %v11636_v52 = vld [vmem:[#allocation2 + $0x54] sm:$0xff]  }
 0x426   : > { %v13512_v34 = vrot.slane %v5671_v29, 5  ;;  %v5677_v16 = vrot.slane %v5675_v26, 4  ;;  %v5695_v29 = vshll.u32 %v13250_v48, 16  ;;  %v5705_v48 = vshll.u32 %v13252_v28, 16 }
 0x428   : > { %v5678_v26 = vor.u32 %v5677_v16, %v13512_v34  ;;  %v13529_v16 = vrot.slane %v5695_v29, 5 }
 0x42a   : > { %10661 = vmatmul.mubr.bf16.gmra.mrb[28].mxu1 %v14607_v4  ;;  %v5643_v4 = vrot.slane %v5641_v10, 5  ;;  %v11644_v10 = vld [vmem:[%s14493_s2 + $0x128] sm:$0xff]   ;;  %v5679_v43 = vrot.slane %v5678_v26, 4 }
 0x42b   : > { %10680 = vmatprep.mubr.bf16.mxu1 %v11627_v42  ;;  %v5640_v42 = vrot.slane %v5638_v40, 4  ;;  %v11634_v40 = vld [vmem:[#allocation2 + $0x48] sm:$0xff]  }
 0x432   : > { %10681 = vmatmul.mubr.bf16.vlgmr.msra.gmra.mrb[0].mxu1 %v11628_v60  ;;  %v5662_v60 = vshrl.u32 %v5592_v55, 16 }
 0x433   : > { %10684 = vmatprep.mubr.bf16.mxu1 %v11630_v59  ;;  %10713 = vmatpush3.bf16.msra.mxu1 %v13279_v2  ;;  %v11633_v2 = vld [vmem:[#allocation2 + $0x3c] sm:$0xff]  }
 0x434   : > { %10714 = vmatprep.subr.bf16.mxu1 %v11632_v22  ;;  %v11641_v59 = vld [vmem:[%s14493_s2 + $0x120] sm:$0xff]  }
 0x437   : > { %10715 = vmatpush3.bf16.msra.mxu1 %v11632_v22  ;;  %v5665_v22 = vshll.u32 %v5592_v55, 16  ;;  %v5654_v55 = vor.u32 %v5653_v30, %v5649_v41  ;;  %v11647_v30 = vld [vmem:[%s14493_s2 + $0x130] sm:$0xff]  }
 0x438   : > { %10716 = vmatprep.subr.bf16.mxu1 %v11635_v32 }
 0x439   : > { %v5655_v14 = vrot.slane %v5654_v55, 4  ;;  %v11650_v55 = vld [vmem:[%s14493_s2 + $0x138] sm:$0xff]  }
 0x43a   : > { %10685 = vmatmul.mubr.bf16.gmra.mrb[4].mxu1 %v11631_v7  ;;  %v5644_v7 = vor.u32 %v5643_v4, %v5640_v42  ;;  %v5657_v42 = vshll.u32 %v13505_v33, 16 }
 0x43b   : > { %10688 = vmatprep.mubr.bf16.mxu1 %v11633_v2  ;;  %10717 = vmatpush3.bf16.msra.mxu1 %v11635_v32  ;;  %v5664_v2 = vrot.slane %v5662_v60, 4  ;;  %v5667_v32 = vrot.slane %v5665_v22, 5  ;;  %v5681_v22 = vshll.u32 %v13510_v56, 16 }
 0x43c   : > { %10718 = vmatprep.subr.bf16.mxu1 %v11638_v21  ;;  %v5645_v4 = vrot.slane %v5644_v7, 4  ;;  %v11637_v7 = vld [vmem:[#allocation2 + $0x60] sm:$0xff]  }
 0x43d   : > { %v5668_v60 = vor.u32 %v5667_v32, %v5664_v2  ;;  %v5683_v0 = vrot.slane %v5681_v22, 5  ;;  %v5723_v22 = vshrl.u32 %v13257_v20, 16 }
 0x43e   : > { %v5650_v2 = vsel %vm12520_vm2, %v5645_v4, %v5649_v41  ;;  %v5701_v41 = vrot.slane %v5699_v45, 4 }
 0x43f   : > { %10719 = vmatpush3.bf16.msra.mxu1 %v11638_v21  ;;  %v5689_v21 = vshll.u32 %v5595_v24, 16  ;;  %v5688_v24 = vrot.slane %v5686_v54, 4  ;;  %v5669_v32 = vrot.slane %v5668_v60, 4  ;;  %v5719_v60 = vshll.u32 %v13257_v20, 16  ;;  %v13544_v20 = vld [vmem:[%s14493_s2 + $0x140] sm:$0xff]  }
 0x440   : > { %10720 = vmatprep.subr.bf16.mxu1 %v11641_v59 }
 0x441   : > { %v5674_v28 = vsel %vm12520_vm2, %v5669_v32, %v13512_v34  ;;  %v5607_v32 = vld [vmem:[#allocation2 + $0x54] sm:$0xf] }
 0x442   : > { %10689 = vmatmul.mubr.bf16.gmra.mrb[8].mxu1 %v11634_v40  ;;  %v5691_v40 = vrot.slane %v5689_v21, 5 }
 0x443   : > { %10692 = vmatprep.mubr.bf16.mxu1 %v11636_v52  ;;  %10721 = vmatpush3.bf16.msra.mxu1 %v11641_v59  ;;  %v5598_v52 = vld [vmem:[#allocation2 + $0x30] sm:$0xf]  ;;  %v5659_v59 = vrot.slane %v5657_v42, 5  ;;  %v5601_v42 = vld [vmem:[#allocation2 + $0x3c] sm:$0xf] }
 0x444   : > { %10722 = vmatprep.subr.bf16.mxu1 %v11644_v10  ;;  %v5710_v21 = vshrl.u32 %v5598_v52, 16  ;;  %v5692_v58 = vor.u32 %v5691_v40, %v5688_v24  ;;  %v5713_v4 = vshll.u32 %v5598_v52, 16  ;;  %v5734_v26 = vshrl.u32 %v5601_v42, 16  ;;  %v5604_v24 = vld [vmem:[#allocation2 + $0x48] sm:$0xf] }
 0x445   : > { %v5660_v54 = vsel %vm12520_vm2, %v5655_v14, %v5659_v59  ;;  %v5747_v14 = vshrl.u32 %v13265_v57, 16  ;;  %v5737_v45 = vshll.u32 %v5601_v42, 16  ;;  %v13546_v40 = vrot.slane %v5705_v48, 5 }
 0x446   : > { %v13536_v29 = vcombine.low %v5650_v2, %v5660_v54  ;;  %v5712_v57 = vrot.slane %v5710_v21, 4  ;;  %v5771_v52 = vshrl.u32 %v13269_v13, 16  ;;  %v5684_v59 = vsel %vm12520_vm2, %v5679_v43, %v5683_v0 }
 0x447   : > { %10723 = vmatpush3.bf16.msra.mxu1 %v11644_v10  ;;  %v11639_v10 = vld [vmem:[#allocation2 + $0x6c] sm:$0xff]   ;;  %v13552_v34 = vrot.slane %v5692_v58, 4  ;;  %v5715_v2 = vrot.slane %v5713_v4, 5  ;;  %v13555_v54 = vrot.slane %v5719_v60, 5  ;;  %v5725_v42 = vrot.slane %v5723_v22, 4  ;;  %v11642_v4 = vld [vmem:[#allocation2 + $0x84] sm:$0xff]  }
 0x448   : > { %10724 = vmatprep.subr.bf16.mxu1 %v11647_v30  ;;  %v5749_v48 = vrot.slane %v5747_v14, 4  ;;  %v5736_v21 = vrot.slane %v5734_v26, 4  ;;  %v5739_v46 = vrot.slane %v5737_v45, 5  ;;  %v5758_v5 = vshrl.u32 %v5604_v24, 16 }
 0x449   : > { %v5773_v58 = vrot.slane %v5771_v52, 4  ;;  %v5782_v0 = vshrl.u32 %v5607_v32, 16  ;;  %v13562_v60 = vcombine.low %v5674_v28, %v5684_v59  ;;  %v5791_v22 = vshll.u32 %v13283_v49, 16 }
 0x44a   : > { %10693 = vmatmul.mubr.bf16.gmra.mrb[12].mxu1 %v11637_v7  ;;  %v5702_v7 = vor.u32 %v5701_v41, %v13529_v16  ;;  %v5785_v41 = vshll.u32 %v5607_v32, 16  ;;  %v5698_v14 = vsel %vm12520_vm2, %v13552_v34, %v13529_v16  ;;  %v5716_v26 = vor.u32 %v5715_v2, %v5712_v57 }
 0x44b   : > { %10696 = vmatprep.mubr.bf16.mxu1 %v11639_v10  ;;  %10725 = vmatpush3.bf16.msra.mxu1 %v11647_v30  ;;  %v5767_v30 = vshll.u32 %v13269_v13, 16  ;;  %v13557_v10 = vrot.slane %v5743_v18, 5  ;;  %v5761_v13 = vshll.u32 %v5604_v24, 16  ;;  %v5729_v18 = vshll.u32 %v13259_v50, 16 }
 0x44c   : > { %10726 = vmatprep.subr.bf16.mxu1 %v11650_v55  ;;  %v5726_v45 = vor.u32 %v5725_v42, %v13555_v54  ;;  %v5703_v28 = vrot.slane %v5702_v7, 4  ;;  %v5753_v50 = vshll.u32 %v13267_v63, 16  ;;  %v5760_v52 = vrot.slane %v5758_v5, 4 }
 0x44d   : > { %v13560_v43 = vrot.slane %v5767_v30, 5  ;;  %v5750_v24 = vor.u32 %v5749_v48, %v13557_v10  ;;  %v5610_v30 = vld [vmem:[#allocation2 + $0x60] sm:$0xf]  ;;  %v5763_v59 = vrot.slane %v5761_v13, 5  ;;  %v5740_v32 = vor.u32 %v5739_v46, %v5736_v21  ;;  %v11643_v21 = vld [vmem:[#allocation2 + $0x90] sm:$0xff]  }
 0x44e   : > { %v5787_v35 = vrot.slane %v5785_v41, 5  ;;  %v13575_v37 = vrot.slane %v5791_v22, 5  ;;  %v5806_v57 = vshrl.u32 %v5610_v30, 16  ;;  %v5809_v34 = vshll.u32 %v5610_v30, 16  ;;  %v5613_v22 = vld [vmem:[#allocation2 + $0x6c] sm:$0xf] }
 0x44f   : > { %10727 = vmatpush3.bf16.msra.mxu1 %v11650_v55  ;;  %v5795_v55 = vshrl.u32 %v13283_v49, 16  ;;  %v5774_v49 = vor.u32 %v5773_v58, %v13560_v43  ;;  %v5717_v2 = vrot.slane %v5716_v26, 4  ;;  %v5727_v42 = vrot.slane %v5726_v45, 4 }
 0x450   : > { %10760 = vmatprep.subr.bf16.mxu1 %v13544_v20  ;;  %v5751_v48 = vrot.slane %v5750_v24, 4  ;;  %v5708_v63 = vsel %vm12520_vm2, %v5703_v28, %v13546_v40  ;;  %v5731_v5 = vrot.slane %v5729_v18, 5  ;;  %v5755_v46 = vrot.slane %v5753_v50, 5 }
 0x451   : > { %v5797_v16 = vrot.slane %v5795_v55, 4  ;;  %v5764_v7 = vor.u32 %v5763_v59, %v5760_v52  ;;  %v5741_v13 = vrot.slane %v5740_v32, 4  ;;  %v5775_v58 = vrot.slane %v5774_v49, 4  ;;  %v11645_v55 = vld [vmem:[#allocation2 + $0x9c] sm:$0xff]  }
 0x452   : > { %10697 = vmatmul.mubr.bf16.gmra.mrb[16].mxu1 %v11640_v9  ;;  %v5784_v9 = vrot.slane %v5782_v0, 4  ;;  %v5815_v41 = vshll.u32 %v13296_v19, 16  ;;  %v5808_v45 = vrot.slane %v5806_v57, 4  ;;  %v5811_v24 = vrot.slane %v5809_v34, 5  ;;  %v13606_v34 = vld [vmem:[#allocation2 + $0x1c] sm:$0xf] }
 0x453   : > { %10700 = vmatprep.mubr.bf16.mxu1 %v11642_v4  ;;  %v5777_v4 = vshll.u32 %v13281_v25, 16  ;;  %v5798_v26 = vor.u32 %v5797_v16, %v13575_v37  ;;  %v5819_v25 = vshrl.u32 %v13296_v19, 16  ;;  %v5722_v40 = vsel %vm12520_vm2, %v5717_v2, %v13555_v54  ;;  %14608 = vst [vmem:[#allocation30_spill] sm:$0xff] %v13606_v34  ;;  %v11646_v2 = vld [vmem:[#allocation2 + $0xa8] sm:$0xff]  }
 0x454   : > { %v5788_v0 = vor.u32 %v5787_v35, %v5784_v9  ;;  %v5732_v18 = vsel %vm12520_vm2, %v5727_v42, %v5731_v5  ;;  %v5756_v35 = vsel %vm12520_vm2, %v5751_v48, %v5755_v46  ;;  %v5765_v28 = vrot.slane %v5764_v7, 4  ;;  %v13615_v5 = vld [vmem:[#allocation2 + $0x20] sm:$0x1]  ;;  %v11648_v46 = vld [vmem:[#allocation2 + $0xb4] sm:$0xff]  }
 0x455   : > { %v5779_v30 = vrot.slane %v5777_v4, 5  ;;  %v5801_v50 = vshll.u32 %v13285_v15, 16  ;;  %v5830_v52 = vshrl.u32 %v5613_v22, 16  ;;  %v5833_v59 = vshll.u32 %v5613_v22, 16  ;;  %14609 = vst [vmem:[#allocation31_spill] sm:$0xff] %v13615_v5 }
 0x456   : > { %v5746_v19 = vsel %vm12520_vm2, %v5741_v13, %v13557_v10  ;;  %v13597_v32 = vrot.slane %v5788_v0, 4  ;;  %v13599_v49 = vrot.slane %v5815_v41, 5  ;;  %v13601_v9 = vrot.slane %v5798_v26, 4  ;;  %v13635_v22 = vld [vmem:[#allocation2 + $0x28] sm:$0xf] }
 0x457   : > { %v5780_v54 = vsel %vm12520_vm2, %v5775_v58, %v5779_v30  ;;  %v5812_v16 = vor.u32 %v5811_v24, %v5808_v45  ;;  %v13603_v57 = vrot.slane %v5819_v25, 4  ;;  %v5839_v15 = vshll.u32 %v13318_v17, 16  ;;  %14610 = vst [vmem:[#allocation32_spill] sm:$0xff] %v13635_v22 }
 0x458   : > { %v13608_v42 = vcombine.low %v5698_v14, %v5708_v63  ;;  %v13610_v10 = vcombine.low %v5722_v40, %v5732_v18  ;;  %v13612_v48 = vcombine.low %v5746_v19, %v5756_v35  ;;  %v5843_v4 = vshrl.u32 %v13318_v17, 16  ;;  %v13626_v14 = vld [vmem:[#allocation2 + $0x78] sm:$0xf]  ;;  %v13650_v40 = vld [vmem:[#allocation2 + $0x2c] sm:$0x1] }
 0x459   : > { %v5770_v7 = vsel %vm12520_vm2, %v5765_v28, %v13560_v43  ;;  %v13622_v13 = vrot.slane %v5830_v52, 4  ;;  %v13624_v58 = vrot.slane %v5833_v59, 5  ;;  %v7982_v63 = vld [vmem:[#allocation2 + $0x18] sm:$0xe]  ;;  %v13637_v43 = vld [vmem:[#allocation2 + $0x34] sm:$0xf] }
 0x45a   : > { %10701 = vmatmul.mubr.bf16.gmra.mrb[20].mxu1 %v11643_v21  ;;  %v13620_v21 = vrot.slane %v5801_v50, 5  ;;  %v13628_v0 = vcombine.low %v5770_v7, %v5780_v54  ;;  %14611 = vst [vmem:[#allocation33_spill] sm:$0xff] %v13637_v43  ;;  %v13644_v45 = vrot.slane %v5812_v16, 4  ;;  %v13648_v25 = vrot.slane %v5839_v15, 5  ;;  %14612 = vst [vmem:[#allocation34_spill] sm:$0xff] %v13650_v40 }
 0x45b   : > { %10704 = vmatprep.mubr.bf16.mxu1 %v11645_v55  ;;  %v8048_v55 = vrot.slane %v13606_v34, 5  ;;  %v13652_v18 = vld [vmem:[#allocation2 + $0x38] sm:$0x1]  ;;  %v13654_v35 = vrot.slane %v5843_v4, 4  ;;  %v9528_v30 = vrot.slane %v7982_v63, 9  ;;  %v8051_v50 = vrot.slane %v13615_v5, 5 }
 0x45c   : > { %14613 = vst [vmem:[#allocation35_spill] sm:$0xff] %v13652_v18  ;;  %v7983_v52 = vld [vmem:[#allocation2 + $0x24] sm:$0xe]  ;;  %v5863_v54 = vshll.u32 %v13342_v12, 16  ;;  %v8055_v16 = vrot.slane %v13635_v22, 5  ;;  %v8062_v19 = vrot.slane %v13637_v43, 5 }
 0x45d   : > { %v8050_v28 = vrot.slane %v8048_v55, 4  ;;  %v7984_v15 = vld [vmem:[#allocation2 + $0x30] sm:$0xe]  ;;  %v13663_v4 = vld [vmem:[#allocation2 + $0x40] sm:$0xf]  ;;  %v13669_v63 = vsel %vm13039_vm13, %v9528_v30, %v8048_v55  ;;  %v9529_v59 = vrot.slane %v7983_v52, 9 }
 0x45e   : > { %14614 = vst [vmem:[#allocation36_spill] sm:$0xff] %v13663_v4  ;;  %v13665_v7 = vld [vmem:[#allocation2 + $0x44] sm:$0x1]  ;;  %14616 = vst [vmem:[#allocation38_spill] sm:$0xff] %v13669_v63  ;;  %v13677_v17 = vld [vmem:[#allocation2 + $0x4c] sm:$0xf] }
 0x45f   : > { %14615 = vst [vmem:[#allocation37_spill] sm:$0xff] %v13665_v7  ;;  %14618 = vst [vmem:[#allocation40_spill] sm:$0xff] %v13677_v17  ;;  %v8058_v24 = vrot.slane %v13650_v40, 5  ;;  %v7242_v5 = vld [vmem:[#allocation2 + $0x50] sm:$0x1]  ;;  %v8057_v22 = vrot.slane %v8055_v16, 4  ;;  %v13690_v26 = vsel %vm13039_vm13, %v9529_v59, %v8055_v16 }
 0x460   : > { %v13682_v55 = vld [vmem:[#allocation2 + $0x58] sm:$0xf]  ;;  %v7247_v30 = vld [vmem:[#allocation2 + $0x64] sm:$0xf]  ;;  %v8065_v43 = vrot.slane %v13652_v18, 5  ;;  %v13685_v34 = vrot.slane %v5863_v54, 5 }
 0x461   : > { %14619 = vst [vmem:[#allocation41_spill] sm:$0xff] %v13682_v55  ;;  %14620 = vst [vmem:[#allocation42_spill] sm:$0xff] %v13690_v26  ;;  %v8069_v52 = vrot.slane %v13663_v4, 5  ;;  %v11649_v63 = vld [vmem:[#allocation2 + $0xc0] sm:$0xff]   ;;  %v7248_v40 = vld [vmem:[#allocation2 + $0x68] sm:$0x1]  ;;  %v13695_v44 = vsel %vm13039_vm13, %v8057_v22, %v8058_v24 }
 0x462   : > { %10705 = vmatmul.mubr.bf16.gmra.mrb[24].mxu1 %v11646_v2  ;;  %v7985_v2 = vld [vmem:[#allocation2 + $0x3c] sm:$0xe]  ;;  %14621 = vst [vmem:[#allocation43_spill] sm:$0xff] %v13695_v44  ;;  %v7987_v59 = vld [vmem:[#allocation2 + $0x54] sm:$0xe]  ;;  %v8072_v24 = vrot.slane %v13665_v7, 5 }
 0x463   : > { %10708 = vmatprep.mubr.bf16.mxu1 %v11648_v46  ;;  %v13673_v46 = vsel %vm13039_vm13, %v8050_v28, %v8051_v50  ;;  %v9530_v28 = vrot.slane %v7984_v15, 9  ;;  %v8064_v50 = vrot.slane %v8062_v19, 4  ;;  %v9531_v41 = vrot.slane %v7985_v2, 9  ;;  %v13705_v16 = vld [vmem:[#allocation2 + $0x5c] sm:$0x1] }
 0x464   : > { %14617 = vst [vmem:[#allocation39_spill] sm:$0xff] %v13673_v46  ;;  %v7986_v46 = vld [vmem:[#allocation2 + $0x48] sm:$0xe]  ;;  %v8071_v22 = vrot.slane %v8069_v52, 4  ;;  %v7251_v18 = vld [vmem:[#allocation2 + $0x74] sm:$0x1] }
 0x465   : > { %v13699_v15 = vsel %vm13039_vm13, %v9530_v28, %v8062_v19  ;;  %v13703_v54 = vsel %vm13039_vm13, %v8064_v50, %v8065_v43  ;;  %v13712_v19 = vld [vmem:[#allocation2 + $0x70] sm:$0xf]  ;;  %v13716_v43 = vsel %vm13039_vm13, %v9531_v41, %v8069_v52  ;;  %v9532_v2 = vrot.slane %v7986_v46, 9  ;;  %v7253_v44 = vld [vmem:[#allocation2 + $0x7c] sm:$0xf] }
 0x466   : > { %14622 = vst [vmem:[#allocation44_spill] sm:$0xff] %v13699_v15  ;;  %14623 = vst [vmem:[#allocation45_spill] sm:$0xff] %v13703_v54  ;;  %v8076_v28 = vrot.slane %v13677_v17, 5  ;;  %v8083_v50 = vrot.slane %v13682_v55, 5  ;;  %v13723_v4 = vsel %vm13039_vm13, %v8071_v22, %v8072_v24  ;;  %v8079_v54 = vrot.slane %v7242_v5, 5 }
 0x467   : > { %14624 = vst [vmem:[#allocation46_spill] sm:$0xff] %v13712_v19  ;;  %14625 = vst [vmem:[#allocation47_spill] sm:$0xff] %v13716_v43  ;;  %v8090_v15 = vrot.slane %v7247_v30, 5  ;;  %v8086_v46 = vrot.slane %v13705_v16, 5  ;;  %v9534_v26 = vrot.slane %v7988_v39, 9  ;;  %v8093_v5 = vrot.slane %v7248_v40, 5 }
 0x468   : > { %14626 = vst [vmem:[#allocation48_spill] sm:$0xff] %v13723_v4  ;;  %v8078_v52 = vrot.slane %v8076_v28, 4  ;;  %v7989_v7 = vld [vmem:[#allocation2 + $0x6c] sm:$0xe]  ;;  %v7254_v55 = vld [vmem:[#allocation2 + $0x80] sm:$0x1] }
 0x469   : > { %v7259_v17 = vld [vmem:[#allocation2 + $0x94] sm:$0xf]  ;;  %v8085_v22 = vrot.slane %v8083_v50, 4  ;;  %v8092_v24 = vrot.slane %v8090_v15, 4  ;;  %v13742_v39 = vsel %vm13039_vm13, %v9534_v26, %v8090_v15  ;;  %v8097_v4 = vrot.slane %v13712_v19, 5  ;;  %v11652_v26 = vld [vmem:[%s14493_s2 + $0x148] sm:$0xff]  }
 0x46a   : > { %10709 = vmatmul.mubr.bf16.gmra.mrb[28].mxu1 %v11649_v63  ;;  %v9533_v63 = vrot.slane %v7987_v59, 9  ;;  %v7256_v59 = vld [vmem:[#allocation2 + $0x88] sm:$0xf]  ;;  %v13734_v30 = vsel %vm13039_vm13, %v8078_v52, %v8079_v54  ;;  %14629 = vst [vmem:[#allocation51_spill] sm:$0xff] %v13742_v39  ;;  %v7262_v19 = vld [vmem:[#allocation2 + $0xa0] sm:$0xf] }
 0x46b   : > { %10728 = vmatprep.mubr.bf16.mxu1 %v13536_v29  ;;  %v13730_v29 = vsel %vm13039_vm13, %v9532_v2, %v8076_v28  ;;  %14628 = vst [vmem:[#allocation50_spill] sm:$0xff] %v13734_v30  ;;  %v7990_v2 = vld [vmem:[#allocation2 + $0x78] sm:$0xe]  ;;  %v7257_v28 = vld [vmem:[#allocation2 + $0x8c] sm:$0x1]  ;;  %v13749_v43 = vsel %vm13039_vm13, %v8085_v22, %v8086_v46  ;;  %v13753_v54 = vsel %vm13039_vm13, %v8092_v24, %v8093_v5  ;;  %v8099_v40 = vrot.slane %v8097_v4, 4 }
 0x46c   : > { %14627 = vst [vmem:[#allocation49_spill] sm:$0xff] %v13730_v29  ;;  %v13738_v41 = vsel %vm13039_vm13, %v9533_v63, %v8083_v50  ;;  %14630 = vst [vmem:[#allocation52_spill] sm:$0xff] %v13749_v43  ;;  %v9535_v50 = vrot.slane %v7989_v7, 9  ;;  %v7991_v63 = vld [vmem:[#allocation2 + $0x84] sm:$0xe]  ;;  %v8100_v30 = vrot.slane %v7251_v18, 5 }
 0x46d   : > { %14631 = vst [vmem:[#allocation53_spill] sm:$0xff] %v13753_v54  ;;  %v7992_v46 = vld [vmem:[#allocation2 + $0x90] sm:$0xe]  ;;  %v7260_v22 = vld [vmem:[#allocation2 + $0x98] sm:$0x1]  ;;  %v9536_v7 = vrot.slane %v7990_v2, 9 }
 0x46e   : > { %v13764_v24 = vsel %vm13039_vm13, %v9535_v50, %v8097_v4  ;;  %v8104_v5 = vrot.slane %v7253_v44, 5  ;;  %v8111_v29 = vrot.slane %v7256_v59, 5  ;;  %v13769_v15 = vsel %vm13039_vm13, %v8099_v40, %v8100_v30  ;;  %v7265_v18 = vld [vmem:[#allocation2 + $0xac] sm:$0xf]  ;;  %v11653_v30 = vld [vmem:[%s14493_s2 + $0x150] sm:$0xff]  }
 0x46f   : > { %14632 = vst [vmem:[#allocation54_spill] sm:$0xff] %v13764_v24  ;;  %14633 = vst [vmem:[#allocation55_spill] sm:$0xff] %v13769_v15  ;;  %v8107_v43 = vrot.slane %v7254_v55, 5  ;;  %v9537_v52 = vrot.slane %v7991_v63, 9  ;;  %v8118_v54 = vrot.slane %v7259_v17, 5  ;;  %v8114_v59 = vrot.slane %v7257_v28, 5 }
 0x470   : > { %v8106_v44 = vrot.slane %v8104_v5, 4  ;;  %v9538_v2 = vrot.slane %v7992_v46, 9  ;;  %v7263_v55 = vld [vmem:[#allocation2 + $0xa4] sm:$0x1]  ;;  %v7266_v40 = vld [vmem:[#allocation2 + $0xb0] sm:$0x1] }
 0x471   : > { %v8120_v17 = vrot.slane %v8118_v54, 4  ;;  %v8121_v50 = vrot.slane %v7260_v22, 5  ;;  %v7268_v63 = vld [vmem:[#allocation2 + $0xb8] sm:$0xf]  ;;  %v13788_v46 = vsel %vm13039_vm13, %v9537_v52, %v8111_v29  ;;  %v8125_v15 = vrot.slane %v7262_v19, 5 }
 0x472   : > { %10729 = vmatmul.mubr.bf16.vlgmr.msra.gmra.mrb[0].mxu1 %v13562_v60  ;;  %v7993_v60 = vld [vmem:[#allocation2 + $0x9c] sm:$0xe]  ;;  %v13784_v28 = vsel %vm13039_vm13, %v8106_v44, %v8107_v43  ;;  %v13792_v4 = vsel %vm13039_vm13, %v9538_v2, %v8118_v54  ;;  %v7994_v24 = vld [vmem:[#allocation2 + $0xa8] sm:$0xe]  ;;  %v7272_v52 = vld [vmem:[#allocation2 + $0xc8] sm:$0x1] }
 0x473   : > { %10732 = vmatprep.mubr.bf16.mxu1 %v13608_v42  ;;  %10761 = vmatpush3.bf16.msra.mxu1 %v13544_v20  ;;  %v13780_v42 = vsel %vm13039_vm13, %v9536_v7, %v8104_v5  ;;  %v8113_v20 = vrot.slane %v8111_v29, 4  ;;  %14634 = vst [vmem:[#allocation56_spill] sm:$0xff] %v13792_v4  ;;  %v7269_v7 = vld [vmem:[#allocation2 + $0xbc] sm:$0x1]  ;;  %v7271_v5 = vld [vmem:[#allocation2 + $0xc4] sm:$0xf]  ;;  %v13802_v43 = vsel %vm13039_vm13, %v8120_v17, %v8121_v50 }
 0x474   : > { %10762 = vmatprep.subr.bf16.mxu1 %v11652_v26  ;;  %14636 = vst [vmem:[#allocation58_spill] sm:$0xff] %v13802_v43  ;;  %v9539_v29 = vrot.slane %v7993_v60, 9  ;;  %v8127_v44 = vrot.slane %v8125_v15, 4  ;;  %v8128_v2 = vrot.slane %v7263_v55, 5  ;;  %v7995_v22 = vld [vmem:[#allocation2 + $0xb4] sm:$0xe] }
 0x475   : > { %v13798_v39 = vsel %vm13039_vm13, %v8113_v20, %v8114_v59  ;;  %v11654_v59 = vld [vmem:[%s14493_s2 + $0x158] sm:$0xff]   ;;  %v5846_v20 = vor.u32 %v13654_v35, %v13648_v25  ;;  %v9540_v60 = vrot.slane %v7994_v24, 9  ;;  %v8139_v17 = vrot.slane %v7268_v63, 5  ;;  %v7996_v50 = vld [vmem:[#allocation2 + $0xc0] sm:$0xe]  ;;  %v14707_v38 = vld [vmem:[#allocation49_spill] sm:$0xff] }
 0x476   : > { %14635 = vst [vmem:[#allocation57_spill] sm:$0xff] %v13798_v39  ;;  %v13815_v19 = vsel %vm13039_vm13, %v9539_v29, %v8125_v15  ;;  %v13819_v55 = vsel %vm13039_vm13, %v8127_v44, %v8128_v2  ;;  %v8135_v54 = vrot.slane %v7266_v40, 5  ;;  %v8146_v43 = vrot.slane %v7271_v5, 5  ;;  %v5619_v5 = vld [vmem:[#allocation2 + $0x84] sm:$0xf] }
 0x477   : > { %10763 = vmatpush3.bf16.msra.mxu1 %v11652_v26  ;;  %v8132_v26 = vrot.slane %v7265_v18, 5  ;;  %v9571_v4 = vcombine.low %v13815_v19, %v13819_v55  ;;  %v9541_v24 = vrot.slane %v7995_v22, 9  ;;  %v8142_v18 = vrot.slane %v7269_v7, 5 }
 0x478   : > { %10764 = vmatprep.subr.bf16.mxu1 %v11653_v30  ;;  %v8141_v63 = vrot.slane %v8139_v17, 4  ;;  %v9542_v15 = vrot.slane %v7996_v50, 9  ;;  %v8148_v29 = vrot.slane %v8146_v43, 4  ;;  %v8149_v39 = vrot.slane %v7272_v52, 5 }
 0x479   : > { %v8134_v35 = vrot.slane %v8132_v26, 4  ;;  %v14637_v44 = vshrl.u32 %v13342_v12, 16  ;;  %v13832_v22 = vsel %vm13039_vm13, %v9540_v60, %v8132_v26  ;;  %v5891_v60 = vshrl.u32 %v13356_v6, 16 }
 0x47a   : > { %10733 = vmatmul.mubr.bf16.gmra.mrb[4].mxu1 %v13610_v10  ;;  %v11655_v10 = vld [vmem:[%s14493_s2 + $0x160] sm:$0xff]   ;;  %v13846_v7 = vsel %vm13039_vm13, %v8141_v63, %v8142_v18  ;;  %v13850_v52 = vsel %vm13039_vm13, %v9542_v15, %v8146_v43  ;;  %v13854_v2 = vsel %vm13039_vm13, %v8148_v29, %v8149_v39  ;;  %v14638_v50 = vshrl.u32 %v13626_v14, 16 }
 0x47b   : > { %10736 = vmatprep.mubr.bf16.mxu1 %v13612_v48  ;;  %10765 = vmatpush3.bf16.msra.mxu1 %v11653_v30  ;;  %v5869_v40 = vrot.slane %v14637_v44, 4  ;;  %v13836_v48 = vsel %vm13039_vm13, %v8134_v35, %v8135_v54  ;;  %v13840_v30 = vsel %vm13039_vm13, %v9541_v24, %v8139_v17  ;;  %v5887_v54 = vshll.u32 %v13356_v6, 16 }
 0x47c   : > { %10766 = vmatprep.subr.bf16.mxu1 %v11654_v59  ;;  %v9572_v12 = vcombine.low %v13832_v22, %v13836_v48  ;;  %v9573_v26 = vcombine.low %v13840_v30, %v13846_v7  ;;  %v5856_v35 = vrot.slane %v14638_v50, 4  ;;  %v14639_v43 = vshll.u32 %v13626_v14, 16  ;;  %v9586_v22 = vld [vmem:[%s11913_s23 + $0x31] sm:$0xff]  ;;  %v9584_v7 = vld [vmem:[%s11913_s23 + $0x19] sm:$0xff] }
 0x47d   : > { %v5878_v18 = vshrl.u32 %v5619_v5, 16  ;;  %v5881_v39 = vshll.u32 %v5619_v5, 16  ;;  %v14640_v63 = vor.u32 %v13603_v57, %v13599_v49  ;;  %v14641_v6 = vor.u32 %v13624_v58, %v13622_v13 }
 0x47e   : > { %v5859_v24 = vrot.slane %v14639_v43, 5  ;;  %v5847_v44 = vrot.slane %v5846_v20, 4  ;;  %v5870_v17 = vor.u32 %v5869_v40, %v13685_v34  ;;  %v14642_v14 = vsel %vm12520_vm2, %v13601_v9, %v13620_v21  ;;  %v5622_v9 = vld [vmem:[#allocation2 + $0x90] sm:$0xf] }
 0x47f   : > { %10767 = vmatpush3.bf16.msra.mxu1 %v11654_v59  ;;  %v5823_v15 = vrot.slane %v14640_v63, 4  ;;  %v5837_v29 = vrot.slane %v14641_v6, 4  ;;  %v11656_v59 = vld [vmem:[%s14493_s2 + $0x168] sm:$0xff]   ;;  %v14643_v57 = vsel %vm12520_vm2, %v13597_v32, %v13575_v37  ;;  %v14644_v58 = vshll.u32 %v13305_v62, 16 }
 0x480   : > { %10768 = vmatprep.subr.bf16.mxu1 %v11655_v10  ;;  %v9374_v13 = vcombine.low %v14643_v57, %v14642_v14  ;;  %v14645_v40 = vshll.u32 %v13320_v8, 16  ;;  %v5873_v50 = vshll.u32 %v13354_v31, 16  ;;  %v13892_v43 = vrot.slane %v5887_v54, 5 }
 0x481   : > { %v5827_v20 = vrot.slane %v14644_v58, 5  ;;  %v5893_v63 = vrot.slane %v5891_v60, 4  ;;  %v5818_v37 = vsel %vm12520_vm2, %v13644_v45, %v13599_v49  ;;  %v5860_v32 = vor.u32 %v5859_v24, %v5856_v35  ;;  %v11657_v49 = vld [vmem:[%s14493_s2 + $0x170] sm:$0xff]   ;;  %v5625_v24 = vld [vmem:[#allocation2 + $0x9c] sm:$0xf] }
 0x482   : > { %10737 = vmatmul.mubr.bf16.gmra.mrb[8].mxu1 %v13628_v0  ;;  %v5851_v5 = vrot.slane %v14645_v40, 5  ;;  %v5880_v62 = vrot.slane %v5878_v18, 4  ;;  %v5883_v21 = vrot.slane %v5881_v39, 5  ;;  %v5842_v31 = vsel %vm12520_vm2, %v5837_v29, %v13648_v25  ;;  %v11658_v58 = vld [vmem:[%s14493_s2 + $0x178] sm:$0xff]  }
 0x483   : > { %10740 = vmatprep.mubr.bf16.mxu1 %v9374_v13  ;;  %10769 = vmatpush3.bf16.msra.mxu1 %v11655_v10  ;;  %v5828_v8 = vsel %vm12520_vm2, %v5823_v15, %v5827_v20  ;;  %v5871_v54 = vrot.slane %v5870_v17, 4  ;;  %v5902_v45 = vshrl.u32 %v5622_v9, 16  ;;  %v5905_v60 = vshll.u32 %v5622_v9, 16 }
 0x484   : > { %v5852_v0 = vsel %vm12520_vm2, %v5847_v44, %v5851_v5  ;;  %10770 = vmatprep.subr.bf16.mxu1 %v11656_v59  ;;  %v5911_v10 = vshll.u32 %v13365_v27, 16  ;;  %v5915_v35 = vshrl.u32 %v13365_v27, 16  ;;  %v5875_v18 = vrot.slane %v5873_v50, 5 }
 0x485   : > { %v5894_v39 = vor.u32 %v5893_v63, %v13892_v43  ;;  %v5935_v25 = vshll.u32 %v13386_v23, 16  ;;  %v5939_v15 = vshrl.u32 %v13386_v23, 16  ;;  %v9375_v17 = vcombine.low %v5818_v37, %v5828_v8  ;;  %v5628_v8 = vld [vmem:[#allocation2 + $0xa8] sm:$0xf] }
 0x486   : > { %v9376_v6 = vcombine.low %v5842_v31, %v5852_v0  ;;  %v5861_v29 = vrot.slane %v5860_v32, 4  ;;  %v5884_v44 = vor.u32 %v5883_v21, %v5880_v62  ;;  %v5876_v14 = vsel %vm12520_vm2, %v5871_v54, %v5875_v18  ;;  %v13929_v31 = vld [vmem:[%s14493_s2 + $0x180] sm:$0xff]  }
 0x487   : > { %10771 = vmatpush3.bf16.msra.mxu1 %v11656_v59  ;;  %v5897_v57 = vshll.u32 %v13374_v3, 16  ;;  %v5926_v13 = vshrl.u32 %v5625_v24, 16  ;;  %v5929_v27 = vshll.u32 %v5625_v24, 16  ;;  %v5904_v20 = vrot.slane %v5902_v45, 4 }
 0x488   : > { %10772 = vmatprep.subr.bf16.mxu1 %v11657_v49  ;;  %v5907_v40 = vrot.slane %v5905_v60, 5  ;;  %v13919_v23 = vrot.slane %v5911_v10, 5  ;;  %v5917_v5 = vrot.slane %v5915_v35, 4  ;;  %v5895_v50 = vrot.slane %v5894_v39, 4  ;;  %v5631_v60 = vld [vmem:[#allocation2 + $0xb4] sm:$0xf] }
 0x489   : > { %v13921_v59 = vrot.slane %v5935_v25, 5  ;;  %v5941_v63 = vrot.slane %v5939_v15, 4  ;;  %v5866_v3 = vsel %vm12520_vm2, %v5861_v29, %v13685_v34  ;;  %v5885_v9 = vrot.slane %v5884_v44, 4  ;;  %v11717_v39 = vld [vmem:[#allocation2 + $0x98] sm:$0x1] }
 0x48a   : > { %10741 = vmatmul.mubr.bf16.gmra.mrb[12].mxu1 %v9375_v17  ;;  %v9377_v37 = vcombine.low %v5866_v3, %v5876_v14  ;;  %v5899_v32 = vrot.slane %v5897_v57, 5  ;;  %v5928_v62 = vrot.slane %v5926_v13, 4  ;;  %v5931_v21 = vrot.slane %v5929_v27, 5 }
 0x48b   : > { %10744 = vmatprep.mubr.bf16.mxu1 %v9376_v6  ;;  %10773 = vmatpush3.bf16.msra.mxu1 %v11657_v49  ;;  %v5908_v0 = vor.u32 %v5907_v40, %v5904_v20  ;;  %v5918_v54 = vor.u32 %v5917_v5, %v13919_v23  ;;  %v5959_v45 = vshll.u32 %v13405_v36, 16  ;;  %v5963_v34 = vshrl.u32 %v13405_v36, 16  ;;  %v11718_v6 = vld [vmem:[#allocation2 + $0xa4] sm:$0x1] }
 0x48c   : > { %10774 = vmatprep.subr.bf16.mxu1 %v11658_v58  ;;  %v5900_v49 = vsel %vm12520_vm2, %v5895_v50, %v5899_v32  ;;  %v5942_v10 = vor.u32 %v5941_v63, %v13921_v59  ;;  %v5983_v35 = vshll.u32 %v13420_v53, 16  ;;  %v5987_v24 = vshrl.u32 %v13420_v53, 16 }
 0x48d   : > { %v5890_v18 = vsel %vm12520_vm2, %v5885_v9, %v13892_v43  ;;  %v5921_v25 = vshll.u32 %v11717_v39, 16  ;;  %v5950_v15 = vshrl.u32 %v5628_v8, 16  ;;  %v5953_v17 = vshll.u32 %v5628_v8, 16 }
 0x48e   : > { %v5932_v36 = vor.u32 %v5931_v21, %v5928_v62  ;;  %v5945_v29 = vshll.u32 %v11718_v6, 16  ;;  %v5974_v44 = vshrl.u32 %v5631_v60, 16  ;;  %v5977_v14 = vshll.u32 %v5631_v60, 16  ;;  %v5634_v21 = vld [vmem:[#allocation2 + $0xc0] sm:$0xf] }
 0x48f   : > { %10775 = vmatpush3.bf16.msra.mxu1 %v11658_v58  ;;  %v9378_v57 = vcombine.low %v5890_v18, %v5900_v49  ;;  %v5919_v13 = vrot.slane %v5918_v54, 4  ;;  %v5961_v27 = vrot.slane %v5959_v45, 5  ;;  %v5965_v53 = vrot.slane %v5963_v34, 4  ;;  %v11719_v45 = vld [vmem:[#allocation2 + $0xc4] sm:$0xf] }
 0x490   : > { %10808 = vmatprep.subr.bf16.mxu1 %v13929_v31  ;;  %v5909_v20 = vrot.slane %v5908_v0, 4  ;;  %v5943_v40 = vrot.slane %v5942_v10, 4  ;;  %v5985_v43 = vrot.slane %v5983_v35, 5  ;;  %v5989_v5 = vrot.slane %v5987_v24, 4  ;;  %v11720_v35 = vld [vmem:[#allocation2 + $0xb0] sm:$0x1] }
 0x491   : > { %v5923_v50 = vrot.slane %v5921_v25, 5  ;;  %v5952_v63 = vrot.slane %v5950_v15, 4  ;;  %v5955_v58 = vrot.slane %v5953_v17, 5  ;;  %v5933_v3 = vrot.slane %v5932_v36, 4  ;;  %v11721_v36 = vld [vmem:[#allocation2 + $0xbc] sm:$0x1] }
 0x492   : > { %10745 = vmatmul.mubr.bf16.gmra.mrb[16].mxu1 %v9377_v37  ;;  %v5947_v9 = vrot.slane %v5945_v29, 5  ;;  %v5976_v32 = vrot.slane %v5974_v44, 4  ;;  %v5979_v62 = vrot.slane %v5977_v14, 5  ;;  %v5966_v54 = vor.u32 %v5965_v53, %v5961_v27 }
 0x493   : > { %10748 = vmatprep.mubr.bf16.mxu1 %v9378_v57  ;;  %v5924_v8 = vsel %vm12520_vm2, %v5919_v13, %v5923_v50  ;;  %v6007_v34 = vshll.u32 %v11719_v45, 16  ;;  %v6011_v37 = vshrl.u32 %v11719_v45, 16  ;;  %v5914_v0 = vsel %vm12520_vm2, %v5909_v20, %v13919_v23 }
 0x494   : > { %v5948_v60 = vsel %vm12520_vm2, %v5943_v40, %v5947_v9  ;;  %v5990_v49 = vor.u32 %v5989_v5, %v5985_v43  ;;  %v5956_v10 = vor.u32 %v5955_v58, %v5952_v63  ;;  %v5969_v24 = vshll.u32 %v11720_v35, 16 }
 0x495   : > { %v5998_v18 = vshrl.u32 %v5634_v21, 16  ;;  %v6001_v39 = vshll.u32 %v5634_v21, 16  ;;  %v9379_v25 = vcombine.low %v5914_v0, %v5924_v8  ;;  %v5938_v15 = vsel %vm12520_vm2, %v5933_v3, %v13921_v59  ;;  %v11722_v3 = vld [vmem:[#allocation2 + $0x10] sm:$0xf]  ;;  %v11723_v21 = vld [vmem:[#allocation2 + $0xc8] sm:$0x1] }
 0x496   : > { %v5980_v17 = vor.u32 %v5979_v62, %v5976_v32  ;;  %v5993_v6 = vshll.u32 %v11721_v36, 16  ;;  %v9380_v29 = vcombine.low %v5938_v15, %v5948_v60  ;;  %v5967_v44 = vrot.slane %v5966_v54, 4 }
 0x497   : > { %v6009_v23 = vrot.slane %v6007_v34, 5  ;;  %v6013_v14 = vrot.slane %v6011_v37, 4  ;;  %v5991_v57 = vrot.slane %v5990_v49, 4  ;;  %v5957_v13 = vrot.slane %v5956_v10, 4  ;;  %v6343_v10 = vld [vmem:[#allocation2 + $0xc] sm:$0xe] }
 0x498   : > { %v5971_v53 = vrot.slane %v5969_v24, 5  ;;  %v6000_v20 = vrot.slane %v5998_v18, 4  ;;  %v6003_v40 = vrot.slane %v6001_v39, 5  ;;  %v5981_v5 = vrot.slane %v5980_v17, 4  ;;  %v11724_v24 = vld [vmem:[#allocation2 + $0x1c] sm:$0xf] }
 0x499   : > { %v5995_v50 = vrot.slane %v5993_v6, 5  ;;  %v6014_v59 = vor.u32 %v6013_v14, %v6009_v23  ;;  %v6409_v9 = vrot.slane %v11722_v3, 5  ;;  %v5962_v32 = vsel %vm12520_vm2, %v5957_v13, %v5961_v27 }
 0x49a   : > { %10749 = vmatmul.mubr.bf16.gmra.mrb[20].mxu1 %v9379_v25  ;;  %v5972_v63 = vsel %vm12520_vm2, %v5967_v44, %v5971_v53  ;;  %v6004_v62 = vor.u32 %v6003_v40, %v6000_v20  ;;  %v6017_v8 = vshll.u32 %v11723_v21, 16  ;;  %v5986_v45 = vsel %vm12520_vm2, %v5981_v5, %v5985_v43  ;;  %v11662_v20 = vld [vmem:[%s14493_s2 + $0x198] sm:$0xff]   ;;  %v14658_v21 = vld [vmem:[#allocation13_spill] sm:$0xff] }
 0x49b   : > { %10752 = vmatprep.mubr.bf16.mxu1 %v9380_v29  ;;  %v5996_v58 = vsel %vm12520_vm2, %v5991_v57, %v5995_v50  ;;  %v9381_v54 = vcombine.low %v5962_v32, %v5972_v63  ;;  %v6015_v37 = vrot.slane %v6014_v59, 4  ;;  %v6411_v0 = vrot.slane %v6409_v9, 4  ;;  %v14648_v5 = vld [vmem:[#allocation6_spill] sm:$0xff]  ;;  %v11664_v50 = vld [vmem:[%s14493_s2 + $0x1a8] sm:$0xff]   ;;  %v14651_v63 = vld [vmem:[#allocation7_spill] sm:$0xff] }
 0x49c   : > { %v9382_v34 = vcombine.low %v5986_v45, %v5996_v58  ;;  %v6005_v60 = vrot.slane %v6004_v62, 4  ;;  %v6019_v49 = vrot.slane %v6017_v8, 5  ;;  %v6412_v35 = vrot.slane %v13505_v33, 5  ;;  %v6344_v33 = vld [vmem:[#allocation2 + $0x18] sm:$0xe]  ;;  %v14652_v59 = vld [vmem:[#allocation9_spill] sm:$0xff] }
 0x49d   : > { %v6416_v18 = vrot.slane %v11724_v24, 5  ;;  %v9392_v39 = vrot.slane %v6343_v10, 9  ;;  %v6419_v29 = vrot.slane %v13510_v56, 5  ;;  %v9393_v44 = vrot.slane %v6344_v33, 9  ;;  %v11661_v56 = vld [vmem:[%s14493_s2 + $0x190] sm:$0xff]   ;;  %v14655_v58 = vld [vmem:[#allocation11_spill] sm:$0xff] }
 0x49e   : > { %v6020_v27 = vsel %vm12520_vm2, %v6015_v37, %v6019_v49  ;;  %v6413_v25 = vsel %vm13039_vm13, %v6411_v0, %v6412_v35  ;;  %v6010_v43 = vsel %vm12520_vm2, %v6005_v60, %v6009_v23  ;;  %v11660_v23 = vld [vmem:[%s14493_s2 + $0x188] sm:$0xff]   ;;  %v14646_v53 = vcombine.low %v13289_v11, %v13293_v61  ;;  %v11666_v32 = vld [vmem:[%s14493_s2 + $0x1b8] sm:$0xff]   ;;  %v11669_v37 = vld [vmem:[%s14493_s2 + $0x1c0] sm:$0xff]  }
 0x49f   : > { %v9383_v15 = vcombine.low %v6010_v43, %v6020_v27  ;;  %v6410_v17 = vsel %vm13039_vm13, %v9392_v39, %v6409_v9  ;;  %v6418_v6 = vrot.slane %v6416_v18, 4  ;;  %v6417_v57 = vsel %vm13039_vm13, %v9393_v44, %v6416_v18  ;;  %v14649_v11 = vld [vmem:[#allocation8_spill] sm:$0xff]  ;;  %v11665_v9 = vld [vmem:[%s14493_s2 + $0x1b0] sm:$0xff]   ;;  %v14663_v0 = vld [vmem:[#allocation15_spill] sm:$0xff] }
 0x4a0   : > { %v9424_v36 = vcombine.low %v6410_v17, %v6413_v25  ;;  %v14647_v40 = vcombine.low %v13302_v51, %v13309_v47  ;;  %v14650_v61 = vcombine.low %v14648_v5, %v14649_v11  ;;  %v14653_v51 = vcombine.low %v14651_v63, %v14652_v59  ;;  %v14654_v47 = vld [vmem:[#allocation10_spill] sm:$0xff]  ;;  %v14657_v62 = vld [vmem:[#allocation12_spill] sm:$0xff]  ;;  %v14664_v60 = vld [vmem:[#allocation17_spill] sm:$0xff] }
 0x4a1   : > { %v6420_v14 = vsel %vm13039_vm13, %v6418_v6, %v6419_v29  ;;  %v14656_v3 = vcombine.low %v14654_v47, %v14655_v58  ;;  %v14659_v8 = vcombine.low %v14657_v62, %v14658_v21  ;;  %v14661_v45 = vld [vmem:[#allocation16_spill] sm:$0xff]  ;;  %v14665_v49 = vcombine.low %v14663_v0, %v14664_v60  ;;  %v14666_v10 = vld [vmem:[#allocation18_spill] sm:$0xff]  ;;  %v14667_v35 = vld [vmem:[#allocation19_spill] sm:$0xff] }
 0x4a2   : > { %10753 = vmatmul.mubr.bf16.gmra.mrb[24].mxu1 %v9381_v54  ;;  %v9425_v13 = vcombine.low %v6417_v57, %v6420_v14  ;;  %v14660_v54 = vld [vmem:[#allocation14_spill] sm:$0xff]  ;;  %v14668_v27 = vcombine.low %v14666_v10, %v14667_v35  ;;  %v14669_v24 = vld [vmem:[#allocation20_spill] sm:$0xff]  ;;  %v14670_v18 = vld [vmem:[#allocation21_spill] sm:$0xff] }
 0x4a3   : > { %10756 = vmatprep.mubr.bf16.mxu1 %v9382_v34  ;;  %v14662_v34 = vcombine.low %v14660_v54, %v14661_v45  ;;  %v14671_v39 = vcombine.low %v14669_v24, %v14670_v18  ;;  %v14672_v25 = vld [vmem:[#allocation22_spill] sm:$0xff]  ;;  %v14673_v43 = vld [vmem:[#allocation24_spill] sm:$0xff]  ;;  %v14675_v17 = vld [vmem:[#allocation23_spill] sm:$0xff] }
 0x4a4   : > { %v14678_v33 = vld [vmem:[#allocation26_spill] sm:$0xff]  ;;  %v14679_v29 = vld [vmem:[#allocation27_spill] sm:$0xff]  ;;  %v14681_v57 = vld [vmem:[#allocation28_spill] sm:$0xff] }
 0x4a5   : > { %v14680_v44 = vcombine.low %v14678_v33, %v14679_v29  ;;  %v11667_v14 = vld [vmem:[#allocation2 + $0x18] sm:$0xff]   ;;  %v11684_v63 = vld [vmem:[%s14493_s2 + $0x1e8] sm:$0xff]   ;;  %v11676_v59 = vld [vmem:[#allocation2 + $0x60] sm:$0xff]  }
 0x4a6   : > { %v11671_v5 = vld [vmem:[#allocation2 + $0x3c] sm:$0xff]   ;;  %v11677_v47 = vld [vmem:[#allocation2 + $0x6c] sm:$0xff]   ;;  %v7231_v0 = vld [vmem:[#allocation2 + $0x24] sm:$0xf] }
 0x4a7   : > { %v11678_v11 = vld [vmem:[%s14493_s2 + $0x1d8] sm:$0xff]   ;;  %v11682_v54 = vld [vmem:[#allocation2 + $0x90] sm:$0xff]   ;;  %v7301_v10 = vshrl.u32 %v7231_v0, 16  ;;  %v7304_v35 = vshll.u32 %v7231_v0, 16  ;;  %v14685_v18 = vld [vmem:[#allocation32_spill] sm:$0xff] }
 0x4a8   : > { %v11690_v58 = vld [vmem:[%s14493_s2 + $0x1f8] sm:$0xff]   ;;  %v14686_v33 = vld [vmem:[#allocation33_spill] sm:$0xff] }
 0x4a9   : > { %v14684_v45 = vld [vmem:[#allocation30_spill] sm:$0xff]  ;;  %v7334_v29 = vshll.u32 %v14686_v33, 16 }
 0x4aa   : > { %10757 = vmatmul.mubr.bf16.gmra.mrb[28].mxu1 %v9383_v15  ;;  %v14674_v15 = vcombine.low %v14672_v25, %v14673_v43  ;;  %v7314_v25 = vshrl.u32 %v14685_v18, 16 }
 0x4ab   : > { %10776 = vmatprep.mubr.bf16.mxu1 %v9424_v36  ;;  %v14676_v36 = vld [vmem:[#allocation25_spill] sm:$0xff] }
 0x4ac   : > { %v14677_v6 = vcombine.low %v14675_v17, %v14676_v36  ;;  %v11683_v17 = vld [vmem:[#allocation2 + $0x9c] sm:$0xff]   ;;  %v7303_v36 = vrot.slane %v7301_v10, 4 }
 0x4ad   : > { %v11688_v10 = vld [vmem:[#allocation2 + $0xc0] sm:$0xff]  }
 0x4b2   : > { %10777 = vmatmul.mubr.bf16.vlgmr.msra.gmra.mrb[0].mxu1 %v9425_v13  ;;  %v14682_v13 = vld [vmem:[#allocation29_spill] sm:$0xff] }
 0x4b3   : > { %10780 = vmatprep.mubr.bf16.mxu1 %v14646_v53  ;;  %10809 = vmatpush3.bf16.msra.mxu1 %v13929_v31  ;;  %v11663_v31 = vld [vmem:[%s14493_s2 + $0x1a0] sm:$0xff]  }
 0x4b4   : > { %10810 = vmatprep.subr.bf16.mxu1 %v11660_v23  ;;  %v11668_v53 = vld [vmem:[#allocation2 + $0x24] sm:$0xff]  }
 0x4b7   : > { %10811 = vmatpush3.bf16.msra.mxu1 %v11660_v23  ;;  %v14683_v23 = vcombine.low %v14681_v57, %v14682_v13 }
 0x4b8   : > { %10812 = vmatprep.subr.bf16.mxu1 %v11661_v56 }
 0x4ba   : > { %10781 = vmatmul.mubr.bf16.gmra.mrb[4].mxu1 %v14647_v40  ;;  %v11675_v40 = vld [vmem:[%s14493_s2 + $0x1d0] sm:$0xff]  }
 0x4bb   : > { %10784 = vmatprep.mubr.bf16.mxu1 %v14650_v61  ;;  %10813 = vmatpush3.bf16.msra.mxu1 %v11661_v56  ;;  %v11672_v56 = vld [vmem:[%s14493_s2 + $0x1c8] sm:$0xff]  }
 0x4bc   : > { %10814 = vmatprep.subr.bf16.mxu1 %v11662_v20  ;;  %v11673_v61 = vld [vmem:[#allocation2 + $0x48] sm:$0xff]  }
 0x4bf   : > { %10815 = vmatpush3.bf16.msra.mxu1 %v11662_v20  ;;  %v11670_v20 = vld [vmem:[#allocation2 + $0x30] sm:$0xff]  }
 0x4c0   : > { %10816 = vmatprep.subr.bf16.mxu1 %v11663_v31 }
 0x4c2   : > { %10785 = vmatmul.mubr.bf16.gmra.mrb[8].mxu1 %v14653_v51  ;;  %v11687_v51 = vld [vmem:[%s14493_s2 + $0x1f0] sm:$0xff]  }
 0x4c3   : > { %10788 = vmatprep.mubr.bf16.mxu1 %v14656_v3  ;;  %10817 = vmatpush3.bf16.msra.mxu1 %v11663_v31  ;;  %v11681_v31 = vld [vmem:[%s14493_s2 + $0x1e0] sm:$0xff]   ;;  %v11679_v3 = vld [vmem:[#allocation2 + $0x78] sm:$0xff]  }
 0x4c4   : > { %10818 = vmatprep.subr.bf16.mxu1 %v11664_v50 }
 0x4c7   : > { %10819 = vmatpush3.bf16.msra.mxu1 %v11664_v50  ;;  %v11674_v50 = vld [vmem:[#allocation2 + $0x54] sm:$0xff]  }
 0x4c8   : > { %10820 = vmatprep.subr.bf16.mxu1 %v11665_v9 }
 0x4ca   : > { %10789 = vmatmul.mubr.bf16.gmra.mrb[12].mxu1 %v14659_v8  ;;  %v11680_v8 = vld [vmem:[#allocation2 + $0x84] sm:$0xff]  }
 0x4cb   : > { %10792 = vmatprep.mubr.bf16.mxu1 %v14662_v34  ;;  %10821 = vmatpush3.bf16.msra.mxu1 %v11665_v9  ;;  %v7228_v9 = vld [vmem:[#allocation2 + $0x18] sm:$0xf]  ;;  %v7286_v34 = vshll.u32 %v14684_v45, 16 }
 0x4cc   : > { %10822 = vmatprep.subr.bf16.mxu1 %v11666_v32  ;;  %v7277_v62 = vshrl.u32 %v7228_v9, 16  ;;  %v7280_v21 = vshll.u32 %v7228_v9, 16  ;;  %v7240_v9 = vld [vmem:[#allocation2 + $0x48] sm:$0xf] }
 0x4ce   : > { %v7279_v60 = vrot.slane %v7277_v62, 4 }
 0x4cf   : > { %10823 = vmatpush3.bf16.msra.mxu1 %v11666_v32  ;;  %v14066_v32 = vld [vmem:[%s14493_s2 + $0x200] sm:$0xff]  }
 0x4d0   : > { %10856 = vmatprep.subr.bf16.mxu1 %v11669_v37 }
 0x4d2   : > { %10793 = vmatmul.mubr.bf16.gmra.mrb[16].mxu1 %v14665_v49  ;;  %v7282_v49 = vrot.slane %v7280_v21, 5 }
 0x4d3   : > { %10796 = vmatprep.mubr.bf16.mxu1 %v14668_v27  ;;  %v14071_v27 = vrot.slane %v7286_v34, 5 }
 0x4d4   : > { %v7283_v43 = vor.u32 %v7282_v49, %v7279_v60  ;;  %v14689_v60 = vld [vmem:[#allocation36_spill] sm:$0xff] }
 0x4d5   : > { %v7358_v49 = vshll.u32 %v14689_v60, 16 }
 0x4da   : > { %10797 = vmatmul.mubr.bf16.gmra.mrb[20].mxu1 %v14671_v39  ;;  %v7310_v39 = vshll.u32 %v14685_v18, 16  ;;  %v7362_v18 = vshrl.u32 %v14689_v60, 16 }
 0x4db   : > { %10800 = vmatprep.mubr.bf16.mxu1 %v14674_v15  ;;  %v7234_v15 = vld [vmem:[#allocation2 + $0x30] sm:$0xf] }
 0x4dc   : > { %v14078_v13 = vrot.slane %v7310_v39, 5  ;;  %v7373_v39 = vshrl.u32 %v7240_v9, 16 }
 0x4e2   : > { %10801 = vmatmul.mubr.bf16.gmra.mrb[24].mxu1 %v14677_v6  ;;  %v7306_v6 = vrot.slane %v7304_v35, 5  ;;  %v14690_v35 = vld [vmem:[#allocation35_spill] sm:$0xff] }
 0x4e3   : > { %10804 = vmatprep.mubr.bf16.mxu1 %v14680_v44  ;;  %v7338_v44 = vshrl.u32 %v14686_v33, 16  ;;  %v14099_v33 = vld [vmem:[#allocation2 + $0xd4] sm:$0x1] }
 0x4ea   : > { %10805 = vmatmul.mubr.bf16.gmra.mrb[28].mxu1 %v14683_v23  ;;  %v7316_v23 = vrot.slane %v7314_v25, 4  ;;  %v7376_v25 = vshll.u32 %v7240_v9, 16 }
 0x4eb   : > { %10824 = vmatprep.mubr.bf16.mxu1 %v11667_v14  ;;  %v11685_v14 = vld [vmem:[#allocation2 + $0xa8] sm:$0xff]  }
 0x4f2   : > { %10825 = vmatmul.mubr.bf16.vlgmr.msra.gmra.mrb[0].mxu1 %v11668_v53  ;;  %v7325_v53 = vshrl.u32 %v7234_v15, 16 }
 0x4f3   : > { %10828 = vmatprep.mubr.bf16.mxu1 %v11670_v20  ;;  %10857 = vmatpush3.bf16.msra.mxu1 %v11669_v37  ;;  %v7290_v37 = vshrl.u32 %v14684_v45, 16  ;;  %v7284_v20 = vrot.slane %v7283_v43, 4  ;;  %v11686_v45 = vld [vmem:[#allocation2 + $0xb4] sm:$0xff]  }
 0x4f4   : > { %10858 = vmatprep.subr.bf16.mxu1 %v11672_v56 }
 0x4f5   : > { %v7292_v24 = vrot.slane %v7290_v37, 4  ;;  %v7289_v62 = vsel %vm12520_vm2, %v7284_v20, %v14071_v27  ;;  %v14104_v20 = vrot.slane %v7358_v49, 5 }
 0x4f7   : > { %10859 = vmatpush3.bf16.msra.mxu1 %v11672_v56  ;;  %v7293_v57 = vor.u32 %v7292_v24, %v14071_v27  ;;  %v7328_v56 = vshll.u32 %v7234_v15, 16  ;;  %v7344_v24 = vshll.u32 %v14690_v35, 16 }
 0x4f8   : > { %10860 = vmatprep.subr.bf16.mxu1 %v11675_v40 }
 0x4f9   : > { %v7346_v49 = vrot.slane %v7344_v24, 5 }
 0x4fa   : > { %10829 = vmatmul.mubr.bf16.gmra.mrb[4].mxu1 %v11671_v5 }
 0x4fb   : > { %10832 = vmatprep.mubr.bf16.mxu1 %v11673_v61  ;;  %10861 = vmatpush3.bf16.msra.mxu1 %v11675_v40  ;;  %v14687_v40 = vld [vmem:[#allocation31_spill] sm:$0xff] }
 0x4fc   : > { %10862 = vmatprep.subr.bf16.mxu1 %v11678_v11  ;;  %v7296_v5 = vshll.u32 %v14687_v40, 16  ;;  %v7243_v40 = vld [vmem:[#allocation2 + $0x54] sm:$0xf] }
 0x4fe   : > { %v7298_v21 = vrot.slane %v7296_v5, 5 }
 0x4ff   : > { %10863 = vmatpush3.bf16.msra.mxu1 %v11678_v11  ;;  %v14688_v11 = vld [vmem:[#allocation34_spill] sm:$0xff] }
 0x500   : > { %10864 = vmatprep.subr.bf16.mxu1 %v11681_v31  ;;  %v7320_v61 = vshll.u32 %v14688_v11, 16  ;;  %v7364_v11 = vrot.slane %v7362_v18, 4 }
 0x502   : > { %10833 = vmatmul.mubr.bf16.gmra.mrb[8].mxu1 %v11674_v50  ;;  %v14082_v50 = vrot.slane %v7334_v29, 5  ;;  %v7365_v24 = vor.u32 %v7364_v11, %v14104_v20 }
 0x503   : > { %10836 = vmatprep.mubr.bf16.mxu1 %v11676_v59  ;;  %10865 = vmatpush3.bf16.msra.mxu1 %v11681_v31  ;;  %v7307_v31 = vor.u32 %v7306_v6, %v7303_v36  ;;  %v7237_v59 = vld [vmem:[#allocation2 + $0x3c] sm:$0xf]  ;;  %v14097_v6 = vld [vmem:[#allocation2 + $0xd0] sm:$0xf] }
 0x504   : > { %10866 = vmatprep.subr.bf16.mxu1 %v11684_v63  ;;  %v7352_v0 = vshll.u32 %v7237_v59, 16  ;;  %v7366_v11 = vrot.slane %v7365_v24, 4  ;;  %v7252_v24 = vld [vmem:[#allocation2 + $0x78] sm:$0xf] }
 0x505   : > { %v7308_v34 = vrot.slane %v7307_v31, 4  ;;  %v7378_v31 = vrot.slane %v7376_v25, 5  ;;  %v14693_v25 = vld [vmem:[#allocation37_spill] sm:$0xff] }
 0x507   : > { %10867 = vmatpush3.bf16.msra.mxu1 %v11684_v63  ;;  %v7340_v63 = vrot.slane %v7338_v44, 4  ;;  %v7313_v35 = vsel %vm12520_vm2, %v7308_v34, %v14078_v13 }
 0x508   : > { %10868 = vmatprep.subr.bf16.mxu1 %v11687_v51 }
 0x509   : > { %v7341_v37 = vor.u32 %v7340_v63, %v14082_v50 }
 0x50a   : > { %10837 = vmatmul.mubr.bf16.gmra.mrb[12].mxu1 %v11677_v47  ;;  %v7317_v47 = vor.u32 %v7316_v23, %v14078_v13  ;;  %v8156_v23 = vrot.slane %v14099_v33, 5 }
 0x50b   : > { %10840 = vmatprep.mubr.bf16.mxu1 %v11679_v3  ;;  %10869 = vmatpush3.bf16.msra.mxu1 %v11687_v51  ;;  %v7294_v51 = vrot.slane %v7293_v57, 4  ;;  %v7330_v3 = vrot.slane %v7328_v56, 5  ;;  %v8153_v57 = vrot.slane %v14097_v6, 5  ;;  %v7354_v56 = vrot.slane %v7352_v0, 5 }
 0x50c   : > { %10870 = vmatprep.subr.bf16.mxu1 %v11690_v58  ;;  %v7318_v43 = vrot.slane %v7317_v47, 4  ;;  %v14692_v47 = vld [vmem:[#allocation41_spill] sm:$0xff] }
 0x50d   : > { %v7299_v27 = vsel %vm12520_vm2, %v7294_v51, %v7298_v21  ;;  %v8155_v63 = vrot.slane %v8153_v57, 4 }
 0x50e   : > { %v9504_v0 = vcombine.low %v7289_v62, %v7299_v27 }
 0x50f   : > { %10871 = vmatpush3.bf16.msra.mxu1 %v11690_v58  ;;  %v7327_v58 = vrot.slane %v7325_v53, 4  ;;  %v7342_v53 = vrot.slane %v7341_v37, 4  ;;  %v14116_v37 = vsel %vm13039_vm13, %v8155_v63, %v8156_v23 }
 0x510   : > { %10904 = vmatprep.subr.bf16.mxu1 %v14066_v32 }
 0x511   : > { %v7331_v15 = vor.u32 %v7330_v3, %v7327_v58  ;;  %v7406_v58 = vshll.u32 %v14692_v47, 16  ;;  %v7410_v3 = vshrl.u32 %v14692_v47, 16  ;;  %v7347_v62 = vsel %vm12520_vm2, %v7342_v53, %v7346_v49 }
 0x512   : > { %10841 = vmatmul.mubr.bf16.gmra.mrb[16].mxu1 %v11680_v8  ;;  %v14088_v8 = vrot.slane %v7320_v61, 5  ;;  %v7375_v61 = vrot.slane %v7373_v39, 4 }
 0x513   : > { %10844 = vmatprep.mubr.bf16.mxu1 %v11682_v54  ;;  %v7349_v54 = vshrl.u32 %v7237_v59, 16  ;;  %v11689_v59 = vld [vmem:[#allocation2 + $0xcc] sm:$0xff]   ;;  %v7332_v60 = vrot.slane %v7331_v15, 4  ;;  %v14130_v27 = vrot.slane %v7406_v58, 5  ;;  %v7412_v15 = vrot.slane %v7410_v3, 4 }
 0x514   : > { %v7323_v18 = vsel %vm12520_vm2, %v7318_v43, %v14088_v8 }
 0x515   : > { %v7351_v29 = vrot.slane %v7349_v54, 4  ;;  %v7397_v54 = vshrl.u32 %v7243_v40, 16  ;;  %v9505_v8 = vcombine.low %v7313_v35, %v7323_v18  ;;  %v7337_v43 = vsel %vm12520_vm2, %v7332_v60, %v14082_v50  ;;  %v11692_v50 = vld [vmem:[%s14493_s2 + $0x208] sm:$0xff]   ;;  %v14694_v18 = vld [vmem:[#allocation46_spill] sm:$0xff] }
 0x517   : > { %v7355_v39 = vor.u32 %v7354_v56, %v7351_v29  ;;  %v7399_v34 = vrot.slane %v7397_v54, 4  ;;  %v7421_v29 = vshrl.u32 %v7246_v1, 16  ;;  %v11725_v56 = vld [vmem:[#allocation2 + $0x50] sm:$0x1] }
 0x519   : > { %v7356_v23 = vrot.slane %v7355_v39, 4  ;;  %v7423_v54 = vrot.slane %v7421_v29, 4  ;;  %v7454_v39 = vshll.u32 %v14694_v18, 16 }
 0x51a   : > { %10845 = vmatmul.mubr.bf16.gmra.mrb[20].mxu1 %v11683_v17  ;;  %v14691_v17 = vld [vmem:[#allocation40_spill] sm:$0xff] }
 0x51b   : > { %10848 = vmatprep.mubr.bf16.mxu1 %v11685_v14  ;;  %v7382_v36 = vshll.u32 %v14691_v17, 16  ;;  %v7386_v44 = vshrl.u32 %v14691_v17, 16  ;;  %v7997_v14 = vld [vmem:[#allocation2 + $0xcc] sm:$0xe]  ;;  %v7368_v17 = vshll.u32 %v14693_v25, 16  ;;  %v7361_v49 = vsel %vm12520_vm2, %v7356_v23, %v14104_v20 }
 0x51c   : > { %v9543_v5 = vrot.slane %v7997_v14, 9  ;;  %v7424_v14 = vshll.u32 %v7246_v1, 16  ;;  %v7458_v25 = vshrl.u32 %v14694_v18, 16  ;;  %v7469_v23 = vshrl.u32 %v7252_v24, 16 }
 0x51d   : > { %v14106_v51 = vrot.slane %v7382_v36, 5  ;;  %v7388_v21 = vrot.slane %v7386_v44, 4  ;;  %v7379_v36 = vor.u32 %v7378_v31, %v7375_v61  ;;  %v7370_v53 = vrot.slane %v7368_v17, 5  ;;  %v11726_v31 = vld [vmem:[#allocation2 + $0x64] sm:$0xf] }
 0x51e   : > { %v14112_v9 = vsel %vm13039_vm13, %v9543_v5, %v8153_v57  ;;  %v9506_v57 = vcombine.low %v7337_v43, %v7347_v62  ;;  %v7249_v5 = vld [vmem:[#allocation2 + $0x6c] sm:$0xf]  ;;  %v7413_v61 = vor.u32 %v7412_v15, %v14130_v27  ;;  %v7430_v63 = vshll.u32 %v11726_v31, 16 }
 0x51f   : > { %v7389_v13 = vor.u32 %v7388_v21, %v14106_v51  ;;  %v7380_v47 = vrot.slane %v7379_v36, 4  ;;  %v7416_v21 = vshll.u32 %v13705_v16, 16  ;;  %v7448_v60 = vshll.u32 %v7249_v5, 16 }
 0x520   : > { %v7371_v16 = vsel %vm12520_vm2, %v7366_v11, %v7370_v53  ;;  %v7414_v17 = vrot.slane %v7413_v61, 4  ;;  %v14148_v1 = vrot.slane %v7430_v63, 5 }
 0x521   : > { %v7390_v58 = vrot.slane %v7389_v13, 4  ;;  %v7385_v20 = vsel %vm12520_vm2, %v7380_v47, %v14106_v51  ;;  %v7418_v13 = vrot.slane %v7416_v21, 5  ;;  %v7472_v51 = vshll.u32 %v7252_v24, 16  ;;  %v11694_v21 = vld [vmem:[%s14493_s2 + $0x218] sm:$0xff]  }
 0x522   : > { %10849 = vmatmul.mubr.bf16.gmra.mrb[24].mxu1 %v11686_v45  ;;  %v7400_v45 = vshll.u32 %v7243_v40, 16  ;;  %v7392_v40 = vshll.u32 %v11725_v56, 16  ;;  %v9507_v61 = vcombine.low %v7361_v49, %v7371_v16 }
 0x523   : > { %10852 = vmatprep.mubr.bf16.mxu1 %v11688_v10  ;;  %v9575_v10 = vcombine.low %v14112_v9, %v14116_v37  ;;  %v7419_v53 = vsel %vm12520_vm2, %v7414_v17, %v7418_v13  ;;  %v7474_v49 = vrot.slane %v7472_v51, 5  ;;  %v11730_v17 = vld [vmem:[#allocation2 + $0x88] sm:$0xf]  ;;  %v11731_v13 = vld [vmem:[#allocation2 + $0x94] sm:$0xf]  ;;  %v9587_v9 = vld [vmem:[%s11913_s23 + $0x39] sm:$0xff] }
 0x524   : > { %v7402_v44 = vrot.slane %v7400_v45, 5  ;;  %v7426_v45 = vrot.slane %v7424_v14, 5  ;;  %v7394_v35 = vrot.slane %v7392_v40, 5  ;;  %v7450_v14 = vrot.slane %v7448_v60, 5  ;;  %v11728_v40 = vld [vmem:[#allocation2 + $0x7c] sm:$0xf] }
 0x525   : > { %v7482_v11 = vshrl.u32 %v11728_v40, 16  ;;  %v7471_v60 = vrot.slane %v7469_v23, 4  ;;  %v7506_v24 = vshrl.u32 %v11730_v17, 16 }
 0x526   : > { %v7403_v3 = vor.u32 %v7402_v44, %v7399_v34  ;;  %v7395_v15 = vsel %vm12520_vm2, %v7390_v58, %v7394_v35  ;;  %v11693_v34 = vld [vmem:[%s14493_s2 + $0x210] sm:$0xff]   ;;  %v7427_v44 = vor.u32 %v7426_v45, %v7423_v54  ;;  %v7255_v54 = vld [vmem:[#allocation2 + $0x84] sm:$0xf] }
 0x527   : > { %v11729_v58 = vld [vmem:[#allocation2 + $0x74] sm:$0x1]  ;;  %v7496_v16 = vshll.u32 %v7255_v54, 16 }
 0x528   : > { %v7404_v36 = vrot.slane %v7403_v3, 4  ;;  %v7464_v3 = vshll.u32 %v11729_v58, 16 }
 0x52a   : > { %10853 = vmatmul.mubr.bf16.gmra.mrb[28].mxu1 %v11689_v59  ;;  %v7434_v59 = vshrl.u32 %v11726_v31, 16  ;;  %v9508_v31 = vcombine.low %v7385_v20, %v7395_v15  ;;  %v7409_v63 = vsel %vm12520_vm2, %v7404_v36, %v14130_v27  ;;  %v11695_v20 = vld [vmem:[%s14493_s2 + $0x220] sm:$0xff]  }
 0x52b   : > { %10872 = vmatprep.mubr.bf16.mxu1 %v9504_v0  ;;  %v7445_v0 = vshrl.u32 %v7249_v5, 16  ;;  %v7478_v5 = vshll.u32 %v11728_v40, 16  ;;  %v9509_v45 = vcombine.low %v7409_v63, %v7419_v53  ;;  %v11732_v53 = vld [vmem:[#allocation2 + $0x80] sm:$0x1] }
 0x52c   : > { %v7436_v62 = vrot.slane %v7434_v59, 4  ;;  %v7428_v59 = vrot.slane %v7427_v44, 4  ;;  %v7526_v44 = vshll.u32 %v11731_v13, 16 }
 0x52d   : > { %v7447_v29 = vrot.slane %v7445_v0, 4  ;;  %v14171_v27 = vrot.slane %v7478_v5, 5  ;;  %v7498_v5 = vrot.slane %v7496_v16, 5 }
 0x52e   : > { %v7437_v56 = vor.u32 %v7436_v62, %v14148_v1  ;;  %v7502_v62 = vshll.u32 %v11730_v17, 16 }
 0x52f   : > { %v7451_v18 = vor.u32 %v7450_v14, %v7447_v29  ;;  %v7466_v29 = vrot.slane %v7464_v3, 5  ;;  %v7475_v14 = vor.u32 %v7474_v49, %v7471_v60 }
 0x530   : > { %v7438_v35 = vrot.slane %v7437_v56, 4  ;;  %v7488_v56 = vshll.u32 %v11732_v53, 16 }
 0x531   : > { %v7452_v23 = vrot.slane %v7451_v18, 4 }
 0x532   : > { %10873 = vmatmul.mubr.bf16.vlgmr.msra.gmra.mrb[0].mxu1 %v9505_v8  ;;  %v11727_v8 = vld [vmem:[#allocation2 + $0x68] sm:$0x1] }
 0x533   : > { %10876 = vmatprep.mubr.bf16.mxu1 %v9506_v57  ;;  %10905 = vmatpush3.bf16.msra.mxu1 %v14066_v32  ;;  %v7440_v43 = vshll.u32 %v11727_v8, 16  ;;  %v14159_v32 = vrot.slane %v7454_v39, 5  ;;  %v7460_v57 = vrot.slane %v7458_v25, 4  ;;  %v7484_v39 = vrot.slane %v7482_v11, 4 }
 0x534   : > { %10906 = vmatprep.subr.bf16.mxu1 %v11692_v50  ;;  %v7493_v25 = vshrl.u32 %v7255_v54, 16  ;;  %v7530_v8 = vshrl.u32 %v11731_v13, 16  ;;  %v14182_v11 = vrot.slane %v7502_v62, 5  ;;  %v7476_v54 = vrot.slane %v7475_v14, 4  ;;  %v11733_v62 = vld [vmem:[#allocation2 + $0x8c] sm:$0x1] }
 0x535   : > { %v7442_v47 = vrot.slane %v7440_v43, 5  ;;  %v7461_v0 = vor.u32 %v7460_v57, %v14159_v32  ;;  %v7433_v43 = vsel %vm12520_vm2, %v7428_v59, %v14148_v1  ;;  %v7485_v51 = vor.u32 %v7484_v39, %v14171_v27  ;;  %v7264_v13 = vld [vmem:[#allocation2 + $0xa8] sm:$0xf] }
 0x536   : > { %v7495_v40 = vrot.slane %v7493_v25, 4  ;;  %v14184_v59 = vrot.slane %v7526_v44, 5  ;;  %v7532_v58 = vrot.slane %v7530_v8, 4  ;;  %v7490_v25 = vrot.slane %v7488_v56, 5  ;;  %v11735_v8 = vld [vmem:[#allocation2 + $0x98] sm:$0x1] }
 0x537   : > { %10907 = vmatpush3.bf16.msra.mxu1 %v11692_v50  ;;  %v7258_v50 = vld [vmem:[#allocation2 + $0x90] sm:$0xf]  ;;  %v7443_v57 = vsel %vm12520_vm2, %v7438_v35, %v7442_v47  ;;  %v11696_v47 = vld [vmem:[%s14493_s2 + $0x228] sm:$0xff]   ;;  %v7486_v60 = vrot.slane %v7485_v51, 4 }
 0x538   : > { %10908 = vmatprep.subr.bf16.mxu1 %v11693_v34  ;;  %v7517_v15 = vshrl.u32 %v7258_v50, 16  ;;  %v7520_v36 = vshll.u32 %v7258_v50, 16  ;;  %v9510_v3 = vcombine.low %v7433_v43, %v7443_v57  ;;  %v7499_v49 = vor.u32 %v7498_v5, %v7495_v40 }
 0x539   : > { %v7533_v17 = vor.u32 %v7532_v58, %v14184_v59  ;;  %v7491_v44 = vsel %vm12520_vm2, %v7486_v60, %v7490_v25  ;;  %v7536_v43 = vshll.u32 %v11735_v8, 16  ;;  %v7565_v40 = vshrl.u32 %v7264_v13, 16 }
 0x53a   : > { %10877 = vmatmul.mubr.bf16.gmra.mrb[4].mxu1 %v9507_v61  ;;  %v7508_v61 = vrot.slane %v7506_v24, 4  ;;  %v7519_v1 = vrot.slane %v7517_v15, 4  ;;  %v7522_v63 = vrot.slane %v7520_v36, 5  ;;  %v7512_v24 = vshll.u32 %v11733_v62, 16  ;;  %v11734_v15 = vld [vmem:[#allocation2 + $0xa0] sm:$0xf] }
 0x53b   : > { %10880 = vmatprep.mubr.bf16.mxu1 %v9508_v31  ;;  %10909 = vmatpush3.bf16.msra.mxu1 %v11693_v34  ;;  %v7462_v34 = vrot.slane %v7461_v0, 4  ;;  %v7261_v31 = vld [vmem:[#allocation2 + $0x9c] sm:$0xf]  ;;  %v7457_v0 = vsel %vm12520_vm2, %v7452_v23, %v14159_v32  ;;  %v7481_v32 = vsel %vm12520_vm2, %v7476_v54, %v14171_v27  ;;  %v7554_v36 = vshrl.u32 %v11734_v15, 16 }
 0x53c   : > { %10910 = vmatprep.subr.bf16.mxu1 %v11694_v21  ;;  %v7509_v50 = vor.u32 %v7508_v61, %v14182_v11  ;;  %v7541_v35 = vshrl.u32 %v7261_v31, 16  ;;  %v7544_v18 = vshll.u32 %v7261_v31, 16  ;;  %v7523_v16 = vor.u32 %v7522_v63, %v7519_v1  ;;  %v11698_v61 = vld [vmem:[%s14493_s2 + $0x238] sm:$0xff]  }
 0x53d   : > { %v7500_v57 = vrot.slane %v7499_v49, 4  ;;  %v7534_v56 = vrot.slane %v7533_v17, 4  ;;  %v7568_v5 = vshll.u32 %v7264_v13, 16  ;;  %v9512_v31 = vcombine.low %v7481_v32, %v7491_v44  ;;  %v11738_v32 = vld [vmem:[#allocation2 + $0xb8] sm:$0xf] }
 0x53e   : > { %v7510_v23 = vrot.slane %v7509_v50, 4  ;;  %v7543_v51 = vrot.slane %v7541_v35, 4  ;;  %v7546_v53 = vrot.slane %v7544_v18, 5  ;;  %v7524_v27 = vrot.slane %v7523_v16, 4  ;;  %v11737_v50 = vld [vmem:[#allocation2 + $0xa4] sm:$0x1] }
 0x53f   : > { %10911 = vmatpush3.bf16.msra.mxu1 %v11694_v21  ;;  %v7467_v21 = vsel %vm12520_vm2, %v7462_v34, %v7466_v29  ;;  %v11736_v34 = vld [vmem:[#allocation2 + $0xac] sm:$0xf]  ;;  %v7514_v1 = vrot.slane %v7512_v24, 5  ;;  %v7556_v58 = vrot.slane %v7554_v36, 4  ;;  %v7560_v35 = vshll.u32 %v11737_v50, 16 }
 0x540   : > { %10912 = vmatprep.subr.bf16.mxu1 %v11695_v20  ;;  %v9511_v39 = vcombine.low %v7457_v0, %v7467_v21  ;;  %v7574_v29 = vshll.u32 %v11736_v34, 16  ;;  %v7578_v14 = vshrl.u32 %v11736_v34, 16  ;;  %v7505_v0 = vsel %vm12520_vm2, %v7500_v57, %v14182_v11  ;;  %v11739_v36 = vld [vmem:[#allocation2 + $0xc4] sm:$0xf] }
 0x541   : > { %v7515_v60 = vsel %vm12520_vm2, %v7510_v23, %v7514_v1  ;;  %v7547_v49 = vor.u32 %v7546_v53, %v7543_v51  ;;  %v7529_v18 = vsel %vm12520_vm2, %v7524_v27, %v14184_v59  ;;  %v7567_v25 = vrot.slane %v7565_v40, 4  ;;  %v7273_v53 = vld [vmem:[#allocation2 + $0xcc] sm:$0xf] }
 0x542   : > { %10881 = vmatmul.mubr.bf16.gmra.mrb[8].mxu1 %v9509_v45  ;;  %v11697_v45 = vld [vmem:[%s14493_s2 + $0x230] sm:$0xff]   ;;  %v14209_v21 = vrot.slane %v7574_v29, 5  ;;  %v7580_v54 = vrot.slane %v7578_v14, 4  ;;  %v7570_v16 = vrot.slane %v7568_v5, 5  ;;  %v7598_v62 = vshll.u32 %v11738_v32, 16 }
 0x543   : > { %10884 = vmatprep.mubr.bf16.mxu1 %v9510_v3  ;;  %10913 = vmatpush3.bf16.msra.mxu1 %v11695_v20  ;;  %v7550_v20 = vshll.u32 %v11734_v15, 16  ;;  %v7538_v3 = vrot.slane %v7536_v43, 5  ;;  %v7602_v24 = vshrl.u32 %v11738_v32, 16  ;;  %v7270_v15 = vld [vmem:[#allocation2 + $0xc0] sm:$0xf]  ;;  %v7622_v13 = vshll.u32 %v11739_v36, 16 }
 0x544   : > { %10914 = vmatprep.subr.bf16.mxu1 %v11696_v47  ;;  %v7626_v44 = vshrl.u32 %v11739_v36, 16  ;;  %v9513_v59 = vcombine.low %v7505_v0, %v7515_v60  ;;  %v7548_v43 = vrot.slane %v7547_v49, 4  ;;  %v7562_v34 = vrot.slane %v7560_v35, 5  ;;  %v11740_v14 = vld [vmem:[#allocation2 + $0xb0] sm:$0x1] }
 0x545   : > { %v14207_v63 = vrot.slane %v7550_v20, 5  ;;  %v7581_v20 = vor.u32 %v7580_v54, %v14209_v21  ;;  %v7571_v29 = vor.u32 %v7570_v16, %v7567_v25  ;;  %v7584_v57 = vshll.u32 %v11740_v14, 16 }
 0x546   : > { %v7613_v23 = vshrl.u32 %v7270_v15, 16  ;;  %v7616_v51 = vshll.u32 %v7270_v15, 16  ;;  %v7600_v40 = vrot.slane %v7598_v62, 5  ;;  %v7604_v5 = vrot.slane %v7602_v24, 4 }
 0x547   : > { %10915 = vmatpush3.bf16.msra.mxu1 %v11696_v47  ;;  %v7267_v47 = vld [vmem:[#allocation2 + $0xb4] sm:$0xf]  ;;  %v7557_v17 = vor.u32 %v7556_v58, %v14207_v63  ;;  %v7624_v58 = vrot.slane %v7622_v13, 5  ;;  %v7637_v54 = vshrl.u32 %v7273_v53, 16  ;;  %v7650_v0 = vshrl.u32 %v14097_v6, 16 }
 0x548   : > { %10916 = vmatprep.subr.bf16.mxu1 %v11697_v45  ;;  %v7589_v11 = vshrl.u32 %v7267_v47, 16  ;;  %v7572_v60 = vrot.slane %v7571_v29, 4  ;;  %v7586_v49 = vrot.slane %v7584_v57, 5  ;;  %v7615_v50 = vrot.slane %v7613_v23, 4  ;;  %v11742_v13 = vld [vmem:[#allocation2 + $0xc8] sm:$0x1] }
 0x549   : > { %v7558_v27 = vrot.slane %v7557_v17, 4  ;;  %v7618_v35 = vrot.slane %v7616_v51, 5  ;;  %v7605_v25 = vor.u32 %v7604_v5, %v7600_v40  ;;  %v7656_v23 = vshll.u32 %v14099_v33, 16 }
 0x54a   : > { %10885 = vmatmul.mubr.bf16.gmra.mrb[12].mxu1 %v9511_v39  ;;  %v7539_v39 = vsel %vm12520_vm2, %v7534_v56, %v7538_v3  ;;  %v7591_v56 = vrot.slane %v7589_v11, 4  ;;  %v7628_v3 = vrot.slane %v7626_v44, 4  ;;  %v11741_v11 = vld [vmem:[#allocation2 + $0xbc] sm:$0x1]  ;;  %v7632_v44 = vshll.u32 %v11742_v13, 16 }
 0x54b   : > { %10888 = vmatprep.mubr.bf16.mxu1 %v9512_v31  ;;  %10917 = vmatpush3.bf16.msra.mxu1 %v11697_v45  ;;  %v7592_v45 = vshll.u32 %v7267_v47, 16  ;;  %v9514_v8 = vcombine.low %v7529_v18, %v7539_v39  ;;  %v7582_v31 = vrot.slane %v7581_v20, 4  ;;  %v7640_v47 = vshll.u32 %v7273_v53, 16 }
 0x54c   : > { %10918 = vmatprep.subr.bf16.mxu1 %v11698_v61  ;;  %v7553_v18 = vsel %vm12520_vm2, %v7548_v43, %v14207_v63  ;;  %v7563_v39 = vsel %vm12520_vm2, %v7558_v27, %v7562_v34  ;;  %v7608_v32 = vshll.u32 %v11741_v11, 16  ;;  %v7629_v62 = vor.u32 %v7628_v3, %v7624_v58 }
 0x54d   : > { %v7594_v1 = vrot.slane %v7592_v45, 5  ;;  %v7587_v16 = vsel %vm12520_vm2, %v7582_v31, %v7586_v49  ;;  %v7642_v24 = vrot.slane %v7640_v47, 5  ;;  %v7652_v20 = vrot.slane %v7650_v0, 4 }
 0x54e   : > { %v9515_v45 = vcombine.low %v7553_v18, %v7563_v39  ;;  %v7577_v63 = vsel %vm12520_vm2, %v7572_v60, %v14209_v21  ;;  %v7619_v36 = vor.u32 %v7618_v35, %v7615_v50  ;;  %v7610_v43 = vrot.slane %v7608_v32, 5  ;;  %v14695_v60 = vld [vmem:[#allocation38_spill] sm:$0xff]  ;;  %v14699_v35 = vld [vmem:[#allocation43_spill] sm:$0xff]  ;;  %v14702_v39 = vld [vmem:[#allocation45_spill] sm:$0xff] }
 0x54f   : > { %10919 = vmatpush3.bf16.msra.mxu1 %v11698_v61  ;;  %v7646_v61 = vshll.u32 %v14097_v6, 16  ;;  %v7595_v17 = vor.u32 %v7594_v1, %v7591_v56  ;;  %v7639_v6 = vrot.slane %v7637_v54, 4  ;;  %v7630_v34 = vrot.slane %v7629_v62, 4  ;;  %v14698_v50 = vld [vmem:[#allocation42_spill] sm:$0xff] }
 0x550   : > { %v7620_v51 = vrot.slane %v7619_v36, 4  ;;  %v7634_v53 = vrot.slane %v7632_v44, 5  ;;  %v7658_v1 = vrot.slane %v7656_v23, 5  ;;  %v14700_v18 = vcombine.low %v14698_v50, %v14699_v35  ;;  %v14708_v32 = vld [vmem:[#allocation50_spill] sm:$0xff]  ;;  %v14716_v36 = vld [vmem:[#allocation55_spill] sm:$0xff]  ;;  %v9591_v50 = vld [vmem:[%s11913_s23 + $0x69] sm:$0xff] }
 0x551   : > { %v7648_v15 = vrot.slane %v7646_v61, 5  ;;  %v7596_v29 = vrot.slane %v7595_v17, 4  ;;  %v7643_v14 = vor.u32 %v7642_v24, %v7639_v6  ;;  %v14705_v17 = vld [vmem:[#allocation48_spill] sm:$0xff]  ;;  %v14709_v62 = vcombine.low %v14707_v38, %v14708_v32 }
 0x552   : > { %10889 = vmatmul.mubr.bf16.gmra.mrb[16].mxu1 %v9513_v59  ;;  %v9516_v59 = vcombine.low %v7577_v63, %v7587_v16  ;;  %v7635_v21 = vsel %vm12520_vm2, %v7630_v34, %v7634_v53  ;;  %v7625_v54 = vsel %vm12520_vm2, %v7620_v51, %v7624_v58  ;;  %v14701_v58 = vld [vmem:[#allocation44_spill] sm:$0xff]  ;;  %v14704_v16 = vld [vmem:[#allocation47_spill] sm:$0xff]  ;;  %v14715_v63 = vld [vmem:[#allocation54_spill] sm:$0xff]  ;;  %v14718_v44 = vcombine.low %v13780_v42, %v13784_v28 }
 0x553   : > { %10892 = vmatprep.mubr.bf16.mxu1 %v9514_v8  ;;  %v7606_v8 = vrot.slane %v7605_v25, 4  ;;  %v7653_v57 = vor.u32 %v7652_v20, %v7648_v15  ;;  %v7601_v56 = vsel %vm12520_vm2, %v7596_v29, %v7600_v40  ;;  %v7644_v5 = vrot.slane %v7643_v14, 4  ;;  %v14696_v40 = vld [vmem:[#allocation39_spill] sm:$0xff]  ;;  %v14710_v6 = vld [vmem:[#allocation52_spill] sm:$0xff]  ;;  %v14713_v20 = vld [vmem:[#allocation53_spill] sm:$0xff] }
 0x554   : > { %v9518_v47 = vcombine.low %v7625_v54, %v7635_v21  ;;  %v14697_v49 = vcombine.low %v14695_v60, %v14696_v40  ;;  %v14703_v25 = vcombine.low %v14701_v58, %v14702_v39  ;;  %v14706_v11 = vcombine.low %v14704_v16, %v14705_v17  ;;  %v14305_v28 = vld [vmem:[%s14497_s6] ss:$0 sm:$0xff]  ;;  %v9585_v14 = vld [vmem:[%s11913_s23 + $0x21] sm:$0xff]  ;;  %v9589_v39 = vld [vmem:[%s11913_s23 + $0x51] sm:$0xff] }
 0x555   : > { %v7611_v27 = vsel %vm12520_vm2, %v7606_v8, %v7610_v43  ;;  %v7654_v31 = vrot.slane %v7653_v57, 4  ;;  %v7649_v33 = vsel %vm12520_vm2, %v7644_v5, %v7648_v15  ;;  %v14711_v24 = vcombine.low %v13738_v41, %v14710_v6  ;;  %v14712_v15 = vld [vmem:[#allocation51_spill] sm:$0xff]  ;;  %v14721_v43 = vld [vmem:[#allocation56_spill] sm:$0xff]  ;;  %v14722_v41 = vld [vmem:[#allocation58_spill] sm:$0xff] }
 0x556   : > { %v9517_v3 = vcombine.low %v7601_v56, %v7611_v27  ;;  %v14717_v13 = vcombine.low %v14715_v63, %v14716_v36  ;;  %v14723_v34 = vcombine.low %v14721_v43, %v14722_v41  ;;  %v14724_v42 = vcombine.low %v13850_v52, %v13854_v2  ;;  %v9590_v54 = vld [vmem:[%s11913_s23 + $0x61] sm:$0xff]  ;;  %v9595_v41 = vld [vmem:[%s11913_s23 + $0x99] sm:$0xff] }
 0x557   : > { %v7659_v61 = vsel %vm12520_vm2, %v7654_v31, %v7658_v1 }
 0x558   : > { %v9519_v0 = vcombine.low %v7649_v33, %v7659_v61 }
 0x55a   : > { %10893 = vmatmul.mubr.bf16.gmra.mrb[20].mxu1 %v9515_v45  ;;  %v14714_v45 = vcombine.low %v14712_v15, %v14713_v20 }
 0x55b   : > { %10896 = vmatprep.mubr.bf16.mxu1 %v9516_v59  ;;  %v14719_v59 = vld [vmem:[#allocation57_spill] sm:$0xff] }
 0x55c   : > { %v14720_v8 = vcombine.low %v13788_v46, %v14719_v59 }
 0x562   : > { %10897 = vmatmul.mubr.bf16.gmra.mrb[24].mxu1 %v9517_v3 }
 0x563   : > { %10900 = vmatprep.mubr.bf16.mxu1 %v9518_v47 }
 0x56a   : > { %10901 = vmatmul.mubr.bf16.gmra.mrb[28].mxu1 %v9519_v0  ;;  %v9588_v0 = vld [vmem:[%s11913_s23 + $0x49] sm:$0xff] }
 0x56b   : > { %10920 = vmatprep.mubr.bf16.mxu1 %v14697_v49 }
 0x572   : > { %10921 = vmatmul.mubr.bf16.vlgmr.msra.gmra.mrb[0].mxu1 %v14700_v18 }
 0x573   : > { %10924 = vmatprep.mubr.bf16.mxu1 %v14703_v25 }
 0x57a   : > { %10925 = vmatmul.mubr.bf16.gmra.mrb[4].mxu1 %v14706_v11 }
 0x57b   : > { %10928 = vmatprep.mubr.bf16.mxu1 %v14709_v62 }
 0x582   : > { %10929 = vmatmul.mubr.bf16.gmra.mrb[8].mxu1 %v14711_v24 }
 0x583   : > { %10932 = vmatprep.mubr.bf16.mxu1 %v14714_v45  ;;  %v9594_v45 = vld [vmem:[%s11913_s23 + $0x91] sm:$0xff] }
 0x58a   : > { %10933 = vmatmul.mubr.bf16.gmra.mrb[12].mxu1 %v14717_v13 }
 0x58b   : > { %10936 = vmatprep.mubr.bf16.mxu1 %v14718_v44  ;;  %v9592_v44 = vld [vmem:[%s11913_s23 + $0x79] sm:$0xff] }
 0x592   : > { %10937 = vmatmul.mubr.bf16.gmra.mrb[16].mxu1 %v14720_v8 }
 0x593   : > { %10940 = vmatprep.mubr.bf16.mxu1 %v14723_v34 }
 0x59a   : > { %10941 = vmatmul.mubr.bf16.gmra.mrb[20].mxu1 %v9571_v4  ;;  %v14299_v4 = vld [vmem:[%s14496_s5] ss:$0 sm:$0xff] }
 0x59b   : > { %10944 = vmatprep.mubr.bf16.mxu1 %v9572_v12 }
 0x5a2   : > { %10945 = vmatmul.mubr.bf16.gmra.mrb[24].mxu1 %v9573_v26 }
 0x5a3   : > { %10948 = vmatprep.mubr.bf16.mxu1 %v14724_v42 }
 0x5aa   : > { %10949 = vmatmul.mubr.bf16.gmra.mrb[28].mxu1 %v9575_v10 }
 0x645   : > { %v10922_v46 = vpop.f32.mrb[0].mxu1 }
 0x646   : > { %v8520_v19 = vmul.f32 %v10922_v46, %v14299_v4  ;;  %v8321_v55 = vpop.f32.mrb[1].mxu1 }
 0x647   : > { %v8518_v48 = vmul.f32 %v14299_v4, %v8321_v55  ;;  %v10923_v30 = vpop.f32.mrb[2].mxu1 }
 0x648   : > { %v8558_v12 = vadd.f32 %v14305_v28, %v8520_v19  ;;  %v8521_v52 = vmul.f32 %v10923_v30, %v14299_v4  ;;  %v8324_v2 = vpop.f32.mrb[3].mxu1  ;;  %v9593_v19 = vld [vmem:[%s11913_s23 + $0x81] sm:$0xff] }
 0x649   : > { %v8556_v26 = vadd.f32 %v14305_v28, %v8518_v48  ;;  %v8519_v37 = vmul.f32 %v14299_v4, %v8324_v2 }
 0x64a   : > { %v8590_v10 = vadd.f32 %v9586_v22, %v8558_v12  ;;  %v8559_v29 = vadd.f32 %v14305_v28, %v8521_v52 }
 0x64b   : > { %v8588_v57 = vadd.f32 %v9584_v7, %v8556_v26  ;;  %v8557_v23 = vadd.f32 %v14305_v28, %v8519_v37 }
 0x64c   : > { %v8622_v51 = vmax.f32 %v8590_v10, 0.0  ;;  %v8591_v53 = vadd.f32 %v9587_v9, %v8559_v29  ;;  %v9598_v10 = vld [vmem:[%s11913_s23 + $0xc1] sm:$0xff] }
 0x64d   : > { %v8620_v27 = vmax.f32 %v8588_v57, 0.0  ;;  %v8589_v21 = vadd.f32 %v9585_v14, %v8557_v23  ;;  %v10926_v56 = vpop.f32.mrb[4].mxu1  ;;  %v9596_v23 = vld [vmem:[%s11913_s23 + $0xa9] sm:$0xff] }
 0x64e   : > { %8654 = vst [vmem:[%s14321_s20 + $0x10] sm:$0xff] %v8622_v51  ;;  %v8623_v5 = vmax.f32 %v8591_v53, 0.0  ;;  %v8524_v31 = vmul.f32 %v10926_v56, %v14299_v4  ;;  %v8337_v1 = vpop.f32.mrb[5].mxu1 }
 0x64f   : > { %8652 = vst [vmem:[%s14321_s20] sm:$0xff] %v8620_v27  ;;  %v8621_v3 = vmax.f32 %v8589_v21, 0.0  ;;  %v8522_v47 = vmul.f32 %v14299_v4, %v8337_v1  ;;  %v10927_v33 = vpop.f32.mrb[6].mxu1  ;;  %v9599_v21 = vld [vmem:[%s11913_s23 + $0xc9] sm:$0xff]  ;;  %v9597_v1 = vld [vmem:[%s11913_s23 + $0xb1] sm:$0xff] }
 0x650   : > { %8655 = vst [vmem:[%s14321_s20 + $0x18] sm:$0xff] %v8623_v5  ;;  %v8562_v61 = vadd.f32 %v14305_v28, %v8524_v31  ;;  %v8525_v60 = vmul.f32 %v10927_v33, %v14299_v4  ;;  %v8340_v40 = vpop.f32.mrb[7].mxu1 }
 0x651   : > { %8653 = vst [vmem:[%s14321_s20 + $0x8] sm:$0xff] %v8621_v3  ;;  %v8560_v49 = vadd.f32 %v14305_v28, %v8522_v47  ;;  %v8523_v35 = vmul.f32 %v14299_v4, %v8340_v40 }
 0x652   : > { %v8594_v18 = vadd.f32 %v9590_v54, %v8562_v61  ;;  %v8563_v58 = vadd.f32 %v14305_v28, %v8525_v60 }
 0x653   : > { %v8592_v25 = vadd.f32 %v9588_v0, %v8560_v49  ;;  %v8561_v16 = vadd.f32 %v14305_v28, %v8523_v35 }
 0x654   : > { %v8626_v17 = vmax.f32 %v8594_v18, 0.0  ;;  %v8595_v11 = vadd.f32 %v9591_v50, %v8563_v58  ;;  %v9602_v18 = vld [vmem:[%s11913_s23 + $0xf1] sm:$0xff] }
 0x655   : > { %v8624_v38 = vmax.f32 %v8592_v25, 0.0  ;;  %v8593_v32 = vadd.f32 %v9589_v39, %v8561_v16  ;;  %v10930_v62 = vpop.f32.mrb[8].mxu1  ;;  %v9600_v16 = vld [vmem:[%s11913_s23 + $0xd9] sm:$0xff] }
 0x656   : > { %8658 = vst [vmem:[%s14321_s20 + $0x30] sm:$0xff] %v8626_v17  ;;  %v8627_v6 = vmax.f32 %v8595_v11, 0.0  ;;  %v8528_v24 = vmul.f32 %v10930_v62, %v14299_v4  ;;  %v8353_v15 = vpop.f32.mrb[9].mxu1 }
 0x657   : > { %8656 = vst [vmem:[%s14321_s20 + $0x20] sm:$0xff] %v8624_v38  ;;  %v8625_v20 = vmax.f32 %v8593_v32, 0.0  ;;  %v8526_v63 = vmul.f32 %v14299_v4, %v8353_v15  ;;  %v10931_v36 = vpop.f32.mrb[10].mxu1  ;;  %v9603_v32 = vld [vmem:[%s11913_s23 + $0xf9] sm:$0xff]  ;;  %v9601_v15 = vld [vmem:[%s11913_s23 + $0xe1] sm:$0xff] }
 0x658   : > { %8659 = vst [vmem:[%s14321_s20 + $0x38] sm:$0xff] %v8627_v6  ;;  %v8566_v13 = vadd.f32 %v14305_v28, %v8528_v24  ;;  %v8529_v59 = vmul.f32 %v10931_v36, %v14299_v4  ;;  %v8356_v8 = vpop.f32.mrb[11].mxu1 }
 0x659   : > { %8657 = vst [vmem:[%s14321_s20 + $0x28] sm:$0xff] %v8625_v20  ;;  %v8564_v43 = vadd.f32 %v14305_v28, %v8526_v63  ;;  %v8527_v34 = vmul.f32 %v14299_v4, %v8356_v8 }
 0x65a   : > { %v8598_v42 = vadd.f32 %v9594_v45, %v8566_v13  ;;  %v8567_v46 = vadd.f32 %v14305_v28, %v8529_v59 }
 0x65b   : > { %v8596_v55 = vadd.f32 %v9592_v44, %v8564_v43  ;;  %v8565_v22 = vadd.f32 %v14305_v28, %v8527_v34 }
 0x65c   : > { %v8630_v48 = vmax.f32 %v8598_v42, 0.0  ;;  %v8599_v30 = vadd.f32 %v9595_v41, %v8567_v46  ;;  %v9606_v42 = vld [vmem:[%s11913_s23 + $0x121] sm:$0xff] }
 0x65d   : > { %v8628_v12 = vmax.f32 %v8596_v55, 0.0  ;;  %v8597_v7 = vadd.f32 %v9593_v19, %v8565_v22  ;;  %v10934_v52 = vpop.f32.mrb[12].mxu1  ;;  %v9604_v22 = vld [vmem:[%s11913_s23 + $0x109] sm:$0xff] }
 0x65e   : > { %8662 = vst [vmem:[%s14321_s20 + $0x50] sm:$0xff] %v8630_v48  ;;  %v8631_v2 = vmax.f32 %v8599_v30, 0.0  ;;  %v8532_v26 = vmul.f32 %v10934_v52, %v14299_v4  ;;  %v8369_v9 = vpop.f32.mrb[13].mxu1 }
 0x65f   : > { %8660 = vst [vmem:[%s14321_s20 + $0x40] sm:$0xff] %v8628_v12  ;;  %v8629_v37 = vmax.f32 %v8597_v7, 0.0  ;;  %v8530_v29 = vmul.f32 %v14299_v4, %v8369_v9  ;;  %v10935_v14 = vpop.f32.mrb[14].mxu1  ;;  %v9607_v7 = vld [vmem:[%s11913_s23 + $0x129] sm:$0xff]  ;;  %v9605_v9 = vld [vmem:[%s11913_s23 + $0x111] sm:$0xff] }
 0x660   : > { %8663 = vst [vmem:[%s14321_s20 + $0x58] sm:$0xff] %v8631_v2  ;;  %v8570_v57 = vadd.f32 %v14305_v28, %v8532_v26  ;;  %v8533_v51 = vmul.f32 %v10935_v14, %v14299_v4  ;;  %v8372_v53 = vpop.f32.mrb[15].mxu1 }
 0x661   : > { %8661 = vst [vmem:[%s14321_s20 + $0x48] sm:$0xff] %v8629_v37  ;;  %v8568_v27 = vadd.f32 %v14305_v28, %v8530_v29  ;;  %v8531_v56 = vmul.f32 %v14299_v4, %v8372_v53 }
 0x662   : > { %v8602_v5 = vadd.f32 %v9598_v10, %v8570_v57  ;;  %v8571_v31 = vadd.f32 %v14305_v28, %v8533_v51 }
 0x663   : > { %v8600_v3 = vadd.f32 %v9596_v23, %v8568_v27  ;;  %v8569_v54 = vadd.f32 %v14305_v28, %v8531_v56 }
 0x664   : > { %v8634_v47 = vmax.f32 %v8602_v5, 0.0  ;;  %v8603_v33 = vadd.f32 %v9599_v21, %v8571_v31  ;;  %v9610_v5 = vld [vmem:[%s11913_s23 + $0x151] sm:$0xff] }
 0x665   : > { %v8632_v61 = vmax.f32 %v8600_v3, 0.0  ;;  %v8601_v0 = vadd.f32 %v9597_v1, %v8569_v54  ;;  %v10938_v60 = vpop.f32.mrb[16].mxu1  ;;  %v9608_v54 = vld [vmem:[%s11913_s23 + $0x139] sm:$0xff] }
 0x666   : > { %8666 = vst [vmem:[%s14321_s20 + $0x70] sm:$0xff] %v8634_v47  ;;  %v8635_v40 = vmax.f32 %v8603_v33, 0.0  ;;  %v8536_v49 = vmul.f32 %v10938_v60, %v14299_v4  ;;  %v8385_v50 = vpop.f32.mrb[17].mxu1 }
 0x667   : > { %8664 = vst [vmem:[%s14321_s20 + $0x60] sm:$0xff] %v8632_v61  ;;  %v8633_v35 = vmax.f32 %v8601_v0, 0.0  ;;  %v8534_v58 = vmul.f32 %v14299_v4, %v8385_v50  ;;  %v10939_v39 = vpop.f32.mrb[18].mxu1  ;;  %v9611_v0 = vld [vmem:[%s11913_s23 + $0x159] sm:$0xff]  ;;  %v9609_v50 = vld [vmem:[%s11913_s23 + $0x141] sm:$0xff] }
 0x668   : > { %8667 = vst [vmem:[%s14321_s20 + $0x78] sm:$0xff] %v8635_v40  ;;  %v8574_v25 = vadd.f32 %v14305_v28, %v8536_v49  ;;  %v8537_v17 = vmul.f32 %v10939_v39, %v14299_v4  ;;  %v8388_v11 = vpop.f32.mrb[19].mxu1 }
 0x669   : > { %8665 = vst [vmem:[%s14321_s20 + $0x68] sm:$0xff] %v8633_v35  ;;  %v8572_v38 = vadd.f32 %v14305_v28, %v8534_v58  ;;  %v8535_v62 = vmul.f32 %v14299_v4, %v8388_v11 }
 0x66a   : > { %v8606_v6 = vadd.f32 %v9602_v18, %v8574_v25  ;;  %v8575_v24 = vadd.f32 %v14305_v28, %v8537_v17 }
 0x66b   : > { %v8604_v20 = vadd.f32 %v9600_v16, %v8572_v38  ;;  %v8573_v45 = vadd.f32 %v14305_v28, %v8535_v62 }
 0x66c   : > { %v8638_v63 = vmax.f32 %v8606_v6, 0.0  ;;  %v8607_v36 = vadd.f32 %v9603_v32, %v8575_v24  ;;  %v9614_v6 = vld [vmem:[%s11913_s23 + $0x181] sm:$0xff] }
 0x66d   : > { %v8636_v13 = vmax.f32 %v8604_v20, 0.0  ;;  %v8605_v44 = vadd.f32 %v9601_v15, %v8573_v45  ;;  %v10942_v59 = vpop.f32.mrb[20].mxu1  ;;  %v9612_v45 = vld [vmem:[%s11913_s23 + $0x169] sm:$0xff] }
 0x66e   : > { %8670 = vst [vmem:[%s14321_s20 + $0x90] sm:$0xff] %v8638_v63  ;;  %v8639_v8 = vmax.f32 %v8607_v36, 0.0  ;;  %v8540_v43 = vmul.f32 %v10942_v59, %v14299_v4  ;;  %v8401_v41 = vpop.f32.mrb[21].mxu1 }
 0x66f   : > { %8668 = vst [vmem:[%s14321_s20 + $0x80] sm:$0xff] %v8636_v13  ;;  %v8637_v34 = vmax.f32 %v8605_v44, 0.0  ;;  %v8538_v46 = vmul.f32 %v14299_v4, %v8401_v41  ;;  %v10943_v19 = vpop.f32.mrb[22].mxu1  ;;  %v9615_v44 = vld [vmem:[%s11913_s23 + $0x189] sm:$0xff]  ;;  %v9613_v41 = vld [vmem:[%s11913_s23 + $0x171] sm:$0xff]  ;;  %s11743_s23 = scalar_lea.vmem %s14443_s22, 4096 }
 0x670   : > { %8671 = vst [vmem:[%s14321_s20 + $0x98] sm:$0xff] %v8639_v8  ;;  %v8578_v55 = vadd.f32 %v14305_v28, %v8540_v43  ;;  %v8541_v48 = vmul.f32 %v10943_v19, %v14299_v4  ;;  %v8404_v30 = vpop.f32.mrb[23].mxu1  ;;  %p11744_p11 = scmp.ne.s32.totalorder %s14443_s22, %s11743_s23  ;;  %p11751_p1 = scmp.lt.s32.totalorder %s11749_s15, %s11743_s23 }
 0x671   : > { %8669 = vst [vmem:[%s14321_s20 + $0x88] sm:$0xff] %v8637_v34  ;;  %v8576_v12 = vadd.f32 %v14305_v28, %v8538_v46  ;;  %v8539_v52 = vmul.f32 %v14299_v4, %v8404_v30 }
 0x672   : > { %v8610_v2 = vadd.f32 %v9606_v42, %v8578_v55  ;;  %v8579_v26 = vadd.f32 %v14305_v28, %v8541_v48  ;;  %p11745_p12 = pnand %p11744_p11, %p11889_p5  ;;  %p11752_p2 = por %p11751_p1, %p11750_p0 }
 0x673   : > { %v8608_v37 = vadd.f32 %v9604_v22, %v8576_v12  ;;  %v8577_v10 = vadd.f32 %v14305_v28, %v8539_v52 }
 0x674   : > { %v8642_v29 = vmax.f32 %v8610_v2, 0.0  ;;  %v8611_v14 = vadd.f32 %v9607_v7, %v8579_v26  ;;  %p11746_p13 = pneg %p11745_p12 }
 0x675   : > { %v8640_v57 = vmax.f32 %v8608_v37, 0.0  ;;  %v8609_v23 = vadd.f32 %v9605_v9, %v8577_v10  ;;  %v10946_v51 = vpop.f32.mrb[24].mxu1 }
 0x676   : > { %8674 = vst [vmem:[%s14321_s20 + $0xb0] sm:$0xff] %v8642_v29  ;;  %v8643_v53 = vmax.f32 %v8611_v14, 0.0  ;;  %v8544_v27 = vmul.f32 %v10946_v51, %v14299_v4  ;;  %v8417_v21 = vpop.f32.mrb[25].mxu1  ;;  %p11753_p3 = pnand %p11752_p2, %p11746_p13 }
 0x677   : > { %8672 = vst [vmem:[%s14321_s20 + $0xa0] sm:$0xff] %v8640_v57  ;;  %v8641_v56 = vmax.f32 %v8609_v23, 0.0  ;;  %v8542_v31 = vmul.f32 %v14299_v4, %v8417_v21  ;;  %v10947_v1 = vpop.f32.mrb[26].mxu1 }
 0x678   : > { %8675 = vst [vmem:[%s14321_s20 + $0xb8] sm:$0xff] %v8643_v53  ;;  %v8582_v3 = vadd.f32 %v14305_v28, %v8544_v27  ;;  %v8545_v47 = vmul.f32 %v10947_v1, %v14299_v4  ;;  %v8420_v33 = vpop.f32.mrb[27].mxu1 }
 0x679   : > { %8673 = vst [vmem:[%s14321_s20 + $0xa8] sm:$0xff] %v8641_v56  ;;  %v8580_v61 = vadd.f32 %v14305_v28, %v8542_v31  ;;  %v8543_v60 = vmul.f32 %v14299_v4, %v8420_v33 }
 0x67a   : > { %v8614_v40 = vadd.f32 %v9610_v5, %v8582_v3  ;;  %v8583_v49 = vadd.f32 %v14305_v28, %v8545_v47 }
 0x67b   : > { %v8612_v35 = vadd.f32 %v9608_v54, %v8580_v61  ;;  %v8581_v18 = vadd.f32 %v14305_v28, %v8543_v60 }
 0x67c   : > { %v8646_v58 = vmax.f32 %v8614_v40, 0.0  ;;  %v8615_v39 = vadd.f32 %v9611_v0, %v8583_v49 }
 0x67d   : > { %v8644_v25 = vmax.f32 %v8612_v35, 0.0  ;;  %v8613_v16 = vadd.f32 %v9609_v50, %v8581_v18  ;;  %v10950_v17 = vpop.f32.mrb[28].mxu1 }
 0x67e   : > { %8678 = vst [vmem:[%s14321_s20 + $0xd0] sm:$0xff] %v8646_v58  ;;  %v8647_v11 = vmax.f32 %v8615_v39, 0.0  ;;  %v8548_v38 = vmul.f32 %v10950_v17, %v14299_v4  ;;  %v8433_v32 = vpop.f32.mrb[29].mxu1 }
 0x67f   : > { %8676 = vst [vmem:[%s14321_s20 + $0xc0] sm:$0xff] %v8644_v25  ;;  %v8645_v62 = vmax.f32 %v8613_v16, 0.0  ;;  %v8546_v24 = vmul.f32 %v14299_v4, %v8433_v32  ;;  %v10951_v15 = vpop.f32.mrb[30].mxu1 }
 0x680   : > { %8679 = vst [vmem:[%s14321_s20 + $0xd8] sm:$0xff] %v8647_v11  ;;  %v8586_v20 = vadd.f32 %v14305_v28, %v8548_v38  ;;  %v8549_v63 = vmul.f32 %v10951_v15, %v14299_v4  ;;  %v8436_v36 = vpop.f32.mrb[31].mxu1 }
 0x681   : > { %8677 = vst [vmem:[%s14321_s20 + $0xc8] sm:$0xff] %v8645_v62  ;;  %v8584_v13 = vadd.f32 %v14305_v28, %v8546_v24  ;;  %v8547_v59 = vmul.f32 %v14299_v4, %v8436_v36 }
 0x682   : > { %v8618_v8 = vadd.f32 %v9614_v6, %v8586_v20  ;;  %v8587_v43 = vadd.f32 %v14305_v28, %v8549_v63 }
 0x683   : > { %v8616_v34 = vadd.f32 %v9612_v45, %v8584_v13  ;;  %v8585_v42 = vadd.f32 %v14305_v28, %v8547_v59 }
 0x684   : > { %v8650_v46 = vmax.f32 %v8618_v8, 0.0  ;;  %v8619_v19 = vadd.f32 %v9615_v44, %v8587_v43 }
 0x685   : > { %v8648_v55 = vmax.f32 %v8616_v34, 0.0  ;;  %v8617_v22 = vadd.f32 %v9613_v41, %v8585_v42 }
 0x686   : > { %8682 = vst [vmem:[%s14321_s20 + $0xf0] sm:$0xff] %v8650_v46  ;;  %v8651_v4 = vmax.f32 %v8619_v19, 0.0 }
 0x687   : > { %8680 = vst [vmem:[%s14321_s20 + $0xe0] sm:$0xff] %v8648_v55  ;;  %v8649_v28 = vmax.f32 %v8617_v22, 0.0 }
 0x688   : > { %8683 = vst [vmem:[%s14321_s20 + $0xf8] sm:$0xff] %v8651_v4 }
 0x689   : > { %8681 = vst [vmem:[%s14321_s20 + $0xe8] sm:$0xff] %v8649_v28 }
 0x68a   : > { %11756 = shalt.err (!%p11753_p3)
}
 0x68b   : > { %s11757_s16 = scalar_lea.hbm %s14441_s9, 4096  ;;  %s11761_s19 = scalar_lea.hbm %s14498_s7, 8192 }
 0x68c   : > { %p11758_p4 = scmp.ne.s32.totalorder %s14441_s9, %s11757_s16  ;;  %p11762_p9 = scmp.lt.u32.totalorder %s14441_s9, %s14498_s7 }
 0x68d   : > { %p11763_p10 = scmp.lt.u32.totalorder %s11761_s19, %s11757_s16  ;;  %p11765_p12 = scmp.lt.u32.totalorder %s11757_s16, %s14441_s9 }
 0x68e   : > { %p11759_p7 = pnand %p11758_p4, %p11889_p5 }
 0x68f   : > { %p11764_p11 = por %p11763_p10, %p11762_p9 }
 0x690   : > { %p11760_p8 = pneg %p11759_p7 }
 0x691   : > { %p11766_p13 = por %p11765_p12, %p11764_p11 }
 0x693   : > { %p11767_p0 = pnand %p11766_p13, %p11760_p8 }
 0x695   : > { %11770 = shalt.err (!%p11767_p0)
}
 0x696   : > { %s11809_s29 = smov 128   ;;  %s11810_s8 = smov 8  }
 0x697   : > { %11465 = dma.vmem_to_hbm [thread:$0]  (%p11889_p5), %s14443_s22, 4096, %s14441_s9, %s14450_s28, %s11809_s29, %s11809_s29, %s11810_s8  }
 0x698 PF: > { %p11471_p1 = scmp.ge.s32.totalorder %s11805_s27, 2  ;;  %s8713_s23 = sand.u32 1, %s11793_s24  }
 0x699   : > { %s8714_s13 = scalar_lea.sflag [#allocation4], %s8713_s23 }
 0x69a   : > { %p11468_p2 = pnand %p11471_p1, %p11893_p6 }
 0x69c   : > { %11788 = dma.done.wait (!%p11468_p2), %s8714_s13, 4096  }
 0x69d   : > { %11790 = vsyncadd (!%p11468_p2), %s8714_s13, 4294963200  ;;  %p17_p3 = scmp.ge.s32.totalorder %s11876_s30, 4   ;;  %s14725_s24 = smov %s11797_s25 }
 0x69e   : > { %s14726_s25 = smov %s11801_s26  ;;  %s14727_s26 = smov %s11887_s10 }
 0x69f   : > { %s14728_s27 = smov %s11876_s30  ;;  %19 = sbr.rel (!%p17_p3) target bundleno = 3 (0x3), region = 103 }
 0x6a6   :  { %8719 = vsyncpa [#allocation4], 1 }
 0x6a7   :  { %8721 = vsyncpa [#allocation4 + $0x1], 1 }

</bundles_post_ra>
